<compile_context>
chip_gen: v7x
topology: tpu7x:2x2x1
jax: 0.10.0
libtpu: 0.0.40
codegen_flags: <defaults>
</compile_context>

<pallas_src>
import jax
import jax.numpy as jnp
from jax import lax
from jax.experimental import pallas as pl
from jax.experimental.pallas import tpu as pltpu

HIDDEN = 64
LAYERS = 3
INPUT_DIM = 1
MLP_PAD = 128                                   # lane-padded width of MLP outputs
BLOCK = ((3 * HIDDEN + 127) // 128) * 128       # 256: lane-aligned per-gate block
STEP_W = 4 * BLOCK                              # 1024: [r | z | gh_n | gi_n]


def _make_kernel(T, Bp):
    H = HIDDEN
    SW = LAYERS * H            # 192: packed state width [h0 | h1 | h2]
    BS = BLOCK                 # 256
    unroll = T if T <= 16 else 4

    def kernel(x_ref, w0_row_ref, bias_all_ref, w_step_ref,
               w1_ref, b1_ref, w2_ref, b2_ref, w3_ref, b3_ref, w4_ref, b4_ref,
               out_ref, gi0_ref, seq2_ref):
        f32 = jnp.float32
        bf16 = jnp.bfloat16

        # Layer-0 input projection (+ every GRU bias, kept in f32) for all (t, b)
        # rows at once.  input_dim == 1 so it is a broadcasted FMA, not a matmul.
        gi0_ref[...] = x_ref[...] * w0_row_ref[...] + bias_all_ref[...]

        def wave_step(h_state, gi0_row):
            # h_state: (Bp, 3H) packed [h0 | h1 | h2], f32.
            gi0 = gi0_ref[pl.ds(gi0_row, Bp), :]                     # (Bp, 1024) f32
            mm = jnp.dot(h_state.astype(bf16), w_step_ref[...],
                         preferred_element_type=f32)                 # (Bp, 1024) f32
            pre = mm + gi0                                           # biases folded in
            rz = jax.nn.sigmoid(pre[:, :2 * BS])                     # r | z blocks
            r = rz[:, 0:SW]                                          # (Bp, 192)
            z = rz[:, BS:BS + SW]                                    # (Bp, 192)
            n = jnp.tanh(pre[:, 3 * BS:3 * BS + SW] +
                         r * pre[:, 2 * BS:2 * BS + SW])             # gi_n + r*gh_n
            return n + z * (h_state - n)                             # == (1-z)*n + z*h

        # ---- wavefront warm-up: step s activates layers 0..s; others stay at 0.
        h_state = jnp.zeros((Bp, SW), f32)
        col = lax.broadcasted_iota(jnp.int32, (Bp, SW), 1)
        for s in range(LAYERS - 1):                                  # s = 0, 1 (static)
            h_new = wave_step(h_state, min(s, T - 1) * Bp)
            h_state = jnp.where(col < (s + 1) * H, h_new, h_state)

        # ---- steady wavefront: layer 0 at time s, layer 1 at s-1, layer 2 at s-2.
        def body(s, h_state):
            t0 = jnp.minimum(s, T - 1)                 # clamp after layer 0 finishes
            h_state = wave_step(h_state, pl.multiple_of(t0 * Bp, Bp))
            row2 = pl.multiple_of((s - (LAYERS - 1)) * Bp, Bp)
            seq2_ref[pl.ds(row2, Bp), :] = h_state[:, (LAYERS - 1) * H:]
            return h_state

        lax.fori_loop(LAYERS - 1, T + LAYERS - 1, body, h_state, unroll=unroll)

        # ---- MLP head (64 -> 10 -> 100 -> 10 -> 1), batched over all T*Bp rows.
        # Weights zero-padded to 128 lanes; column 0 of out_ref carries the result.
        y = seq2_ref[...]
        y = jnp.maximum(jnp.dot(y.astype(bf16), w1_ref[...],
                                preferred_element_type=f32) + b1_ref[...], 0.0)
        y = jnp.maximum(jnp.dot(y.astype(bf16), w2_ref[...],
                                preferred_element_type=f32) + b2_ref[...], 0.0)
        y = jnp.maximum(jnp.dot(y.astype(bf16), w3_ref[...],
                                preferred_element_type=f32) + b3_ref[...], 0.0)
        out_ref[...] = jnp.dot(y.astype(bf16), w4_ref[...],
                               preferred_element_type=f32) + b4_ref[...]

    return kernel


def _build_step_weights(params):
    """Pack the 3 layers' GRU weights into one wavefront step matrix.

    Column layout (width STEP_W = 4*BLOCK), each BLOCK=256 lane-aligned:
      [r(l0,l1,l2) | z(l0,l1,l2) | gh_n(l0,l1,l2) | gi_n(l0,l1,l2)]  (+ zero pad).
    Rows are the packed state [h0 | h1 | h2].  r/z columns receive BOTH the
    recurrent (W_hh) and the input (W_ih, from the previous layer's state slot)
    contributions, since they are summed before the sigmoid anyway; the n gate
    keeps gi_n and gh_n separate (r only multiplies gh_n).  All biases plus the
    layer-0 (scalar-input) projection are returned separately so they can be
    added in f32.
    """
    H = HIDDEN
    BS = BLOCK
    w_hh = [params['w_hh0'], params['w_hh12'][0], params['w_hh12'][1]]
    w_ih = [params['w_ih0'], params['w_ih12'][0], params['w_ih12'][1]]
    b_hh = [params['b_hh0'], params['b_hh12'][0], params['b_hh12'][1]]
    b_ih = [params['b_ih0'], params['b_ih12'][0], params['b_ih12'][1]]

    w_step = jnp.zeros((LAYERS * H, STEP_W), jnp.float32)
    bias = jnp.zeros((1, STEP_W), jnp.float32)
    w0_row = jnp.zeros((1, STEP_W), jnp.float32)

    def dst(gate, l):                    # gate: 0=r, 1=z, 2=gh_n, 3=gi_n
        return slice(gate * BS + l * H, gate * BS + (l + 1) * H)

    for l in range(LAYERS):
        rows = slice(l * H, (l + 1) * H)
        # recurrent (W_hh) weights; gate order in params is [r | z | n]
        w_step = w_step.at[rows, dst(0, l)].set(w_hh[l][:, 0:H])
        w_step = w_step.at[rows, dst(1, l)].set(w_hh[l][:, H:2 * H])
        w_step = w_step.at[rows, dst(2, l)].set(w_hh[l][:, 2 * H:])
        # all biases, folded in f32
        bias = bias.at[:, dst(0, l)].add(b_hh[l][:, 0:H] + b_ih[l][:, 0:H])
        bias = bias.at[:, dst(1, l)].add(b_hh[l][:, H:2 * H] + b_ih[l][:, H:2 * H])
        bias = bias.at[:, dst(2, l)].add(b_hh[l][:, 2 * H:])
        bias = bias.at[:, dst(3, l)].add(b_ih[l][:, 2 * H:])
        if l == 0:
            # layer 0 consumes the scalar input x -> broadcasted FMA row
            w0_row = w0_row.at[:, dst(0, 0)].set(w_ih[0][:, 0:H])
            w0_row = w0_row.at[:, dst(1, 0)].set(w_ih[0][:, H:2 * H])
            w0_row = w0_row.at[:, dst(3, 0)].set(w_ih[0][:, 2 * H:])
        else:
            # layers 1/2 consume h_{l-1}: rows (l-1)*H : l*H of the packed state
            prev = slice((l - 1) * H, l * H)
            w_step = w_step.at[prev, dst(0, l)].set(w_ih[l][:, 0:H])
            w_step = w_step.at[prev, dst(1, l)].set(w_ih[l][:, H:2 * H])
            w_step = w_step.at[prev, dst(3, l)].set(w_ih[l][:, 2 * H:])
    return w_step, bias, w0_row


def net2_forward(x, params):
    """x: (B, T, 1) batch-first, returns (B, T, 1)."""
    B, T, _ = x.shape
    H = HIDDEN
    Bp = max(8, ((B + 7) // 8) * 8)                           # pad batch to 8 sublanes

    # Time-major, batch-padded, flattened to (T*Bp, 1).
    xt = jnp.transpose(x.astype(jnp.float32), (1, 0, 2))      # (T, B, 1)
    xt = jnp.pad(xt, ((0, 0), (0, Bp - B), (0, 0)))           # (T, Bp, 1)
    xf = xt.reshape(T * Bp, INPUT_DIM)

    w_step, bias_all, w0_row = _build_step_weights(params)
    w_step = w_step.astype(jnp.bfloat16)                      # MXU operand in bf16

    def pad2(w, rows, cols):
        return jnp.pad(w, ((0, rows - w.shape[0]), (0, cols - w.shape[1])))

    # MLP weights zero-padded so every matmul output width is 128 (lane-dense).
    w1p = pad2(params['w1'], H, MLP_PAD).astype(jnp.bfloat16)
    w2p = pad2(params['w2'], MLP_PAD, MLP_PAD).astype(jnp.bfloat16)
    w3p = pad2(params['w3'], MLP_PAD, MLP_PAD).astype(jnp.bfloat16)
    w4p = pad2(params['w4'], MLP_PAD, MLP_PAD).astype(jnp.bfloat16)
    b1p = pad2(params['b1'], 1, MLP_PAD)
    b2p = pad2(params['b2'], 1, MLP_PAD)
    b3p = pad2(params['b3'], 1, MLP_PAD)
    b4p = pad2(params['b4'], 1, MLP_PAD)

    args = (xf, w0_row, bias_all, w_step,
            w1p, b1p, w2p, b2p, w3p, b3p, w4p, b4p)

    vmem = pl.BlockSpec(memory_space=pltpu.MemorySpace.VMEM)

    # VMEM budget: inputs + scratch (gi0, seq2) + output, with headroom, capped to
    # physical capacity minus compiler scratch (v7x only has 64 MiB per core).
    need = (sum(int(a.size) * a.dtype.itemsize for a in args)
            + 4 * T * Bp * (STEP_W + H + MLP_PAD))
    try:
        cap = int(pltpu.get_tpu_info().vmem_capacity_bytes)
    except Exception:
        cap = 64 * 2**20                                      # conservative (v7x)
    vmem_limit = int(min(cap - (16 << 20), max(32 << 20, 2 * need)))

    out = pl.pallas_call(
        _make_kernel(T, Bp),
        out_shape=jax.ShapeDtypeStruct((T * Bp, MLP_PAD), jnp.float32),
        in_specs=[vmem] * len(args),
        out_specs=vmem,
        scratch_shapes=[
            pltpu.VMEM((T * Bp, STEP_W), jnp.float32),   # layer-0 proj + all biases
            pltpu.VMEM((T * Bp, H), jnp.float32),        # last GRU layer's sequence
        ],
        compiler_params=pltpu.CompilerParams(vmem_limit_bytes=vmem_limit),
    )(*args)

    y = out[:, 0].reshape(T, Bp)[:, :B]                  # (T, B) — drop batch padding
    return jnp.transpose(y, (1, 0))[:, :, None]          # back to (B, T, 1)


def init_params(key):
    """Deterministic synthetic init (uniform +-1/sqrt(fan_in), like PyTorch)."""
    H = HIDDEN
    ks = jax.random.split(key, 16)

    def u(k, shape, bound):
        return jax.random.uniform(k, shape, jnp.float32, -bound, bound)

    kg = 1.0 / float(jnp.sqrt(H))
    params = {
        # GRU layer 0 (input dim 1). Gate order r,z,n packed along last axis.
        'w_ih0': u(ks[0], (INPUT_DIM, 3 * H), kg),
        'w_hh0': u(ks[1], (H, 3 * H), kg),
        'b_ih0': u(ks[2], (1, 3 * H), kg),
        'b_hh0': u(ks[3], (1, 3 * H), kg),
        # GRU layers 1-2 stacked.
        'w_ih12': u(ks[4], (LAYERS - 1, H, 3 * H), kg),
        'w_hh12': u(ks[5], (LAYERS - 1, H, 3 * H), kg),
        'b_ih12': u(ks[6], (LAYERS - 1, 1, 3 * H), kg),
        'b_hh12': u(ks[7], (LAYERS - 1, 1, 3 * H), kg),
        # MLP head: Linear(64,10) ReLU Linear(10,100) ReLU Linear(100,10) ReLU Linear(10,1)
        'w1': u(ks[8], (H, 10), 1.0 / float(jnp.sqrt(H))),
        'b1': u(ks[9], (1, 10), 1.0 / float(jnp.sqrt(H))),
        'w2': u(ks[10], (10, 100), 1.0 / float(jnp.sqrt(10))),
        'b2': u(ks[11], (1, 100), 1.0 / float(jnp.sqrt(10))),
        'w3': u(ks[12], (100, 10), 1.0 / float(jnp.sqrt(100))),
        'b3': u(ks[13], (1, 10), 1.0 / float(jnp.sqrt(100))),
        'w4': u(ks[14], (10, 1), 1.0 / float(jnp.sqrt(10))),
        'b4': u(ks[15], (1, 1), 1.0 / float(jnp.sqrt(10))),
    }
    return params


def net2_reference(x, params):
    """Pure-JAX f32 reference matching torch.nn.GRU(batch_first=True) + MLP head."""
    B, T, _ = x.shape
    H = HIDDEN

    def gru_layer(inp, w_ih, w_hh, b_ih, b_hh):
        def step(h, x_t):
            gi = x_t @ w_ih + b_ih
            gh = h @ w_hh + b_hh
            r = jax.nn.sigmoid(gi[:, 0:H] + gh[:, 0:H])
            z = jax.nn.sigmoid(gi[:, H:2 * H] + gh[:, H:2 * H])
            n = jnp.tanh(gi[:, 2 * H:] + r * gh[:, 2 * H:])
            h_new = (1.0 - z) * n + z * h
            return h_new, h_new
        h0 = jnp.zeros((B, H), jnp.float32)
        _, ys = lax.scan(step, h0, jnp.transpose(inp, (1, 0, 2)))
        return jnp.transpose(ys, (1, 0, 2))                 # (B, T, H)

    out = gru_layer(x, params['w_ih0'], params['w_hh0'],
                    params['b_ih0'], params['b_hh0'])
    for l in range(LAYERS - 1):
        out = gru_layer(out, params['w_ih12'][l], params['w_hh12'][l],
                        params['b_ih12'][l], params['b_hh12'][l])
    y = jnp.maximum(out @ params['w1'] + params['b1'], 0.0)
    y = jnp.maximum(y @ params['w2'] + params['b2'], 0.0)
    y = jnp.maximum(y @ params['w3'] + params['b3'], 0.0)
    y = y @ params['w4'] + params['b4']
    return y


if __name__ == "__main__":
    key = jax.random.PRNGKey(0)
    pkey, xkey = jax.random.split(key)
    params = init_params(pkey)

    B, T = 2, 8                                            # small seq of scalar samples
    x = jax.random.normal(xkey, (B, T, 1), dtype=jnp.float32)

    y = net2_forward(x, params)
    jax.block_until_ready(y)
    assert y.shape == (B, T, 1), y.shape

    y_ref = net2_reference(x, params)
    err = float(jnp.max(jnp.abs(y - y_ref)))
    # Kernel uses bf16 MXU operands (f32 accumulation) vs. the pure-f32 reference.
    assert jnp.allclose(y, y_ref, rtol=2e-2, atol=2e-2), err

    print("KERNEL_OK")
</pallas_src>

<mosaic_0001>
module attributes {stable_mosaic.version = 11 : i64} {
  func.func @kernel(%arg0: memref<64x1xf32, #tpu.memory_space<vmem>>, %arg1: memref<1x1024xf32, #tpu.memory_space<vmem>>, %arg2: memref<1x1024xf32, #tpu.memory_space<vmem>>, %arg3: memref<192x1024xbf16, #tpu.memory_space<vmem>>, %arg4: memref<64x128xbf16, #tpu.memory_space<vmem>>, %arg5: memref<1x128xf32, #tpu.memory_space<vmem>>, %arg6: memref<128x128xbf16, #tpu.memory_space<vmem>>, %arg7: memref<1x128xf32, #tpu.memory_space<vmem>>, %arg8: memref<128x128xbf16, #tpu.memory_space<vmem>>, %arg9: memref<1x128xf32, #tpu.memory_space<vmem>>, %arg10: memref<128x128xbf16, #tpu.memory_space<vmem>>, %arg11: memref<1x128xf32, #tpu.memory_space<vmem>>, %arg12: memref<64x128xf32, #tpu.memory_space<vmem>>, %arg13: memref<64x1024xf32, #tpu.memory_space<vmem>>, %arg14: memref<64x64xf32, #tpu.memory_space<vmem>>) attributes {dimension_semantics = [], scalar_prefetch = 0 : i64, scratch_operands = 2 : i64, tpu.core_type = #tpu.core_type<tc>} {
    %c0 = arith.constant 0 : index
    %c0_0 = arith.constant 0 : index
    %0 = vector.load %arg0[%c0, %c0_0] : memref<64x1xf32, #tpu.memory_space<vmem>>, vector<64x1xf32>
    %c0_1 = arith.constant 0 : index
    %c0_2 = arith.constant 0 : index
    %1 = vector.load %arg1[%c0_1, %c0_2] : memref<1x1024xf32, #tpu.memory_space<vmem>>, vector<1x1024xf32>
    %2 = vector.broadcast %0 : vector<64x1xf32> to vector<64x1024xf32>
    %3 = vector.broadcast %1 : vector<1x1024xf32> to vector<64x1024xf32>
    %4 = arith.mulf %2, %3 : vector<64x1024xf32>
    %c0_3 = arith.constant 0 : index
    %c0_4 = arith.constant 0 : index
    %5 = vector.load %arg2[%c0_3, %c0_4] : memref<1x1024xf32, #tpu.memory_space<vmem>>, vector<1x1024xf32>
    %6 = vector.broadcast %5 : vector<1x1024xf32> to vector<64x1024xf32>
    %7 = arith.addf %4, %6 : vector<64x1024xf32>
    %c0_5 = arith.constant 0 : index
    %c0_6 = arith.constant 0 : index
    %8 = vector.load %arg13[%c0_5, %c0_6] : memref<64x1024xf32, #tpu.memory_space<vmem>>, vector<64x1024xf32>
    tpu.vector_store %arg13[%c0_5, %c0_6], %7 {strides = array<i32>} : memref<64x1024xf32, #tpu.memory_space<vmem>>, vector<64x1024xf32>,
    %cst = arith.constant 0.000000e+00 : f32
    %9 = vector.broadcast %cst : f32 to vector<8x192xf32>
    %10 = tpu.iota {dimensions = array<i32: 1>} : vector<8x192xi32>
    %c0_7 = arith.constant 0 : index
    %c0_8 = arith.constant 0 : index
    %11 = vector.load %arg13[%c0_7, %c0_8] : memref<64x1024xf32, #tpu.memory_space<vmem>>, vector<8x1024xf32>
    %12 = arith.truncf %9 : vector<8x192xf32> to vector<8x192xbf16>
    %c0_9 = arith.constant 0 : index
    %c0_10 = arith.constant 0 : index
    %13 = vector.load %arg3[%c0_9, %c0_10] : memref<192x1024xbf16, #tpu.memory_space<vmem>>, vector<192x1024xbf16>
    %cst_11 = arith.constant dense<0.000000e+00> : vector<8x1024xf32>
    %14 = tpu.matmul %12, %13, %cst_11 {dimension_numbers = #tpu.dot_dimension_numbers<[1], [0], [0], [1], [0, 0, 1, 1], [], []>} : vector<8x192xbf16>, vector<192x1024xbf16>, vector<8x1024xf32> -> vector<8x1024xf32>
    %15 = arith.addf %14, %11 : vector<8x1024xf32>
    %16 = vector.extract_strided_slice %15 {offsets = [0, 0], sizes = [8, 512], strides = [1, 1]} : vector<8x1024xf32> to vector<8x512xf32>
    %17 = arith.negf %16 : vector<8x512xf32>
    %18 = math.exp %17 : vector<8x512xf32>
    %cst_12 = arith.constant 1.000000e+00 : f32
    %19 = vector.broadcast %cst_12 : f32 to vector<8x512xf32>
    %20 = arith.addf %19, %18 : vector<8x512xf32>
    %21 = arith.divf %19, %20 : vector<8x512xf32>
    %22 = vector.extract_strided_slice %21 {offsets = [0, 0], sizes = [8, 192], strides = [1, 1]} : vector<8x512xf32> to vector<8x192xf32>
    %23 = vector.extract_strided_slice %21 {offsets = [0, 256], sizes = [8, 192], strides = [1, 1]} : vector<8x512xf32> to vector<8x192xf32>
    %24 = vector.extract_strided_slice %15 {offsets = [0, 768], sizes = [8, 192], strides = [1, 1]} : vector<8x1024xf32> to vector<8x192xf32>
    %25 = vector.extract_strided_slice %15 {offsets = [0, 512], sizes = [8, 192], strides = [1, 1]} : vector<8x1024xf32> to vector<8x192xf32>
    %26 = arith.mulf %22, %25 : vector<8x192xf32>
    %27 = arith.addf %24, %26 : vector<8x192xf32>
    %28 = math.tanh %27 : vector<8x192xf32>
    %29 = arith.subf %9, %28 : vector<8x192xf32>
    %30 = arith.mulf %23, %29 : vector<8x192xf32>
    %31 = arith.addf %28, %30 : vector<8x192xf32>
    %c64_i32 = arith.constant 64 : i32
    %32 = vector.broadcast %c64_i32 : i32 to vector<8x192xi32>
    %33 = arith.cmpi slt, %10, %32 : vector<8x192xi32>
    %34 = arith.select %33, %31, %9 : vector<8x192xi1>, vector<8x192xf32>
    %c8 = arith.constant 8 : index
    %c0_13 = arith.constant 0 : index
    %35 = vector.load %arg13[%c8, %c0_13] : memref<64x1024xf32, #tpu.memory_space<vmem>>, vector<8x1024xf32>
    %36 = arith.truncf %34 : vector<8x192xf32> to vector<8x192xbf16>
    %c0_14 = arith.constant 0 : index
    %c0_15 = arith.constant 0 : index
    %37 = vector.load %arg3[%c0_14, %c0_15] : memref<192x1024xbf16, #tpu.memory_space<vmem>>, vector<192x1024xbf16>
    %cst_16 = arith.constant dense<0.000000e+00> : vector<8x1024xf32>
    %38 = tpu.matmul %36, %37, %cst_16 {dimension_numbers = #tpu.dot_dimension_numbers<[1], [0], [0], [1], [0, 0, 1, 1], [], []>} : vector<8x192xbf16>, vector<192x1024xbf16>, vector<8x1024xf32> -> vector<8x1024xf32>
    %39 = arith.addf %38, %35 : vector<8x1024xf32>
    %40 = vector.extract_strided_slice %39 {offsets = [0, 0], sizes = [8, 512], strides = [1, 1]} : vector<8x1024xf32> to vector<8x512xf32>
    %41 = arith.negf %40 : vector<8x512xf32>
    %42 = math.exp %41 : vector<8x512xf32>
    %cst_17 = arith.constant 1.000000e+00 : f32
    %43 = vector.broadcast %cst_17 : f32 to vector<8x512xf32>
    %44 = arith.addf %43, %42 : vector<8x512xf32>
    %45 = arith.divf %43, %44 : vector<8x512xf32>
    %46 = vector.extract_strided_slice %45 {offsets = [0, 0], sizes = [8, 192], strides = [1, 1]} : vector<8x512xf32> to vector<8x192xf32>
    %47 = vector.extract_strided_slice %45 {offsets = [0, 256], sizes = [8, 192], strides = [1, 1]} : vector<8x512xf32> to vector<8x192xf32>
    %48 = vector.extract_strided_slice %39 {offsets = [0, 768], sizes = [8, 192], strides = [1, 1]} : vector<8x1024xf32> to vector<8x192xf32>
    %49 = vector.extract_strided_slice %39 {offsets = [0, 512], sizes = [8, 192], strides = [1, 1]} : vector<8x1024xf32> to vector<8x192xf32>
    %50 = arith.mulf %46, %49 : vector<8x192xf32>
    %51 = arith.addf %48, %50 : vector<8x192xf32>
    %52 = math.tanh %51 : vector<8x192xf32>
    %53 = arith.subf %34, %52 : vector<8x192xf32>
    %54 = arith.mulf %47, %53 : vector<8x192xf32>
    %55 = arith.addf %52, %54 : vector<8x192xf32>
    %c128_i32 = arith.constant 128 : i32
    %56 = vector.broadcast %c128_i32 : i32 to vector<8x192xi32>
    %57 = arith.cmpi slt, %10, %56 : vector<8x192xi32>
    %58 = arith.select %57, %55, %34 : vector<8x192xi1>, vector<8x192xf32>
    %c2_i32 = arith.constant 2 : i32
    %c7_i32 = arith.constant 7 : i32
    %59 = arith.minsi %c2_i32, %c7_i32 : i32
    %c8_i32 = arith.constant 8 : i32
    %60 = arith.muli %59, %c8_i32 : i32
    %61 = tpu.assume_multiple %60, 8 : i32
    %62 = arith.index_cast %61 : i32 to index
    %c0_18 = arith.constant 0 : index
    %63 = vector.load %arg13[%62, %c0_18] : memref<64x1024xf32, #tpu.memory_space<vmem>>, vector<8x1024xf32>
    %64 = arith.truncf %58 : vector<8x192xf32> to vector<8x192xbf16>
    %c0_19 = arith.constant 0 : index
    %c0_20 = arith.constant 0 : index
    %65 = vector.load %arg3[%c0_19, %c0_20] : memref<192x1024xbf16, #tpu.memory_space<vmem>>, vector<192x1024xbf16>
    %cst_21 = arith.constant dense<0.000000e+00> : vector<8x1024xf32>
    %66 = tpu.matmul %64, %65, %cst_21 {dimension_numbers = #tpu.dot_dimension_numbers<[1], [0], [0], [1], [0, 0, 1, 1], [], []>} : vector<8x192xbf16>, vector<192x1024xbf16>, vector<8x1024xf32> -> vector<8x1024xf32>
    %67 = arith.addf %66, %63 : vector<8x1024xf32>
    %68 = vector.extract_strided_slice %67 {offsets = [0, 0], sizes = [8, 512], strides = [1, 1]} : vector<8x1024xf32> to vector<8x512xf32>
    %69 = arith.negf %68 : vector<8x512xf32>
    %70 = math.exp %69 : vector<8x512xf32>
    %cst_22 = arith.constant 1.000000e+00 : f32
    %71 = vector.broadcast %cst_22 : f32 to vector<8x512xf32>
    %72 = arith.addf %71, %70 : vector<8x512xf32>
    %73 = arith.divf %71, %72 : vector<8x512xf32>
    %74 = vector.extract_strided_slice %73 {offsets = [0, 0], sizes = [8, 192], strides = [1, 1]} : vector<8x512xf32> to vector<8x192xf32>
    %75 = vector.extract_strided_slice %73 {offsets = [0, 256], sizes = [8, 192], strides = [1, 1]} : vector<8x512xf32> to vector<8x192xf32>
    %76 = vector.extract_strided_slice %67 {offsets = [0, 768], sizes = [8, 192], strides = [1, 1]} : vector<8x1024xf32> to vector<8x192xf32>
    %77 = vector.extract_strided_slice %67 {offsets = [0, 512], sizes = [8, 192], strides = [1, 1]} : vector<8x1024xf32> to vector<8x192xf32>
    %78 = arith.mulf %74, %77 : vector<8x192xf32>
    %79 = arith.addf %76, %78 : vector<8x192xf32>
    %80 = math.tanh %79 : vector<8x192xf32>
    %81 = arith.subf %58, %80 : vector<8x192xf32>
    %82 = arith.mulf %75, %81 : vector<8x192xf32>
    %83 = arith.addf %80, %82 : vector<8x192xf32>
    %c2_i32_23 = arith.constant 2 : i32
    %84 = arith.subi %c2_i32, %c2_i32_23 : i32
    %c8_i32_24 = arith.constant 8 : i32
    %85 = arith.muli %84, %c8_i32_24 : i32
    %86 = tpu.assume_multiple %85, 8 : i32
    %87 = vector.extract_strided_slice %83 {offsets = [0, 128], sizes = [8, 64], strides = [1, 1]} : vector<8x192xf32> to vector<8x64xf32>
    %88 = arith.index_cast %86 : i32 to index
    %c0_25 = arith.constant 0 : index
    %89 = vector.load %arg14[%88, %c0_25] : memref<64x64xf32, #tpu.memory_space<vmem>>, vector<8x64xf32>
    tpu.vector_store %arg14[%88, %c0_25], %87 {strides = array<i32>} : memref<64x64xf32, #tpu.memory_space<vmem>>, vector<8x64xf32>,
    %c3_i32 = arith.constant 3 : i32
    %c7_i32_26 = arith.constant 7 : i32
    %90 = arith.minsi %c3_i32, %c7_i32_26 : i32
    %c8_i32_27 = arith.constant 8 : i32
    %91 = arith.muli %90, %c8_i32_27 : i32
    %92 = tpu.assume_multiple %91, 8 : i32
    %93 = arith.index_cast %92 : i32 to index
    %c0_28 = arith.constant 0 : index
    %94 = vector.load %arg13[%93, %c0_28] : memref<64x1024xf32, #tpu.memory_space<vmem>>, vector<8x1024xf32>
    %95 = arith.truncf %83 : vector<8x192xf32> to vector<8x192xbf16>
    %c0_29 = arith.constant 0 : index
    %c0_30 = arith.constant 0 : index
    %96 = vector.load %arg3[%c0_29, %c0_30] : memref<192x1024xbf16, #tpu.memory_space<vmem>>, vector<192x1024xbf16>
    %cst_31 = arith.constant dense<0.000000e+00> : vector<8x1024xf32>
    %97 = tpu.matmul %95, %96, %cst_31 {dimension_numbers = #tpu.dot_dimension_numbers<[1], [0], [0], [1], [0, 0, 1, 1], [], []>} : vector<8x192xbf16>, vector<192x1024xbf16>, vector<8x1024xf32> -> vector<8x1024xf32>
    %98 = arith.addf %97, %94 : vector<8x1024xf32>
    %99 = vector.extract_strided_slice %98 {offsets = [0, 0], sizes = [8, 512], strides = [1, 1]} : vector<8x1024xf32> to vector<8x512xf32>
    %100 = arith.negf %99 : vector<8x512xf32>
    %101 = math.exp %100 : vector<8x512xf32>
    %cst_32 = arith.constant 1.000000e+00 : f32
    %102 = vector.broadcast %cst_32 : f32 to vector<8x512xf32>
    %103 = arith.addf %102, %101 : vector<8x512xf32>
    %104 = arith.divf %102, %103 : vector<8x512xf32>
    %105 = vector.extract_strided_slice %104 {offsets = [0, 0], sizes = [8, 192], strides = [1, 1]} : vector<8x512xf32> to vector<8x192xf32>
    %106 = vector.extract_strided_slice %104 {offsets = [0, 256], sizes = [8, 192], strides = [1, 1]} : vector<8x512xf32> to vector<8x192xf32>
    %107 = vector.extract_strided_slice %98 {offsets = [0, 768], sizes = [8, 192], strides = [1, 1]} : vector<8x1024xf32> to vector<8x192xf32>
    %108 = vector.extract_strided_slice %98 {offsets = [0, 512], sizes = [8, 192], strides = [1, 1]} : vector<8x1024xf32> to vector<8x192xf32>
    %109 = arith.mulf %105, %108 : vector<8x192xf32>
    %110 = arith.addf %107, %109 : vector<8x192xf32>
    %111 = math.tanh %110 : vector<8x192xf32>
    %112 = arith.subf %83, %111 : vector<8x192xf32>
    %113 = arith.mulf %106, %112 : vector<8x192xf32>
    %114 = arith.addf %111, %113 : vector<8x192xf32>
    %c2_i32_33 = arith.constant 2 : i32
    %115 = arith.subi %c3_i32, %c2_i32_33 : i32
    %c8_i32_34 = arith.constant 8 : i32
    %116 = arith.muli %115, %c8_i32_34 : i32
    %117 = tpu.assume_multiple %116, 8 : i32
    %118 = vector.extract_strided_slice %114 {offsets = [0, 128], sizes = [8, 64], strides = [1, 1]} : vector<8x192xf32> to vector<8x64xf32>
    %119 = arith.index_cast %117 : i32 to index
    %c0_35 = arith.constant 0 : index
    %120 = vector.load %arg14[%119, %c0_35] : memref<64x64xf32, #tpu.memory_space<vmem>>, vector<8x64xf32>
    tpu.vector_store %arg14[%119, %c0_35], %118 {strides = array<i32>} : memref<64x64xf32, #tpu.memory_space<vmem>>, vector<8x64xf32>,
    %c4_i32 = arith.constant 4 : i32
    %c7_i32_36 = arith.constant 7 : i32
    %121 = arith.minsi %c4_i32, %c7_i32_36 : i32
    %c8_i32_37 = arith.constant 8 : i32
    %122 = arith.muli %121, %c8_i32_37 : i32
    %123 = tpu.assume_multiple %122, 8 : i32
    %124 = arith.index_cast %123 : i32 to index
    %c0_38 = arith.constant 0 : index
    %125 = vector.load %arg13[%124, %c0_38] : memref<64x1024xf32, #tpu.memory_space<vmem>>, vector<8x1024xf32>
    %126 = arith.truncf %114 : vector<8x192xf32> to vector<8x192xbf16>
    %c0_39 = arith.constant 0 : index
    %c0_40 = arith.constant 0 : index
    %127 = vector.load %arg3[%c0_39, %c0_40] : memref<192x1024xbf16, #tpu.memory_space<vmem>>, vector<192x1024xbf16>
    %cst_41 = arith.constant dense<0.000000e+00> : vector<8x1024xf32>
    %128 = tpu.matmul %126, %127, %cst_41 {dimension_numbers = #tpu.dot_dimension_numbers<[1], [0], [0], [1], [0, 0, 1, 1], [], []>} : vector<8x192xbf16>, vector<192x1024xbf16>, vector<8x1024xf32> -> vector<8x1024xf32>
    %129 = arith.addf %128, %125 : vector<8x1024xf32>
    %130 = vector.extract_strided_slice %129 {offsets = [0, 0], sizes = [8, 512], strides = [1, 1]} : vector<8x1024xf32> to vector<8x512xf32>
    %131 = arith.negf %130 : vector<8x512xf32>
    %132 = math.exp %131 : vector<8x512xf32>
    %cst_42 = arith.constant 1.000000e+00 : f32
    %133 = vector.broadcast %cst_42 : f32 to vector<8x512xf32>
    %134 = arith.addf %133, %132 : vector<8x512xf32>
    %135 = arith.divf %133, %134 : vector<8x512xf32>
    %136 = vector.extract_strided_slice %135 {offsets = [0, 0], sizes = [8, 192], strides = [1, 1]} : vector<8x512xf32> to vector<8x192xf32>
    %137 = vector.extract_strided_slice %135 {offsets = [0, 256], sizes = [8, 192], strides = [1, 1]} : vector<8x512xf32> to vector<8x192xf32>
    %138 = vector.extract_strided_slice %129 {offsets = [0, 768], sizes = [8, 192], strides = [1, 1]} : vector<8x1024xf32> to vector<8x192xf32>
    %139 = vector.extract_strided_slice %129 {offsets = [0, 512], sizes = [8, 192], strides = [1, 1]} : vector<8x1024xf32> to vector<8x192xf32>
    %140 = arith.mulf %136, %139 : vector<8x192xf32>
    %141 = arith.addf %138, %140 : vector<8x192xf32>
    %142 = math.tanh %141 : vector<8x192xf32>
    %143 = arith.subf %114, %142 : vector<8x192xf32>
    %144 = arith.mulf %137, %143 : vector<8x192xf32>
    %145 = arith.addf %142, %144 : vector<8x192xf32>
    %c2_i32_43 = arith.constant 2 : i32
    %146 = arith.subi %c4_i32, %c2_i32_43 : i32
    %c8_i32_44 = arith.constant 8 : i32
    %147 = arith.muli %146, %c8_i32_44 : i32
    %148 = tpu.assume_multiple %147, 8 : i32
    %149 = vector.extract_strided_slice %145 {offsets = [0, 128], sizes = [8, 64], strides = [1, 1]} : vector<8x192xf32> to vector<8x64xf32>
    %150 = arith.index_cast %148 : i32 to index
    %c0_45 = arith.constant 0 : index
    %151 = vector.load %arg14[%150, %c0_45] : memref<64x64xf32, #tpu.memory_space<vmem>>, vector<8x64xf32>
    tpu.vector_store %arg14[%150, %c0_45], %149 {strides = array<i32>} : memref<64x64xf32, #tpu.memory_space<vmem>>, vector<8x64xf32>,
    %c5_i32 = arith.constant 5 : i32
    %c7_i32_46 = arith.constant 7 : i32
    %152 = arith.minsi %c5_i32, %c7_i32_46 : i32
    %c8_i32_47 = arith.constant 8 : i32
    %153 = arith.muli %152, %c8_i32_47 : i32
    %154 = tpu.assume_multiple %153, 8 : i32
    %155 = arith.index_cast %154 : i32 to index
    %c0_48 = arith.constant 0 : index
    %156 = vector.load %arg13[%155, %c0_48] : memref<64x1024xf32, #tpu.memory_space<vmem>>, vector<8x1024xf32>
    %157 = arith.truncf %145 : vector<8x192xf32> to vector<8x192xbf16>
    %c0_49 = arith.constant 0 : index
    %c0_50 = arith.constant 0 : index
    %158 = vector.load %arg3[%c0_49, %c0_50] : memref<192x1024xbf16, #tpu.memory_space<vmem>>, vector<192x1024xbf16>
    %cst_51 = arith.constant dense<0.000000e+00> : vector<8x1024xf32>
    %159 = tpu.matmul %157, %158, %cst_51 {dimension_numbers = #tpu.dot_dimension_numbers<[1], [0], [0], [1], [0, 0, 1, 1], [], []>} : vector<8x192xbf16>, vector<192x1024xbf16>, vector<8x1024xf32> -> vector<8x1024xf32>
    %160 = arith.addf %159, %156 : vector<8x1024xf32>
    %161 = vector.extract_strided_slice %160 {offsets = [0, 0], sizes = [8, 512], strides = [1, 1]} : vector<8x1024xf32> to vector<8x512xf32>
    %162 = arith.negf %161 : vector<8x512xf32>
    %163 = math.exp %162 : vector<8x512xf32>
    %cst_52 = arith.constant 1.000000e+00 : f32
    %164 = vector.broadcast %cst_52 : f32 to vector<8x512xf32>
    %165 = arith.addf %164, %163 : vector<8x512xf32>
    %166 = arith.divf %164, %165 : vector<8x512xf32>
    %167 = vector.extract_strided_slice %166 {offsets = [0, 0], sizes = [8, 192], strides = [1, 1]} : vector<8x512xf32> to vector<8x192xf32>
    %168 = vector.extract_strided_slice %166 {offsets = [0, 256], sizes = [8, 192], strides = [1, 1]} : vector<8x512xf32> to vector<8x192xf32>
    %169 = vector.extract_strided_slice %160 {offsets = [0, 768], sizes = [8, 192], strides = [1, 1]} : vector<8x1024xf32> to vector<8x192xf32>
    %170 = vector.extract_strided_slice %160 {offsets = [0, 512], sizes = [8, 192], strides = [1, 1]} : vector<8x1024xf32> to vector<8x192xf32>
    %171 = arith.mulf %167, %170 : vector<8x192xf32>
    %172 = arith.addf %169, %171 : vector<8x192xf32>
    %173 = math.tanh %172 : vector<8x192xf32>
    %174 = arith.subf %145, %173 : vector<8x192xf32>
    %175 = arith.mulf %168, %174 : vector<8x192xf32>
    %176 = arith.addf %173, %175 : vector<8x192xf32>
    %c2_i32_53 = arith.constant 2 : i32
    %177 = arith.subi %c5_i32, %c2_i32_53 : i32
    %c8_i32_54 = arith.constant 8 : i32
    %178 = arith.muli %177, %c8_i32_54 : i32
    %179 = tpu.assume_multiple %178, 8 : i32
    %180 = vector.extract_strided_slice %176 {offsets = [0, 128], sizes = [8, 64], strides = [1, 1]} : vector<8x192xf32> to vector<8x64xf32>
    %181 = arith.index_cast %179 : i32 to index
    %c0_55 = arith.constant 0 : index
    %182 = vector.load %arg14[%181, %c0_55] : memref<64x64xf32, #tpu.memory_space<vmem>>, vector<8x64xf32>
    tpu.vector_store %arg14[%181, %c0_55], %180 {strides = array<i32>} : memref<64x64xf32, #tpu.memory_space<vmem>>, vector<8x64xf32>,
    %c6_i32 = arith.constant 6 : i32
    %c7_i32_56 = arith.constant 7 : i32
    %183 = arith.minsi %c6_i32, %c7_i32_56 : i32
    %c8_i32_57 = arith.constant 8 : i32
    %184 = arith.muli %183, %c8_i32_57 : i32
    %185 = tpu.assume_multiple %184, 8 : i32
    %186 = arith.index_cast %185 : i32 to index
    %c0_58 = arith.constant 0 : index
    %187 = vector.load %arg13[%186, %c0_58] : memref<64x1024xf32, #tpu.memory_space<vmem>>, vector<8x1024xf32>
    %188 = arith.truncf %176 : vector<8x192xf32> to vector<8x192xbf16>
    %c0_59 = arith.constant 0 : index
    %c0_60 = arith.constant 0 : index
    %189 = vector.load %arg3[%c0_59, %c0_60] : memref<192x1024xbf16, #tpu.memory_space<vmem>>, vector<192x1024xbf16>
    %cst_61 = arith.constant dense<0.000000e+00> : vector<8x1024xf32>
    %190 = tpu.matmul %188, %189, %cst_61 {dimension_numbers = #tpu.dot_dimension_numbers<[1], [0], [0], [1], [0, 0, 1, 1], [], []>} : vector<8x192xbf16>, vector<192x1024xbf16>, vector<8x1024xf32> -> vector<8x1024xf32>
    %191 = arith.addf %190, %187 : vector<8x1024xf32>
    %192 = vector.extract_strided_slice %191 {offsets = [0, 0], sizes = [8, 512], strides = [1, 1]} : vector<8x1024xf32> to vector<8x512xf32>
    %193 = arith.negf %192 : vector<8x512xf32>
    %194 = math.exp %193 : vector<8x512xf32>
    %cst_62 = arith.constant 1.000000e+00 : f32
    %195 = vector.broadcast %cst_62 : f32 to vector<8x512xf32>
    %196 = arith.addf %195, %194 : vector<8x512xf32>
    %197 = arith.divf %195, %196 : vector<8x512xf32>
    %198 = vector.extract_strided_slice %197 {offsets = [0, 0], sizes = [8, 192], strides = [1, 1]} : vector<8x512xf32> to vector<8x192xf32>
    %199 = vector.extract_strided_slice %197 {offsets = [0, 256], sizes = [8, 192], strides = [1, 1]} : vector<8x512xf32> to vector<8x192xf32>
    %200 = vector.extract_strided_slice %191 {offsets = [0, 768], sizes = [8, 192], strides = [1, 1]} : vector<8x1024xf32> to vector<8x192xf32>
    %201 = vector.extract_strided_slice %191 {offsets = [0, 512], sizes = [8, 192], strides = [1, 1]} : vector<8x1024xf32> to vector<8x192xf32>
    %202 = arith.mulf %198, %201 : vector<8x192xf32>
    %203 = arith.addf %200, %202 : vector<8x192xf32>
    %204 = math.tanh %203 : vector<8x192xf32>
    %205 = arith.subf %176, %204 : vector<8x192xf32>
    %206 = arith.mulf %199, %205 : vector<8x192xf32>
    %207 = arith.addf %204, %206 : vector<8x192xf32>
    %c2_i32_63 = arith.constant 2 : i32
    %208 = arith.subi %c6_i32, %c2_i32_63 : i32
    %c8_i32_64 = arith.constant 8 : i32
    %209 = arith.muli %208, %c8_i32_64 : i32
    %210 = tpu.assume_multiple %209, 8 : i32
    %211 = vector.extract_strided_slice %207 {offsets = [0, 128], sizes = [8, 64], strides = [1, 1]} : vector<8x192xf32> to vector<8x64xf32>
    %212 = arith.index_cast %210 : i32 to index
    %c0_65 = arith.constant 0 : index
    %213 = vector.load %arg14[%212, %c0_65] : memref<64x64xf32, #tpu.memory_space<vmem>>, vector<8x64xf32>
    tpu.vector_store %arg14[%212, %c0_65], %211 {strides = array<i32>} : memref<64x64xf32, #tpu.memory_space<vmem>>, vector<8x64xf32>,
    %c7_i32_66 = arith.constant 7 : i32
    %c7_i32_67 = arith.constant 7 : i32
    %214 = arith.minsi %c7_i32_66, %c7_i32_67 : i32
    %c8_i32_68 = arith.constant 8 : i32
    %215 = arith.muli %214, %c8_i32_68 : i32
    %216 = tpu.assume_multiple %215, 8 : i32
    %217 = arith.index_cast %216 : i32 to index
    %c0_69 = arith.constant 0 : index
    %218 = vector.load %arg13[%217, %c0_69] : memref<64x1024xf32, #tpu.memory_space<vmem>>, vector<8x1024xf32>
    %219 = arith.truncf %207 : vector<8x192xf32> to vector<8x192xbf16>
    %c0_70 = arith.constant 0 : index
    %c0_71 = arith.constant 0 : index
    %220 = vector.load %arg3[%c0_70, %c0_71] : memref<192x1024xbf16, #tpu.memory_space<vmem>>, vector<192x1024xbf16>
    %cst_72 = arith.constant dense<0.000000e+00> : vector<8x1024xf32>
    %221 = tpu.matmul %219, %220, %cst_72 {dimension_numbers = #tpu.dot_dimension_numbers<[1], [0], [0], [1], [0, 0, 1, 1], [], []>} : vector<8x192xbf16>, vector<192x1024xbf16>, vector<8x1024xf32> -> vector<8x1024xf32>
    %222 = arith.addf %221, %218 : vector<8x1024xf32>
    %223 = vector.extract_strided_slice %222 {offsets = [0, 0], sizes = [8, 512], strides = [1, 1]} : vector<8x1024xf32> to vector<8x512xf32>
    %224 = arith.negf %223 : vector<8x512xf32>
    %225 = math.exp %224 : vector<8x512xf32>
    %cst_73 = arith.constant 1.000000e+00 : f32
    %226 = vector.broadcast %cst_73 : f32 to vector<8x512xf32>
    %227 = arith.addf %226, %225 : vector<8x512xf32>
    %228 = arith.divf %226, %227 : vector<8x512xf32>
    %229 = vector.extract_strided_slice %228 {offsets = [0, 0], sizes = [8, 192], strides = [1, 1]} : vector<8x512xf32> to vector<8x192xf32>
    %230 = vector.extract_strided_slice %228 {offsets = [0, 256], sizes = [8, 192], strides = [1, 1]} : vector<8x512xf32> to vector<8x192xf32>
    %231 = vector.extract_strided_slice %222 {offsets = [0, 768], sizes = [8, 192], strides = [1, 1]} : vector<8x1024xf32> to vector<8x192xf32>
    %232 = vector.extract_strided_slice %222 {offsets = [0, 512], sizes = [8, 192], strides = [1, 1]} : vector<8x1024xf32> to vector<8x192xf32>
    %233 = arith.mulf %229, %232 : vector<8x192xf32>
    %234 = arith.addf %231, %233 : vector<8x192xf32>
    %235 = math.tanh %234 : vector<8x192xf32>
    %236 = arith.subf %207, %235 : vector<8x192xf32>
    %237 = arith.mulf %230, %236 : vector<8x192xf32>
    %238 = arith.addf %235, %237 : vector<8x192xf32>
    %c2_i32_74 = arith.constant 2 : i32
    %239 = arith.subi %c7_i32_66, %c2_i32_74 : i32
    %c8_i32_75 = arith.constant 8 : i32
    %240 = arith.muli %239, %c8_i32_75 : i32
    %241 = tpu.assume_multiple %240, 8 : i32
    %242 = vector.extract_strided_slice %238 {offsets = [0, 128], sizes = [8, 64], strides = [1, 1]} : vector<8x192xf32> to vector<8x64xf32>
    %243 = arith.index_cast %241 : i32 to index
    %c0_76 = arith.constant 0 : index
    %244 = vector.load %arg14[%243, %c0_76] : memref<64x64xf32, #tpu.memory_space<vmem>>, vector<8x64xf32>
    tpu.vector_store %arg14[%243, %c0_76], %242 {strides = array<i32>} : memref<64x64xf32, #tpu.memory_space<vmem>>, vector<8x64xf32>,
    %c8_i32_77 = arith.constant 8 : i32
    %c7_i32_78 = arith.constant 7 : i32
    %245 = arith.minsi %c8_i32_77, %c7_i32_78 : i32
    %c8_i32_79 = arith.constant 8 : i32
    %246 = arith.muli %245, %c8_i32_79 : i32
    %247 = tpu.assume_multiple %246, 8 : i32
    %248 = arith.index_cast %247 : i32 to index
    %c0_80 = arith.constant 0 : index
    %249 = vector.load %arg13[%248, %c0_80] : memref<64x1024xf32, #tpu.memory_space<vmem>>, vector<8x1024xf32>
    %250 = arith.truncf %238 : vector<8x192xf32> to vector<8x192xbf16>
    %c0_81 = arith.constant 0 : index
    %c0_82 = arith.constant 0 : index
    %251 = vector.load %arg3[%c0_81, %c0_82] : memref<192x1024xbf16, #tpu.memory_space<vmem>>, vector<192x1024xbf16>
    %cst_83 = arith.constant dense<0.000000e+00> : vector<8x1024xf32>
    %252 = tpu.matmul %250, %251, %cst_83 {dimension_numbers = #tpu.dot_dimension_numbers<[1], [0], [0], [1], [0, 0, 1, 1], [], []>} : vector<8x192xbf16>, vector<192x1024xbf16>, vector<8x1024xf32> -> vector<8x1024xf32>
    %253 = arith.addf %252, %249 : vector<8x1024xf32>
    %254 = vector.extract_strided_slice %253 {offsets = [0, 0], sizes = [8, 512], strides = [1, 1]} : vector<8x1024xf32> to vector<8x512xf32>
    %255 = arith.negf %254 : vector<8x512xf32>
    %256 = math.exp %255 : vector<8x512xf32>
    %cst_84 = arith.constant 1.000000e+00 : f32
    %257 = vector.broadcast %cst_84 : f32 to vector<8x512xf32>
    %258 = arith.addf %257, %256 : vector<8x512xf32>
    %259 = arith.divf %257, %258 : vector<8x512xf32>
    %260 = vector.extract_strided_slice %259 {offsets = [0, 0], sizes = [8, 192], strides = [1, 1]} : vector<8x512xf32> to vector<8x192xf32>
    %261 = vector.extract_strided_slice %259 {offsets = [0, 256], sizes = [8, 192], strides = [1, 1]} : vector<8x512xf32> to vector<8x192xf32>
    %262 = vector.extract_strided_slice %253 {offsets = [0, 768], sizes = [8, 192], strides = [1, 1]} : vector<8x1024xf32> to vector<8x192xf32>
    %263 = vector.extract_strided_slice %253 {offsets = [0, 512], sizes = [8, 192], strides = [1, 1]} : vector<8x1024xf32> to vector<8x192xf32>
    %264 = arith.mulf %260, %263 : vector<8x192xf32>
    %265 = arith.addf %262, %264 : vector<8x192xf32>
    %266 = math.tanh %265 : vector<8x192xf32>
    %267 = arith.subf %238, %266 : vector<8x192xf32>
    %268 = arith.mulf %261, %267 : vector<8x192xf32>
    %269 = arith.addf %266, %268 : vector<8x192xf32>
    %c2_i32_85 = arith.constant 2 : i32
    %270 = arith.subi %c8_i32_77, %c2_i32_85 : i32
    %c8_i32_86 = arith.constant 8 : i32
    %271 = arith.muli %270, %c8_i32_86 : i32
    %272 = tpu.assume_multiple %271, 8 : i32
    %273 = vector.extract_strided_slice %269 {offsets = [0, 128], sizes = [8, 64], strides = [1, 1]} : vector<8x192xf32> to vector<8x64xf32>
    %274 = arith.index_cast %272 : i32 to index
    %c0_87 = arith.constant 0 : index
    %275 = vector.load %arg14[%274, %c0_87] : memref<64x64xf32, #tpu.memory_space<vmem>>, vector<8x64xf32>
    tpu.vector_store %arg14[%274, %c0_87], %273 {strides = array<i32>} : memref<64x64xf32, #tpu.memory_space<vmem>>, vector<8x64xf32>,
    %c9_i32 = arith.constant 9 : i32
    %c7_i32_88 = arith.constant 7 : i32
    %276 = arith.minsi %c9_i32, %c7_i32_88 : i32
    %c8_i32_89 = arith.constant 8 : i32
    %277 = arith.muli %276, %c8_i32_89 : i32
    %278 = tpu.assume_multiple %277, 8 : i32
    %279 = arith.index_cast %278 : i32 to index
    %c0_90 = arith.constant 0 : index
    %280 = vector.load %arg13[%279, %c0_90] : memref<64x1024xf32, #tpu.memory_space<vmem>>, vector<8x1024xf32>
    %281 = arith.truncf %269 : vector<8x192xf32> to vector<8x192xbf16>
    %c0_91 = arith.constant 0 : index
    %c0_92 = arith.constant 0 : index
    %282 = vector.load %arg3[%c0_91, %c0_92] : memref<192x1024xbf16, #tpu.memory_space<vmem>>, vector<192x1024xbf16>
    %cst_93 = arith.constant dense<0.000000e+00> : vector<8x1024xf32>
    %283 = tpu.matmul %281, %282, %cst_93 {dimension_numbers = #tpu.dot_dimension_numbers<[1], [0], [0], [1], [0, 0, 1, 1], [], []>} : vector<8x192xbf16>, vector<192x1024xbf16>, vector<8x1024xf32> -> vector<8x1024xf32>
    %284 = arith.addf %283, %280 : vector<8x1024xf32>
    %285 = vector.extract_strided_slice %284 {offsets = [0, 0], sizes = [8, 512], strides = [1, 1]} : vector<8x1024xf32> to vector<8x512xf32>
    %286 = arith.negf %285 : vector<8x512xf32>
    %287 = math.exp %286 : vector<8x512xf32>
    %cst_94 = arith.constant 1.000000e+00 : f32
    %288 = vector.broadcast %cst_94 : f32 to vector<8x512xf32>
    %289 = arith.addf %288, %287 : vector<8x512xf32>
    %290 = arith.divf %288, %289 : vector<8x512xf32>
    %291 = vector.extract_strided_slice %290 {offsets = [0, 0], sizes = [8, 192], strides = [1, 1]} : vector<8x512xf32> to vector<8x192xf32>
    %292 = vector.extract_strided_slice %290 {offsets = [0, 256], sizes = [8, 192], strides = [1, 1]} : vector<8x512xf32> to vector<8x192xf32>
    %293 = vector.extract_strided_slice %284 {offsets = [0, 768], sizes = [8, 192], strides = [1, 1]} : vector<8x1024xf32> to vector<8x192xf32>
    %294 = vector.extract_strided_slice %284 {offsets = [0, 512], sizes = [8, 192], strides = [1, 1]} : vector<8x1024xf32> to vector<8x192xf32>
    %295 = arith.mulf %291, %294 : vector<8x192xf32>
    %296 = arith.addf %293, %295 : vector<8x192xf32>
    %297 = math.tanh %296 : vector<8x192xf32>
    %298 = arith.subf %269, %297 : vector<8x192xf32>
    %299 = arith.mulf %292, %298 : vector<8x192xf32>
    %300 = arith.addf %297, %299 : vector<8x192xf32>
    %c2_i32_95 = arith.constant 2 : i32
    %301 = arith.subi %c9_i32, %c2_i32_95 : i32
    %c8_i32_96 = arith.constant 8 : i32
    %302 = arith.muli %301, %c8_i32_96 : i32
    %303 = tpu.assume_multiple %302, 8 : i32
    %304 = vector.extract_strided_slice %300 {offsets = [0, 128], sizes = [8, 64], strides = [1, 1]} : vector<8x192xf32> to vector<8x64xf32>
    %305 = arith.index_cast %303 : i32 to index
    %c0_97 = arith.constant 0 : index
    %306 = vector.load %arg14[%305, %c0_97] : memref<64x64xf32, #tpu.memory_space<vmem>>, vector<8x64xf32>
    tpu.vector_store %arg14[%305, %c0_97], %304 {strides = array<i32>} : memref<64x64xf32, #tpu.memory_space<vmem>>, vector<8x64xf32>,
    %c8_i32_98 = arith.constant 8 : i32
    %c0_99 = arith.constant 0 : index
    %c0_100 = arith.constant 0 : index
    %307 = vector.load %arg14[%c0_99, %c0_100] : memref<64x64xf32, #tpu.memory_space<vmem>>, vector<64x64xf32>
    %308 = arith.truncf %307 : vector<64x64xf32> to vector<64x64xbf16>
    %c0_101 = arith.constant 0 : index
    %c0_102 = arith.constant 0 : index
    %309 = vector.load %arg4[%c0_101, %c0_102] : memref<64x128xbf16, #tpu.memory_space<vmem>>, vector<64x128xbf16>
    %cst_103 = arith.constant dense<0.000000e+00> : vector<64x128xf32>
    %310 = tpu.matmul %308, %309, %cst_103 {dimension_numbers = #tpu.dot_dimension_numbers<[1], [0], [0], [1], [0, 0, 1, 1], [], []>} : vector<64x64xbf16>, vector<64x128xbf16>, vector<64x128xf32> -> vector<64x128xf32>
    %c0_104 = arith.constant 0 : index
    %c0_105 = arith.constant 0 : index
    %311 = vector.load %arg5[%c0_104, %c0_105] : memref<1x128xf32, #tpu.memory_space<vmem>>, vector<1x128xf32>
    %312 = vector.broadcast %311 : vector<1x128xf32> to vector<64x128xf32>
    %313 = arith.addf %310, %312 : vector<64x128xf32>
    %cst_106 = arith.constant 0.000000e+00 : f32
    %314 = vector.broadcast %cst_106 : f32 to vector<64x128xf32>
    %315 = arith.maximumf %313, %314 : vector<64x128xf32>
    %316 = arith.truncf %315 : vector<64x128xf32> to vector<64x128xbf16>
    %c0_107 = arith.constant 0 : index
    %c0_108 = arith.constant 0 : index
    %317 = vector.load %arg6[%c0_107, %c0_108] : memref<128x128xbf16, #tpu.memory_space<vmem>>, vector<128x128xbf16>
    %cst_109 = arith.constant dense<0.000000e+00> : vector<64x128xf32>
    %318 = tpu.matmul %316, %317, %cst_109 {dimension_numbers = #tpu.dot_dimension_numbers<[1], [0], [0], [1], [0, 0, 1, 1], [], []>} : vector<64x128xbf16>, vector<128x128xbf16>, vector<64x128xf32> -> vector<64x128xf32>
    %c0_110 = arith.constant 0 : index
    %c0_111 = arith.constant 0 : index
    %319 = vector.load %arg7[%c0_110, %c0_111] : memref<1x128xf32, #tpu.memory_space<vmem>>, vector<1x128xf32>
    %320 = vector.broadcast %319 : vector<1x128xf32> to vector<64x128xf32>
    %321 = arith.addf %318, %320 : vector<64x128xf32>
    %cst_112 = arith.constant 0.000000e+00 : f32
    %322 = vector.broadcast %cst_112 : f32 to vector<64x128xf32>
    %323 = arith.maximumf %321, %322 : vector<64x128xf32>
    %324 = arith.truncf %323 : vector<64x128xf32> to vector<64x128xbf16>
    %c0_113 = arith.constant 0 : index
    %c0_114 = arith.constant 0 : index
    %325 = vector.load %arg8[%c0_113, %c0_114] : memref<128x128xbf16, #tpu.memory_space<vmem>>, vector<128x128xbf16>
    %cst_115 = arith.constant dense<0.000000e+00> : vector<64x128xf32>
    %326 = tpu.matmul %324, %325, %cst_115 {dimension_numbers = #tpu.dot_dimension_numbers<[1], [0], [0], [1], [0, 0, 1, 1], [], []>} : vector<64x128xbf16>, vector<128x128xbf16>, vector<64x128xf32> -> vector<64x128xf32>
    %c0_116 = arith.constant 0 : index
    %c0_117 = arith.constant 0 : index
    %327 = vector.load %arg9[%c0_116, %c0_117] : memref<1x128xf32, #tpu.memory_space<vmem>>, vector<1x128xf32>
    %328 = vector.broadcast %327 : vector<1x128xf32> to vector<64x128xf32>
    %329 = arith.addf %326, %328 : vector<64x128xf32>
    %cst_118 = arith.constant 0.000000e+00 : f32
    %330 = vector.broadcast %cst_118 : f32 to vector<64x128xf32>
    %331 = arith.maximumf %329, %330 : vector<64x128xf32>
    %332 = arith.truncf %331 : vector<64x128xf32> to vector<64x128xbf16>
    %c0_119 = arith.constant 0 : index
    %c0_120 = arith.constant 0 : index
    %333 = vector.load %arg10[%c0_119, %c0_120] : memref<128x128xbf16, #tpu.memory_space<vmem>>, vector<128x128xbf16>
    %cst_121 = arith.constant dense<0.000000e+00> : vector<64x128xf32>
    %334 = tpu.matmul %332, %333, %cst_121 {dimension_numbers = #tpu.dot_dimension_numbers<[1], [0], [0], [1], [0, 0, 1, 1], [], []>} : vector<64x128xbf16>, vector<128x128xbf16>, vector<64x128xf32> -> vector<64x128xf32>
    %c0_122 = arith.constant 0 : index
    %c0_123 = arith.constant 0 : index
    %335 = vector.load %arg11[%c0_122, %c0_123] : memref<1x128xf32, #tpu.memory_space<vmem>>, vector<1x128xf32>
    %336 = vector.broadcast %335 : vector<1x128xf32> to vector<64x128xf32>
    %337 = arith.addf %334, %336 : vector<64x128xf32>
    %c0_124 = arith.constant 0 : index
    %c0_125 = arith.constant 0 : index
    %338 = vector.load %arg12[%c0_124, %c0_125] : memref<64x128xf32, #tpu.memory_space<vmem>>, vector<64x128xf32>
    tpu.vector_store %arg12[%c0_124, %c0_125], %337 {strides = array<i32>} : memref<64x128xf32, #tpu.memory_space<vmem>>, vector<64x128xf32>,
    return
  }
}

</mosaic_0001>

<bundles_post_ra>
// kernel: tpu_custom_call.1
= control target key start
LH: loop header
LB: loop body
LE: loop exit
PB: predicated region body
PF: predicated region fallthrough
CT: control target
= control target key end

     0   :  { %17 = vsyncpa [#allocation5], 0  ;;  %s11415_s0 = inlined_call_operand.vmem [shape: f32[64,1], index: 0, kind: input, shape index: {}]   ;;  %s11416_s1 = inlined_call_operand.vmem [shape: f32[1,1024], index: 1, kind: input, shape index: {}]   ;;  %s11417_s2 = inlined_call_operand.vmem [shape: f32[1,1024], index: 2, kind: input, shape index: {}]   ;;  %s11418_s3 = inlined_call_operand.hbm [shape: bf16[192,1024], index: 3, kind: input, shape index: {}]   ;;  %s11419_s4 = inlined_call_operand.hbm [shape: bf16[64,128], index: 4, kind: input, shape index: {}]   ;;  %s11420_s5 = inlined_call_operand.vmem [shape: f32[1,128], index: 5, kind: input, shape index: {}]   ;;  %s11421_s6 = inlined_call_operand.vmem [shape: bf16[128,128], index: 6, kind: input, shape index: {}]   ;;  %s11422_s7 = inlined_call_operand.vmem [shape: f32[1,128], index: 7, kind: input, shape index: {}]   ;;  %s11423_s8 = inlined_call_operand.hbm [shape: bf16[128,128], index: 8, kind: input, shape index: {}]   ;;  %s11424_s9 = inlined_call_operand.vmem [shape: f32[1,128], index: 9, kind: input, shape index: {}]   ;;  %s11425_s10 = inlined_call_operand.hbm [shape: bf16[128,128], index: 10, kind: input, shape index: {}]   ;;  %s11426_s11 = inlined_call_operand.vmem [shape: f32[1,128], index: 11, kind: input, shape index: {}]   ;;  %s11427_s12 = inlined_call_operand.hbm [shape: f32[64,128], index: 12, kind: output, shape index: {}]  }
   0x1   :  { %18 = vsyncpa [#allocation8], 0 }
   0x2   :  { %19 = vsyncpa [#allocation11], 0 }
   0x3   :  { %20 = vsyncpa [#allocation6], 0  ;;  %s9127_s21 = smov [#allocation7]   ;;  %s9009_s25 = scalar_lea.hbm %s11419_s4, 512 }
   0x4   :  { %s44_s22 = sshll.u32 %s9127_s21, 4  ;;  %p9010_p0 = scmp.ne.s32.totalorder %s11419_s4, %s9009_s25  ;;  %s45_s22 = int_to_ptr.vmem [resolvable:$true] %s44_s22 }
   0x5   :  { %p9013_p1 = scmp.lt.u32.totalorder %s9009_s25, %s11419_s4 }
   0x7   :  { %p9015_p2 = pnand %p9013_p1, %p9010_p0 }
   0x9   :  { %9018 = shalt.err (!%p9015_p2)
}
   0xa   :  { %s9019_s30 = scalar_lea.vmem %s45_s22, 512  ;;  %p9024_p4 = scmp.lt.s32.totalorder %s45_s22, %s45_s22 }
   0xb   :  { %p9020_p3 = scmp.ne.s32.totalorder %s45_s22, %s9019_s30  ;;  %p9025_p5 = scmp.lt.s32.totalorder %s9019_s30, %s9019_s30 }
   0xd   :  { %p9026_p6 = por %p9025_p5, %p9024_p4 }
   0xf   :  { %p9027_p7 = pnand %p9026_p6, %p9020_p3 }
  0x11   :  { %9030 = shalt.err (!%p9027_p7)
}
  0x12   :  { %s9128_s13 = smov 64   ;;  %s9129_s14 = smov 4  }
  0x13   :  { %50 = dma.hbm_to_vmem [thread:$0]  %s11419_s4, 512, %s45_s22, [#allocation8], %s9128_s13, %s9128_s13, %s9129_s14  }
  0x14   :  { %s9130_s17 = smov [#allocation4]   ;;  %s9031_s21 = scalar_lea.hbm %s11418_s3, 12288 }
  0x15   :  { %s32_s18 = sshll.u32 %s9130_s17, 4  ;;  %p9032_p8 = scmp.ne.s32.totalorder %s11418_s3, %s9031_s21  ;;  %s33_s18 = int_to_ptr.vmem [resolvable:$true] %s32_s18 }
  0x16   :  { %p9035_p9 = scmp.lt.u32.totalorder %s9031_s21, %s11418_s3 }
  0x18   :  { %p9037_p10 = pnand %p9035_p9, %p9032_p8 }
  0x1a   :  { %9040 = shalt.err (!%p9037_p10)
}
  0x1b   :  { %s9041_s27 = scalar_lea.vmem %s33_s18, 12288  ;;  %p9046_p12 = scmp.lt.s32.totalorder %s33_s18, %s33_s18 }
  0x1c   :  { %p9042_p11 = scmp.ne.s32.totalorder %s33_s18, %s9041_s27  ;;  %p9047_p13 = scmp.lt.s32.totalorder %s9041_s27, %s9041_s27 }
  0x1e   :  { %p9048_p0 = por %p9047_p13, %p9046_p12 }
  0x20   :  { %p9049_p1 = pnand %p9048_p0, %p9042_p11 }
  0x22   :  { %9052 = shalt.err (!%p9049_p1)
}
  0x23   :  { %s9131_s4 = smov 512   ;;  %s9132_s22 = smov 32  }
  0x24   :  { %38 = dma.hbm_to_vmem [thread:$0]  %s11418_s3, 12288, %s33_s18, [#allocation5], %s9131_s4, %s9131_s4, %s9132_s22  }
  0x25   :  { %s9133_s30 = smov [#allocation9]   ;;  %s9134_s16 = smov [#allocation10]  }
  0x26   :  { %s62_s15 = sshll.u32 %s9133_s30, 4  ;;  %s76_s17 = sshll.u32 %s9134_s16, 4  ;;  %s63_s15 = int_to_ptr.vmem [resolvable:$true] %s62_s15  ;;  %s9232_s17 = int_to_ptr.vmem [resolvable:$true] %s76_s17 }
  0x27   :  { %s9053_s21 = scalar_lea.hbm %s11423_s8, 1024 }
  0x28   :  { %p9054_p2 = scmp.ne.s32.totalorder %s11423_s8, %s9053_s21  ;;  %p9057_p3 = scmp.lt.u32.totalorder %s9053_s21, %s11423_s8 }
  0x2a   :  { %p9059_p4 = pnand %p9057_p3, %p9054_p2 }
  0x2c   :  { %9062 = shalt.err (!%p9059_p4)
}
  0x2d   :  { %s9063_s3 = scalar_lea.vmem %s63_s15, 1024  ;;  %p9068_p6 = scmp.lt.s32.totalorder %s63_s15, %s63_s15 }
  0x2e   :  { %p9064_p5 = scmp.ne.s32.totalorder %s63_s15, %s9063_s3  ;;  %p9069_p7 = scmp.lt.s32.totalorder %s9063_s3, %s9063_s3 }
  0x30   :  { %p9070_p8 = por %p9069_p7, %p9068_p6 }
  0x32   :  { %p9071_p9 = pnand %p9070_p8, %p9064_p5 }
  0x34   :  { %9074 = shalt.err (!%p9071_p9)
}
  0x35   :  { %68 = dma.hbm_to_vmem [thread:$0]  %s11423_s8, 1024, %s63_s15, [#allocation8], %s9128_s13, %s9128_s13, %s9129_s14  }
  0x36   :  { %s9075_s28 = scalar_lea.hbm %s11425_s10, 1024 }
  0x37   :  { %p9076_p10 = scmp.ne.s32.totalorder %s11425_s10, %s9075_s28  ;;  %p9079_p11 = scmp.lt.u32.totalorder %s9075_s28, %s11425_s10 }
  0x39   :  { %p9081_p12 = pnand %p9079_p11, %p9076_p10 }
  0x3b   :  { %9084 = shalt.err (!%p9081_p12)
}
  0x3c   :  { %s9085_s20 = scalar_lea.vmem %s9232_s17, 1024  ;;  %p9090_p0 = scmp.lt.s32.totalorder %s9232_s17, %s9232_s17 }
  0x3d   :  { %p9086_p13 = scmp.ne.s32.totalorder %s9232_s17, %s9085_s20  ;;  %p9091_p1 = scmp.lt.s32.totalorder %s9085_s20, %s9085_s20 }
  0x3f   :  { %p9092_p2 = por %p9091_p1, %p9090_p0 }
  0x41   :  { %p9093_p3 = pnand %p9092_p2, %p9086_p13 }
  0x43   :  { %9096 = shalt.err (!%p9093_p3)
}
  0x44   :  { %82 = dma.hbm_to_vmem [thread:$0]  %s11425_s10, 1024, %s9232_s17, [#allocation11], %s9128_s13, %s9128_s13, %s9129_s14  }
  0x45   :  { %9119 = dma.done.wait [#allocation5], 12288  }
  0x46   :  { %9120 = vsyncadd [#allocation5], 4294955008 }
  0x47   :  { %9121 = dma.done.wait [#allocation8], 1536  }
  0x48   :  { %9122 = vsyncadd [#allocation8], 4294965760 }
  0x49   :  { %9123 = dma.done.wait [#allocation11], 1024  }
  0x4a   :  { %9124 = vsyncadd [#allocation11], 4294966272  ;;  %v11428_v0 = vmov 0   ;;  %v433_v1 = vld [vmem:[#allocation4] sm:$0xff]  ;;  %v434_v3 = vld [vmem:[#allocation4 + $0x8] sm:$0xff]  ;;  %vm1009_vm2 = vcmask 523264  }
  0x4b   :  { %1045 = vmatprep.mubr.bf16.mxu0 %v11428_v0  ;;  %1086 = vmatprep.mubr.bf16.mxu1 %v11428_v0  ;;  %v437_v2 = vld [vmem:[#allocation4 + $0x20] sm:$0xff]  ;;  %v438_v5 = vld [vmem:[#allocation4 + $0x28] sm:$0xff] }
  0x4c   :  { %8809 = vset.pattern.permute.xlu0 %v11428_v0  ;;  %8810 = vset.pattern.permute.xlu1 %v11428_v0  ;;  %v9273_v4 = vcombine.high %v433_v1, %v437_v2  ;;  %v9275_v6 = vcombine.low %v433_v1, %v437_v2  ;;  %v441_v7 = vld [vmem:[#allocation4 + $0x40] sm:$0xff]  ;;  %v9277_v9 = vcombine.high %v434_v3, %v438_v5  ;;  %v442_v12 = vld [vmem:[#allocation4 + $0x48] sm:$0xff] }
  0x4d   :  { %v445_v8 = vld [vmem:[#allocation4 + $0x60] sm:$0xff]  ;;  %v9279_v10 = vcombine.low %v434_v3, %v438_v5  ;;  %v446_v13 = vld [vmem:[#allocation4 + $0x68] sm:$0xff] }
  0x4e   :  { %v9281_v11 = vcombine.high %v441_v7, %v445_v8  ;;  %v449_v14 = vld [vmem:[#allocation4 + $0x80] sm:$0xff]  ;;  %1013 = vmatprep.subr.bf16.mxu0 %v9273_v4  ;;  %v9284_v15 = vcombine.high %v442_v12, %v446_v13  ;;  %v450_v17 = vld [vmem:[#allocation4 + $0x88] sm:$0xff]  ;;  %1054 = vmatprep.subr.bf16.mxu1 %v9277_v9  ;;  %v9288_v19 = vcombine.low %v441_v7, %v445_v8 }
  0x4f   :  { %v453_v16 = vld [vmem:[#allocation4 + $0xa0] sm:$0xff]  ;;  %v454_v18 = vld [vmem:[#allocation4 + $0xa8] sm:$0xff]  ;;  %1014 = vmatpush1.bf16.msra.mxu0 %v9275_v6  ;;  %1055 = vmatpush1.bf16.msra.mxu1 %v9279_v10  ;;  %v9292_v20 = vcombine.low %v442_v12, %v446_v13 }
  0x50   :  { %1015 = vmatprep.subr.bf16.mxu0 %v9281_v11  ;;  %v9294_v21 = vcombine.high %v449_v14, %v453_v16  ;;  %1056 = vmatprep.subr.bf16.mxu1 %v9284_v15  ;;  %v9297_v22 = vcombine.high %v450_v17, %v454_v18  ;;  %v457_v23 = vld [vmem:[#allocation4 + $0xc0] sm:$0xff]  ;;  %v458_v25 = vld [vmem:[#allocation4 + $0xc8] sm:$0xff]  ;;  %v9300_v27 = vcombine.low %v449_v14, %v453_v16 }
  0x51   :  { %v461_v24 = vld [vmem:[#allocation4 + $0xe0] sm:$0xff]  ;;  %v462_v26 = vld [vmem:[#allocation4 + $0xe8] sm:$0xff]  ;;  %v9304_v28 = vcombine.low %v450_v17, %v454_v18 }
  0x52   :  { %v9306_v29 = vcombine.high %v457_v23, %v461_v24  ;;  %v9309_v30 = vcombine.high %v458_v25, %v462_v26  ;;  %v465_v31 = vld [vmem:[#allocation4 + $0x100] sm:$0xff]  ;;  %v466_v33 = vld [vmem:[#allocation4 + $0x108] sm:$0xff]  ;;  %v9312_v35 = vcombine.low %v457_v23, %v461_v24  ;;  %v9316_v36 = vcombine.low %v458_v25, %v462_v26  ;;  %v98_v24 = vld [vmem:[%s11415_s0] sm:$0xff] }
  0x53   :  { %1016 = vmatpush1.bf16.msra.mxu0 %v9288_v19  ;;  %1057 = vmatpush1.bf16.msra.mxu1 %v9292_v20  ;;  %v469_v32 = vld [vmem:[#allocation4 + $0x120] sm:$0xff]  ;;  %v470_v34 = vld [vmem:[#allocation4 + $0x128] sm:$0xff] }
  0x54   :  { %1017 = vmatprep.subr.bf16.mxu0 %v9294_v21  ;;  %1058 = vmatprep.subr.bf16.mxu1 %v9297_v22  ;;  %v9318_v37 = vcombine.high %v465_v31, %v469_v32  ;;  %v9321_v38 = vcombine.high %v466_v33, %v470_v34  ;;  %v473_v39 = vld [vmem:[#allocation4 + $0x140] sm:$0xff]  ;;  %v474_v41 = vld [vmem:[#allocation4 + $0x148] sm:$0xff]  ;;  %v9324_v43 = vcombine.low %v465_v31, %v469_v32 }
  0x55   :  { %v477_v40 = vld [vmem:[#allocation4 + $0x160] sm:$0xff]  ;;  %v478_v42 = vld [vmem:[#allocation4 + $0x168] sm:$0xff]  ;;  %v9328_v44 = vcombine.low %v466_v33, %v470_v34  ;;  %109 = vperm.xlu0 %8809, %v98_v24   ;;  %v447_v24 = vld [vmem:[#allocation4 + $0x70] sm:$0xff] }
  0x56   :  { %v9330_v45 = vcombine.high %v473_v39, %v477_v40  ;;  %v9333_v46 = vcombine.high %v474_v41, %v478_v42  ;;  %v481_v47 = vld [vmem:[#allocation4 + $0x180] sm:$0xff]  ;;  %v482_v49 = vld [vmem:[#allocation4 + $0x188] sm:$0xff]  ;;  %v9336_v51 = vcombine.low %v473_v39, %v477_v40  ;;  %v9340_v52 = vcombine.low %v474_v41, %v478_v42  ;;  %v99_v39 = vld [vmem:[%s11415_s0 + $0x8] sm:$0xff] }
  0x57   :  { %1018 = vmatpush1.bf16.msra.mxu0 %v9300_v27  ;;  %1059 = vmatpush1.bf16.msra.mxu1 %v9304_v28  ;;  %v485_v48 = vld [vmem:[#allocation4 + $0x1a0] sm:$0xff]  ;;  %v486_v50 = vld [vmem:[#allocation4 + $0x1a8] sm:$0xff] }
  0x58   :  { %1019 = vmatprep.subr.bf16.mxu0 %v9306_v29  ;;  %1060 = vmatprep.subr.bf16.mxu1 %v9309_v30  ;;  %v9342_v53 = vcombine.high %v481_v47, %v485_v48  ;;  %v9345_v54 = vcombine.high %v482_v49, %v486_v50  ;;  %v489_v55 = vld [vmem:[#allocation4 + $0x1c0] sm:$0xff]  ;;  %v490_v57 = vld [vmem:[#allocation4 + $0x1c8] sm:$0xff]  ;;  %v9348_v59 = vcombine.low %v481_v47, %v485_v48 }
  0x59   :  { %v493_v56 = vld [vmem:[#allocation4 + $0x1e0] sm:$0xff]  ;;  %v494_v58 = vld [vmem:[#allocation4 + $0x1e8] sm:$0xff]  ;;  %v9352_v60 = vcombine.low %v482_v49, %v486_v50  ;;  %114 = vperm.xlu0 %8809, %v99_v39   ;;  %v448_v39 = vld [vmem:[#allocation4 + $0x78] sm:$0xff] }
  0x5a   :  { %v9354_v61 = vcombine.high %v489_v55, %v493_v56  ;;  %v9357_v62 = vcombine.high %v490_v57, %v494_v58  ;;  %v497_v63 = vld [vmem:[#allocation4 + $0x200] sm:$0xff]  ;;  %v498_v2 = vld [vmem:[#allocation4 + $0x208] sm:$0xff]  ;;  %v9360_v5 = vcombine.low %v489_v55, %v493_v56  ;;  %v9364_v7 = vcombine.low %v490_v57, %v494_v58  ;;  %v102_v55 = vld [vmem:[%s11415_s0 + $0x20] sm:$0xff] }
  0x5b   :  { %1020 = vmatpush1.bf16.msra.mxu0 %v9312_v35  ;;  %1061 = vmatpush1.bf16.msra.mxu1 %v9316_v36  ;;  %v501_v1 = vld [vmem:[#allocation4 + $0x220] sm:$0xff]  ;;  %v502_v3 = vld [vmem:[#allocation4 + $0x228] sm:$0xff]  ;;  %v435_v58 = vld [vmem:[#allocation4 + $0x10] sm:$0xff] }
  0x5c   :  { %1021 = vmatprep.subr.bf16.mxu0 %v9318_v37  ;;  %1062 = vmatprep.subr.bf16.mxu1 %v9321_v38  ;;  %11730 = vst [vmem:[#allocation17_spill] sm:$0xff] %v9354_v61  ;;  %11731 = vst [vmem:[#allocation18_spill] sm:$0xff] %v9357_v62  ;;  %v9366_v8 = vcombine.high %v497_v63, %v501_v1  ;;  %v9369_v12 = vcombine.high %v498_v2, %v502_v3  ;;  %v505_v13 = vld [vmem:[#allocation4 + $0x240] sm:$0xff]  ;;  %v506_v16 = vld [vmem:[#allocation4 + $0x248] sm:$0xff] }
  0x5d   :  { %11732 = vst [vmem:[#allocation19_spill] sm:$0xff] %v9360_v5  ;;  %11733 = vst [vmem:[#allocation20_spill] sm:$0xff] %v9364_v7  ;;  %v509_v14 = vld [vmem:[#allocation4 + $0x260] sm:$0xff]  ;;  %v510_v17 = vld [vmem:[#allocation4 + $0x268] sm:$0xff]  ;;  %v9372_v18 = vcombine.low %v497_v63, %v501_v1  ;;  %v9379_v25 = vcombine.low %v498_v2, %v502_v3  ;;  %129 = vperm.xlu0 %8809, %v102_v55  }
  0x5e   :  { %11734 = vst [vmem:[#allocation21_spill] sm:$0xff] %v9366_v8  ;;  %11735 = vst [vmem:[#allocation22_spill] sm:$0xff] %v9369_v12  ;;  %v513_v23 = vld [vmem:[#allocation4 + $0x280] sm:$0xff]  ;;  %v9381_v26 = vcombine.high %v505_v13, %v509_v14  ;;  %v514_v32 = vld [vmem:[#allocation4 + $0x288] sm:$0xff]  ;;  %v9384_v33 = vcombine.high %v506_v16, %v510_v17  ;;  %v9390_v40 = vcombine.low %v505_v13, %v509_v14 }
  0x5f   :  { %1022 = vmatpush1.bf16.msra.mxu0 %v9324_v43  ;;  %1063 = vmatpush1.bf16.msra.mxu1 %v9328_v44  ;;  %11736 = vst [vmem:[#allocation23_spill] sm:$0xff] %v9372_v18  ;;  %11737 = vst [vmem:[#allocation24_spill] sm:$0xff] %v9379_v25  ;;  %v517_v31 = vld [vmem:[#allocation4 + $0x2a0] sm:$0xff]  ;;  %v518_v34 = vld [vmem:[#allocation4 + $0x2a8] sm:$0xff]  ;;  %v9394_v47 = vcombine.low %v506_v16, %v510_v17 }
  0x60   :  { %1023 = vmatprep.subr.bf16.mxu0 %v9330_v45  ;;  %1064 = vmatprep.subr.bf16.mxu1 %v9333_v46  ;;  %11738 = vst [vmem:[#allocation25_spill] sm:$0xff] %v9381_v26  ;;  %11739 = vst [vmem:[#allocation26_spill] sm:$0xff] %v9384_v33  ;;  %v521_v41 = vld [vmem:[#allocation4 + $0x2c0] sm:$0xff]  ;;  %v9396_v48 = vcombine.high %v513_v23, %v517_v31  ;;  %v522_v49 = vld [vmem:[#allocation4 + $0x2c8] sm:$0xff]  ;;  %v9402_v56 = vcombine.high %v514_v32, %v518_v34 }
  0x61   :  { %11740 = vst [vmem:[#allocation27_spill] sm:$0xff] %v9390_v40  ;;  %v525_v42 = vld [vmem:[#allocation4 + $0x2e0] sm:$0xff]  ;;  %11741 = vst [vmem:[#allocation28_spill] sm:$0xff] %v9394_v47  ;;  %v526_v50 = vld [vmem:[#allocation4 + $0x2e8] sm:$0xff]  ;;  %v9405_v57 = vcombine.low %v513_v23, %v517_v31  ;;  %v9409_v1 = vcombine.low %v514_v32, %v518_v34 }
  0x62   :  { %11742 = vst [vmem:[#allocation29_spill] sm:$0xff] %v9396_v48  ;;  %11743 = vst [vmem:[#allocation30_spill] sm:$0xff] %v9402_v56  ;;  %v439_v63 = vld [vmem:[#allocation4 + $0x30] sm:$0xff]  ;;  %v9411_v2 = vcombine.high %v521_v41, %v525_v42  ;;  %v436_v3 = vld [vmem:[#allocation4 + $0x18] sm:$0xff]  ;;  %v9417_v16 = vcombine.high %v522_v49, %v526_v50  ;;  %v9420_v17 = vcombine.low %v521_v41, %v525_v42 }
  0x63   :  { %1024 = vmatpush1.bf16.msra.mxu0 %v9336_v51  ;;  %1065 = vmatpush1.bf16.msra.mxu1 %v9340_v52  ;;  %11744 = vst [vmem:[#allocation31_spill] sm:$0xff] %v9405_v57  ;;  %11745 = vst [vmem:[#allocation32_spill] sm:$0xff] %v9409_v1  ;;  %v440_v13 = vld [vmem:[#allocation4 + $0x38] sm:$0xff]  ;;  %v104_v14 = vld [vmem:[%s11415_s0 + $0x30] sm:$0xff]  ;;  %v9424_v31 = vcombine.low %v522_v49, %v526_v50  ;;  %v9426_v32 = vcombine.high %v435_v58, %v439_v63 }
  0x64   :  { %1025 = vmatprep.subr.bf16.mxu0 %v9342_v53  ;;  %1066 = vmatprep.subr.bf16.mxu1 %v9345_v54  ;;  %11746 = vst [vmem:[#allocation33_spill] sm:$0xff] %v9411_v2  ;;  %11747 = vst [vmem:[#allocation34_spill] sm:$0xff] %v9417_v16  ;;  %v443_v23 = vld [vmem:[#allocation4 + $0x50] sm:$0xff]  ;;  %v444_v34 = vld [vmem:[#allocation4 + $0x58] sm:$0xff]  ;;  %v9429_v0 = vcombine.high %v436_v3, %v440_v13  ;;  %v9432_v41 = vcombine.low %v435_v58, %v439_v63 }
  0x65   :  { %11748 = vst [vmem:[#allocation35_spill] sm:$0xff] %v9420_v17  ;;  %11749 = vst [vmem:[#allocation36_spill] sm:$0xff] %v9424_v31  ;;  %139 = vperm.xlu0 %8809, %v104_v14   ;;  %v451_v42 = vld [vmem:[#allocation4 + $0x90] sm:$0xff]  ;;  %v9436_v49 = vcombine.low %v436_v3, %v440_v13  ;;  %v9438_v50 = vcombine.high %v443_v23, %v447_v24  ;;  %v11756_v14 = vmov 0   ;;  %v9446_v58 = vcombine.low %v443_v23, %v447_v24 }
  0x66   :  { %11750 = vst [vmem:[#allocation37_spill] sm:$0xff] %v9426_v32  ;;  %11751 = vst [vmem:[#allocation38_spill] sm:$0xff] %v9429_v0  ;;  %v455_v55 = vld [vmem:[#allocation4 + $0xb0] sm:$0xff]  ;;  %v9450_v63 = vcombine.low %v444_v34, %v448_v39 }
  0x67   :  { %1026 = vmatpush1.bf16.msra.mxu0 %v9348_v59  ;;  %1067 = vmatpush1.bf16.msra.mxu1 %v9352_v60  ;;  %11752 = vst [vmem:[#allocation39_spill] sm:$0xff] %v9432_v41  ;;  %11753 = vst [vmem:[#allocation40_spill] sm:$0xff] %v9436_v49  ;;  %v9452_v3 = vcombine.high %v451_v42, %v455_v55  ;;  %v9460_v23 = vcombine.low %v451_v42, %v455_v55 }
  0x68   :  { %1027 = vmatprep.subr.bf16.mxu0 %v9354_v61  ;;  %1068 = vmatprep.subr.bf16.mxu1 %v9357_v62  ;;  %11754 = vst [vmem:[#allocation41_spill] sm:$0xff] %v9438_v50  ;;  %11757 = vst [vmem:[#allocation43_spill] sm:$0xff] %v9446_v58 }
  0x69   :  { %11758 = vst [vmem:[#allocation44_spill] sm:$0xff] %v9450_v63  ;;  %11759 = vst [vmem:[#allocation45_spill] sm:$0xff] %v9452_v3 }
  0x6a   :  { %11761 = vst [vmem:[#allocation47_spill] sm:$0xff] %v9460_v23 }
  0x6b   :  { %1028 = vmatpush1.bf16.msra.mxu0 %v9360_v5  ;;  %1069 = vmatpush1.bf16.msra.mxu1 %v9364_v7 }
  0x6c   :  { %1029 = vmatprep.subr.bf16.mxu0 %v9366_v8  ;;  %1070 = vmatprep.subr.bf16.mxu1 %v9369_v12 }
  0x6f   :  { %1030 = vmatpush1.bf16.msra.mxu0 %v9372_v18  ;;  %1071 = vmatpush1.bf16.msra.mxu1 %v9379_v25 }
  0x70   :  { %1031 = vmatprep.subr.bf16.mxu0 %v9381_v26  ;;  %1072 = vmatprep.subr.bf16.mxu1 %v9384_v33 }
  0x73   :  { %1032 = vmatpush1.bf16.msra.mxu0 %v9390_v40  ;;  %1073 = vmatpush1.bf16.msra.mxu1 %v9394_v47 }
  0x74   :  { %1033 = vmatprep.subr.bf16.mxu0 %v9396_v48  ;;  %1074 = vmatprep.subr.bf16.mxu1 %v9402_v56 }
  0x77   :  { %1034 = vmatpush1.bf16.msra.mxu0 %v9405_v57  ;;  %1075 = vmatpush1.bf16.msra.mxu1 %v9409_v1  ;;  %v456_v1 = vld [vmem:[#allocation4 + $0xb8] sm:$0xff] }
  0x78   :  { %1035 = vmatprep.subr.bf16.mxu0 %v9411_v2  ;;  %1076 = vmatprep.subr.bf16.mxu1 %v9417_v16  ;;  %v452_v2 = vld [vmem:[#allocation4 + $0x98] sm:$0xff]  ;;  %v9441_v16 = vcombine.high %v444_v34, %v448_v39 }
  0x79   :  { %v9455_v13 = vcombine.high %v452_v2, %v456_v1  ;;  %v9464_v24 = vcombine.low %v452_v2, %v456_v1 }
  0x7a   :  { %11755 = vst [vmem:[#allocation42_spill] sm:$0xff] %v9441_v16 }
  0x7b   :  { %1036 = vmatpush1.bf16.msra.mxu0 %v9420_v17  ;;  %1077 = vmatpush1.bf16.msra.mxu1 %v9424_v31  ;;  %11760 = vst [vmem:[#allocation46_spill] sm:$0xff] %v9455_v13  ;;  %v460_v31 = vld [vmem:[#allocation4 + $0xd8] sm:$0xff]  ;;  %11762 = vst [vmem:[#allocation48_spill] sm:$0xff] %v9464_v24 }
  0x7c   :  { %1095 = vmatprep.subr.bf16.mxu0 %v9426_v32  ;;  %1136 = vmatprep.subr.bf16.mxu1 %v9429_v0  ;;  %v459_v0 = vld [vmem:[#allocation4 + $0xd0] sm:$0xff]  ;;  %v472_v17 = vld [vmem:[#allocation4 + $0x138] sm:$0xff] }
  0x7d   :  { %v463_v32 = vld [vmem:[#allocation4 + $0xf0] sm:$0xff] }
  0x7e   :  { %1046 = vmatmul.mubr.bf16.vlgmr.msra.gmra.mrb[0].mxu0 %v11756_v14  ;;  %1087 = vmatmul.mubr.bf16.vlgmr.msra.gmra.mrb[0].mxu1 %v11756_v14  ;;  %v9466_v34 = vcombine.high %v459_v0, %v463_v32  ;;  %v9472_v42 = vcombine.low %v459_v0, %v463_v32 }
  0x7f   :  { %1096 = vmatpush1.bf16.msra.mxu0 %v9432_v41  ;;  %1137 = vmatpush1.bf16.msra.mxu1 %v9436_v49  ;;  %v464_v41 = vld [vmem:[#allocation4 + $0xf8] sm:$0xff] }
  0x80   :  { %1097 = vmatprep.subr.bf16.mxu0 %v9438_v50  ;;  %1138 = vmatprep.subr.bf16.mxu1 %v9441_v16  ;;  %11763 = vst [vmem:[#allocation49_spill] sm:$0xff] %v9466_v34  ;;  %v9469_v39 = vcombine.high %v460_v31, %v464_v41  ;;  %v467_v16 = vld [vmem:[#allocation4 + $0x110] sm:$0xff]  ;;  %v468_v49 = vld [vmem:[#allocation4 + $0x118] sm:$0xff]  ;;  %11765 = vst [vmem:[#allocation51_spill] sm:$0xff] %v9472_v42  ;;  %v9476_v1 = vcombine.low %v460_v31, %v464_v41 }
  0x81   :  { %1127 = vmatprep.mubr.bf16.mxu0 %v11756_v14  ;;  %1168 = vmatprep.mubr.bf16.mxu1 %v11756_v14  ;;  %v471_v50 = vld [vmem:[#allocation4 + $0x130] sm:$0xff]  ;;  %v9481_v55 = vcombine.high %v468_v49, %v472_v17  ;;  %v9488_v31 = vcombine.low %v468_v49, %v472_v17 }
  0x82   :  { %11764 = vst [vmem:[#allocation50_spill] sm:$0xff] %v9469_v39  ;;  %11766 = vst [vmem:[#allocation52_spill] sm:$0xff] %v9476_v1  ;;  %v9478_v2 = vcombine.high %v467_v16, %v471_v50  ;;  %v9484_v0 = vcombine.low %v467_v16, %v471_v50 }
  0x83   :  { %1098 = vmatpush1.bf16.msra.mxu0 %v9446_v58  ;;  %1139 = vmatpush1.bf16.msra.mxu1 %v9450_v63  ;;  %11768 = vst [vmem:[#allocation54_spill] sm:$0xff] %v9481_v55  ;;  %v476_v63 = vld [vmem:[#allocation4 + $0x158] sm:$0xff]  ;;  %11770 = vst [vmem:[#allocation56_spill] sm:$0xff] %v9488_v31 }
  0x84   :  { %1099 = vmatprep.subr.bf16.mxu0 %v9452_v3  ;;  %1140 = vmatprep.subr.bf16.mxu1 %v9455_v13  ;;  %11767 = vst [vmem:[#allocation53_spill] sm:$0xff] %v9478_v2  ;;  %v475_v13 = vld [vmem:[#allocation4 + $0x150] sm:$0xff]  ;;  %v480_v58 = vld [vmem:[#allocation4 + $0x178] sm:$0xff]  ;;  %11769 = vst [vmem:[#allocation55_spill] sm:$0xff] %v9484_v0 }
  0x85   :  { %v479_v3 = vld [vmem:[#allocation4 + $0x170] sm:$0xff]  ;;  %v9493_v41 = vcombine.high %v476_v63, %v480_v58  ;;  %v9500_v17 = vcombine.low %v476_v63, %v480_v58 }
  0x86   :  { %v9490_v32 = vcombine.high %v475_v13, %v479_v3  ;;  %v9496_v16 = vcombine.low %v475_v13, %v479_v3 }
  0x87   :  { %1100 = vmatpush1.bf16.msra.mxu0 %v9460_v23  ;;  %1141 = vmatpush1.bf16.msra.mxu1 %v9464_v24  ;;  %11772 = vst [vmem:[#allocation58_spill] sm:$0xff] %v9493_v41  ;;  %v484_v24 = vld [vmem:[#allocation4 + $0x198] sm:$0xff]  ;;  %11774 = vst [vmem:[#allocation60_spill] sm:$0xff] %v9500_v17 }
  0x88   :  { %1101 = vmatprep.subr.bf16.mxu0 %v9466_v34  ;;  %1142 = vmatprep.subr.bf16.mxu1 %v9469_v39  ;;  %11771 = vst [vmem:[#allocation57_spill] sm:$0xff] %v9490_v32  ;;  %v483_v39 = vld [vmem:[#allocation4 + $0x190] sm:$0xff]  ;;  %v488_v23 = vld [vmem:[#allocation4 + $0x1b8] sm:$0xff]  ;;  %11773 = vst [vmem:[#allocation59_spill] sm:$0xff] %v9496_v16 }
  0x89   :  { %v487_v34 = vld [vmem:[#allocation4 + $0x1b0] sm:$0xff]  ;;  %v9505_v50 = vcombine.high %v484_v24, %v488_v23  ;;  %v9512_v58 = vcombine.low %v484_v24, %v488_v23 }
  0x8a   :  { %v9502_v49 = vcombine.high %v483_v39, %v487_v34  ;;  %v9508_v3 = vcombine.low %v483_v39, %v487_v34 }
  0x8b   :  { %1102 = vmatpush1.bf16.msra.mxu0 %v9472_v42  ;;  %1143 = vmatpush1.bf16.msra.mxu1 %v9476_v1  ;;  %11776 = vst [vmem:[#allocation62_spill] sm:$0xff] %v9505_v50  ;;  %v492_v1 = vld [vmem:[#allocation4 + $0x1d8] sm:$0xff]  ;;  %11778 = vst [vmem:[#allocation64_spill] sm:$0xff] %v9512_v58 }
  0x8c   :  { %1103 = vmatprep.subr.bf16.mxu0 %v9478_v2  ;;  %1144 = vmatprep.subr.bf16.mxu1 %v9481_v55  ;;  %11775 = vst [vmem:[#allocation61_spill] sm:$0xff] %v9502_v49  ;;  %v491_v55 = vld [vmem:[#allocation4 + $0x1d0] sm:$0xff]  ;;  %v496_v42 = vld [vmem:[#allocation4 + $0x1f8] sm:$0xff]  ;;  %11777 = vst [vmem:[#allocation63_spill] sm:$0xff] %v9508_v3 }
  0x8d   :  { %v495_v2 = vld [vmem:[#allocation4 + $0x1f0] sm:$0xff]  ;;  %v9517_v13 = vcombine.high %v492_v1, %v496_v42  ;;  %v9524_v23 = vcombine.low %v492_v1, %v496_v42 }
  0x8e   :  { %v9514_v63 = vcombine.high %v491_v55, %v495_v2  ;;  %v9520_v34 = vcombine.low %v491_v55, %v495_v2 }
  0x8f   :  { %1104 = vmatpush1.bf16.msra.mxu0 %v9484_v0  ;;  %1145 = vmatpush1.bf16.msra.mxu1 %v9488_v31  ;;  %11780 = vst [vmem:[#allocation66_spill] sm:$0xff] %v9517_v13  ;;  %v500_v31 = vld [vmem:[#allocation4 + $0x218] sm:$0xff]  ;;  %11782 = vst [vmem:[#allocation68_spill] sm:$0xff] %v9524_v23 }
  0x90   :  { %1105 = vmatprep.subr.bf16.mxu0 %v9490_v32  ;;  %1146 = vmatprep.subr.bf16.mxu1 %v9493_v41  ;;  %11779 = vst [vmem:[#allocation65_spill] sm:$0xff] %v9514_v63  ;;  %v499_v41 = vld [vmem:[#allocation4 + $0x210] sm:$0xff]  ;;  %v504_v0 = vld [vmem:[#allocation4 + $0x238] sm:$0xff]  ;;  %11781 = vst [vmem:[#allocation67_spill] sm:$0xff] %v9520_v34 }
  0x91   :  { %v503_v32 = vld [vmem:[#allocation4 + $0x230] sm:$0xff]  ;;  %v9529_v39 = vcombine.high %v500_v31, %v504_v0  ;;  %v9536_v42 = vcombine.low %v500_v31, %v504_v0 }
  0x92   :  { %v9526_v24 = vcombine.high %v499_v41, %v503_v32  ;;  %v9532_v2 = vcombine.low %v499_v41, %v503_v32 }
  0x93   :  { %1106 = vmatpush1.bf16.msra.mxu0 %v9496_v16  ;;  %1147 = vmatpush1.bf16.msra.mxu1 %v9500_v17  ;;  %11784 = vst [vmem:[#allocation70_spill] sm:$0xff] %v9529_v39  ;;  %v508_v17 = vld [vmem:[#allocation4 + $0x258] sm:$0xff] }
  0x94   :  { %1107 = vmatprep.subr.bf16.mxu0 %v9502_v49  ;;  %1148 = vmatprep.subr.bf16.mxu1 %v9505_v50  ;;  %11783 = vst [vmem:[#allocation69_spill] sm:$0xff] %v9526_v24  ;;  %v507_v50 = vld [vmem:[#allocation4 + $0x250] sm:$0xff]  ;;  %v512_v16 = vld [vmem:[#allocation4 + $0x278] sm:$0xff] }
  0x95   :  { %v511_v49 = vld [vmem:[#allocation4 + $0x270] sm:$0xff]  ;;  %v9541_v55 = vcombine.high %v508_v17, %v512_v16  ;;  %v9548_v0 = vcombine.low %v508_v17, %v512_v16 }
  0x96   :  { %v9538_v1 = vcombine.high %v507_v50, %v511_v49  ;;  %v9544_v32 = vcombine.low %v507_v50, %v511_v49 }
  0x97   :  { %1108 = vmatpush1.bf16.msra.mxu0 %v9508_v3  ;;  %1149 = vmatpush1.bf16.msra.mxu1 %v9512_v58  ;;  %11785 = vst [vmem:[#allocation71_spill] sm:$0xff] %v9541_v55  ;;  %v516_v58 = vld [vmem:[#allocation4 + $0x298] sm:$0xff] }
  0x98   :  { %1109 = vmatprep.subr.bf16.mxu0 %v9514_v63  ;;  %1150 = vmatprep.subr.bf16.mxu1 %v9517_v13  ;;  %v515_v13 = vld [vmem:[#allocation4 + $0x290] sm:$0xff]  ;;  %v520_v3 = vld [vmem:[#allocation4 + $0x2b8] sm:$0xff] }
  0x99   :  { %v519_v63 = vld [vmem:[#allocation4 + $0x2b0] sm:$0xff]  ;;  %v9553_v41 = vcombine.high %v516_v58, %v520_v3  ;;  %v9560_v16 = vcombine.low %v516_v58, %v520_v3  ;;  %v11787_v3 = vld [vmem:[#allocation33_spill] sm:$0xff]  ;;  %v11788_v58 = vld [vmem:[#allocation34_spill] sm:$0xff] }
  0x9a   :  { %v9550_v31 = vcombine.high %v515_v13, %v519_v63  ;;  %v9556_v49 = vcombine.low %v515_v13, %v519_v63  ;;  %v11789_v13 = vld [vmem:[#allocation35_spill] sm:$0xff] }
  0x9b   :  { %1110 = vmatpush1.bf16.msra.mxu0 %v9520_v34  ;;  %1151 = vmatpush1.bf16.msra.mxu1 %v9524_v23  ;;  %v524_v23 = vld [vmem:[#allocation4 + $0x2d8] sm:$0xff] }
  0x9c   :  { %1111 = vmatprep.subr.bf16.mxu0 %v9526_v24  ;;  %1152 = vmatprep.subr.bf16.mxu1 %v9529_v39  ;;  %v523_v39 = vld [vmem:[#allocation4 + $0x2d0] sm:$0xff]  ;;  %v528_v34 = vld [vmem:[#allocation4 + $0x2f8] sm:$0xff] }
  0x9d   :  { %v527_v24 = vld [vmem:[#allocation4 + $0x2f0] sm:$0xff]  ;;  %v9565_v50 = vcombine.high %v524_v23, %v528_v34  ;;  %v9572_v63 = vcombine.low %v524_v23, %v528_v34  ;;  %v11790_v34 = vld [vmem:[#allocation36_spill] sm:$0xff]  ;;  %v11791_v23 = vld [vmem:[#allocation37_spill] sm:$0xff] }
  0x9e   :  { %v9562_v17 = vcombine.high %v523_v39, %v527_v24 }
  0x9f   :  { %1112 = vmatpush1.bf16.msra.mxu0 %v9532_v2  ;;  %1153 = vmatpush1.bf16.msra.mxu1 %v9536_v42 }
  0xa0   :  { %1113 = vmatprep.subr.bf16.mxu0 %v9538_v1  ;;  %1154 = vmatprep.subr.bf16.mxu1 %v9541_v55  ;;  %v9568_v55 = vcombine.low %v523_v39, %v527_v24  ;;  %v11792_v24 = vld [vmem:[#allocation38_spill] sm:$0xff]  ;;  %v11514_v39 = vmov 0.0|0.0  }
  0xa3   :  { %1114 = vmatpush1.bf16.msra.mxu0 %v9544_v32  ;;  %1155 = vmatpush1.bf16.msra.mxu1 %v9548_v0 }
  0xa4   :  { %1115 = vmatprep.subr.bf16.mxu0 %v9550_v31  ;;  %1156 = vmatprep.subr.bf16.mxu1 %v9553_v41 }
  0xa7   :  { %1116 = vmatpush1.bf16.msra.mxu0 %v9556_v49  ;;  %1157 = vmatpush1.bf16.msra.mxu1 %v9560_v16 }
  0xa8   :  { %1117 = vmatprep.subr.bf16.mxu0 %v9562_v17  ;;  %1158 = vmatprep.subr.bf16.mxu1 %v9565_v50 }
  0xab   :  { %1118 = vmatpush1.bf16.msra.mxu0 %v9568_v55  ;;  %1159 = vmatpush1.bf16.msra.mxu1 %v9572_v63 }
  0xac   :  { %1230 = vmatprep.subr.bf16.mxu0 %v9273_v4  ;;  %1271 = vmatprep.subr.bf16.mxu1 %v9277_v9 }
  0xae   :  { %1128 = vmatmul.mubr.bf16.vlgmr.msra.gmra.mrb[4].mxu0 %v11756_v14  ;;  %1169 = vmatmul.mubr.bf16.vlgmr.msra.gmra.mrb[4].mxu1 %v11756_v14  ;;  %v11786_v14 = vld [vmem:[#allocation32_spill] sm:$0xff] }
  0xaf   :  { %1231 = vmatpush1.bf16.msra.mxu0 %v9275_v6  ;;  %1272 = vmatpush1.bf16.msra.mxu1 %v9279_v10 }
  0xb0   :  { %1232 = vmatprep.subr.bf16.mxu0 %v9281_v11  ;;  %1273 = vmatprep.subr.bf16.mxu1 %v9284_v15 }
  0xb1   :  { %1262 = vmatprep.mubr.bf16.mxu0 %v11514_v39  ;;  %1303 = vmatprep.mubr.bf16.mxu1 %v11514_v39 }
  0xb3   :  { %1233 = vmatpush1.bf16.msra.mxu0 %v9288_v19  ;;  %1274 = vmatpush1.bf16.msra.mxu1 %v9292_v20 }
  0xb4   :  { %1234 = vmatprep.subr.bf16.mxu0 %v9294_v21  ;;  %1275 = vmatprep.subr.bf16.mxu1 %v9297_v22 }
  0xb7   :  { %1235 = vmatpush1.bf16.msra.mxu0 %v9300_v27  ;;  %1276 = vmatpush1.bf16.msra.mxu1 %v9304_v28 }
  0xb8   :  { %1236 = vmatprep.subr.bf16.mxu0 %v9306_v29  ;;  %1277 = vmatprep.subr.bf16.mxu1 %v9309_v30 }
  0xbb   :  { %1237 = vmatpush1.bf16.msra.mxu0 %v9312_v35  ;;  %1278 = vmatpush1.bf16.msra.mxu1 %v9316_v36 }
  0xbc   :  { %1238 = vmatprep.subr.bf16.mxu0 %v9318_v37  ;;  %1279 = vmatprep.subr.bf16.mxu1 %v9321_v38 }
  0xbf   :  { %1239 = vmatpush1.bf16.msra.mxu0 %v9324_v43  ;;  %1280 = vmatpush1.bf16.msra.mxu1 %v9328_v44 }
  0xc0   :  { %1240 = vmatprep.subr.bf16.mxu0 %v9330_v45  ;;  %1281 = vmatprep.subr.bf16.mxu1 %v9333_v46 }
  0xc3   :  { %1241 = vmatpush1.bf16.msra.mxu0 %v9336_v51  ;;  %1282 = vmatpush1.bf16.msra.mxu1 %v9340_v52 }
  0xc4   :  { %1242 = vmatprep.subr.bf16.mxu0 %v9342_v53  ;;  %1283 = vmatprep.subr.bf16.mxu1 %v9345_v54 }
  0xc7   :  { %1243 = vmatpush1.bf16.msra.mxu0 %v9348_v59  ;;  %1284 = vmatpush1.bf16.msra.mxu1 %v9352_v60 }
  0xc8   :  { %1244 = vmatprep.subr.bf16.mxu0 %v9354_v61  ;;  %1285 = vmatprep.subr.bf16.mxu1 %v9357_v62 }
  0xcb   :  { %1245 = vmatpush1.bf16.msra.mxu0 %v9360_v5  ;;  %1286 = vmatpush1.bf16.msra.mxu1 %v9364_v7 }
  0xcc   :  { %1246 = vmatprep.subr.bf16.mxu0 %v9366_v8  ;;  %1287 = vmatprep.subr.bf16.mxu1 %v9369_v12 }
  0xcf   :  { %1247 = vmatpush1.bf16.msra.mxu0 %v9372_v18  ;;  %1288 = vmatpush1.bf16.msra.mxu1 %v9379_v25 }
  0xd0   :  { %1248 = vmatprep.subr.bf16.mxu0 %v9381_v26  ;;  %1289 = vmatprep.subr.bf16.mxu1 %v9384_v33  ;;  %v9645_v33 = vld [vmem:[%s11417_s2] sm:$0xff] }
  0xd1   :  { %11796 = vst [vmem:[#allocation75_spill] sm:$0xff] %v9645_v33 }
  0xd3   :  { %1249 = vmatpush1.bf16.msra.mxu0 %v9390_v40  ;;  %1290 = vmatpush1.bf16.msra.mxu1 %v9394_v47 }
  0xd4   :  { %1250 = vmatprep.subr.bf16.mxu0 %v9396_v48  ;;  %1291 = vmatprep.subr.bf16.mxu1 %v9402_v56  ;;  %v110_v40 = vpop.permute.xlu0 %109 }
  0xd7   :  { %1251 = vmatpush1.bf16.msra.mxu0 %v9405_v57  ;;  %1292 = vmatpush1.bf16.msra.mxu1 %v11786_v14  ;;  %v148_v57 = vlaneseq }
  0xd8   :  { %1252 = vmatprep.subr.bf16.mxu0 %v11787_v3  ;;  %1293 = vmatprep.subr.bf16.mxu1 %v11788_v58 }
  0xd9   :  { %v9631_v56 = vshrl.u32 %v148_v57, 7 }
  0xdb   :  { %1253 = vmatpush1.bf16.msra.mxu0 %v11789_v13  ;;  %1294 = vmatpush1.bf16.msra.mxu1 %v11790_v34  ;;  %11793 = vst [vmem:[#allocation72_spill] sm:$0xff] %v9631_v56  ;;  %v150_v3 = vsub.s32 0, %v9631_v56  ;;  %v9637_v13 = vld [vmem:[%s11416_s1] sm:$0xff] }
  0xdc   :  { %1312 = vmatprep.subr.bf16.mxu0 %v11791_v23  ;;  %1353 = vmatprep.subr.bf16.mxu1 %v11792_v24  ;;  %11794 = vst [vmem:[#allocation73_spill] sm:$0xff] %v9637_v13 }
  0xdd   :  { %v9640_v48 = vrot.slane %v9637_v13, %v150_v3  ;;  %v9649_v18 = vrot.slane %v9645_v33, %v150_v3 }
  0xdf   :  { %11795 = vst [vmem:[#allocation74_spill] sm:$0xff] %v9640_v48  ;;  %v188_v25 = vmul.f32 %v9640_v48, %v110_v40  ;;  %11797 = vst [vmem:[#allocation76_spill] sm:$0xff] %v9649_v18 }
 0x151   :  { %v1047_v34 = vpop.f32.mrb[0].mxu0  ;;  %v1088_v58 = vpop.f32.mrb[0].mxu1 }
 0x152   :  { %v1049_v23 = vpop.f32.mrb[1].mxu0  ;;  %v1090_v14 = vpop.f32.mrb[1].mxu1 }
 0x153   :  { %v1051_v24 = vpop.f32.mrb[2].mxu0  ;;  %v1092_v47 = vpop.f32.mrb[2].mxu1  ;;  %v294_v14 = vadd.f32 %v9649_v18, %v188_v25  ;;  %v166_v25 = vsub.s32 4, %v9631_v56 }
 0x154   :  { %v1052_v39 = vpop.f32.mrb[3].mxu0  ;;  %v1093_v26 = vpop.f32.mrb[3].mxu1  ;;  %v158_v24 = vsub.s32 2, %v9631_v56 }
 0x155   :  { %v1048_v23 = vadd.f32 %v1047_v34, %v294_v14  ;;  %v174_v14 = vsub.s32 6, %v9631_v56 }
 0x156   :  { %v9654_v47 = vrot.slane %v9637_v13, %v158_v24  ;;  %v9658_v8 = vrot.slane %v9645_v33, %v158_v24 }
 0x157   :  { %v7878_v12 = vmul.f32 -1.442695, %v1048_v23  ;;  %v9664_v23 = vrot.slane %v9637_v13, %v166_v25 }
 0x158   :  { %11798 = vst [vmem:[#allocation77_spill] sm:$0xff] %v9654_v47  ;;  %v190_v39 = vmul.f32 %v9654_v47, %v110_v40  ;;  %11799 = vst [vmem:[#allocation78_spill] sm:$0xff] %v9658_v8 }
 0x159   :  { %8839 = vpow2.f32 %v7878_v12  ;;  %11800 = vst [vmem:[#allocation79_spill] sm:$0xff] %v9664_v23  ;;  %v9667_v12 = vrot.slane %v9637_v13, %v174_v14  ;;  %v192_v24 = vmul.f32 %v9664_v23, %v110_v40 }
 0x15a   :  { %v296_v26 = vadd.f32 %v9658_v8, %v190_v39  ;;  %v9671_v39 = vrot.slane %v9645_v33, %v166_v25 }
 0x15b   :  { %11801 = vst [vmem:[#allocation80_spill] sm:$0xff] %v9667_v12 }
 0x15c   :  { %v1089_v48 = vadd.f32 %v1088_v58, %v296_v26  ;;  %11802 = vst [vmem:[#allocation81_spill] sm:$0xff] %v9671_v39  ;;  %v9675_v58 = vrot.slane %v9645_v33, %v174_v14  ;;  %v298_v26 = vadd.f32 %v9671_v39, %v192_v24  ;;  %v9679_v24 = vand.u32 127, %v148_v57  ;;  %v11810_v57 = vld [vmem:[#allocation43_spill] sm:$0xff] }
 0x15e   :  { %v7880_v7 = vmul.f32 -1.442695, %v1089_v48  ;;  %v194_v48 = vmul.f32 %v9667_v12, %v110_v40  ;;  %vm1213_vm0 = vcmp.lt.s32.totalorder %v9679_v24, 64  ;;  %v11867_v24 = vld [vmem:[#allocation44_spill] sm:$0xff] }
 0x15f   :  { %vm9687_vm1 = vmpackc.low %vm1213_vm0, %vm1213_vm0 }
 0x160   :  { %8841 = vpow2.f32 %v7880_v7 }
 0x163   :  { %v8840_v3 = vpop.eup %8839 }
 0x164   :  { %v1189_v34 = vadd.f32 1.0, %v8840_v3 }
 0x166   :  { %8843 = vrcp.f32 %v1189_v34  ;;  %v300_v34 = vadd.f32 %v9675_v58, %v194_v48 }
 0x16a   :  { %v8842_v3 = vpop.eup %8841 }
 0x16b   :  { %v1191_v12 = vadd.f32 1.0, %v8842_v3  ;;  %v11814_v3 = vld [vmem:[#allocation47_spill] sm:$0xff] }
 0x170   :  { %v8844_v47 = vpop.eup %8843 }
 0x181   :  { %v1129_v7 = vpop.f32.mrb[4].mxu0  ;;  %v1170_v8 = vpop.f32.mrb[4].mxu1 }
 0x182   :  { %v1130_v56 = vadd.f32 %v1129_v7, %v298_v26  ;;  %v1131_v13 = vpop.f32.mrb[5].mxu0  ;;  %v1172_v18 = vpop.f32.mrb[5].mxu1  ;;  %v1171_v25 = vadd.f32 %v1170_v8, %v300_v34  ;;  %v11806_v8 = vld [vmem:[#allocation40_spill] sm:$0xff] }
 0x183   :  { %v1133_v23 = vpop.f32.mrb[6].mxu0  ;;  %v1174_v62 = vpop.f32.mrb[6].mxu1  ;;  %v11807_v18 = vld [vmem:[#allocation41_spill] sm:$0xff]  ;;  %v11815_v34 = vld [vmem:[#allocation48_spill] sm:$0xff] }
 0x184   :  { %v1201_v5 = vmul.f32 %v8844_v47, %v1130_v56  ;;  %v1134_v61 = vpop.f32.mrb[7].mxu0  ;;  %v1175_v40 = vpop.f32.mrb[7].mxu1  ;;  %v11809_v56 = vmov 0.0|0.0   ;;  %v11811_v47 = vld [vmem:[#allocation44_spill] sm:$0xff]  ;;  %v11812_v23 = vld [vmem:[#allocation45_spill] sm:$0xff] }
 0x185   :  { %v11817_v40 = vld [vmem:[#allocation50_spill] sm:$0xff] }
 0x186   :  { %v1203_v14 = vadd.f32 %v1201_v5, %v1171_v25  ;;  %v11805_v5 = vld [vmem:[#allocation39_spill] sm:$0xff]  ;;  %v11816_v25 = vld [vmem:[#allocation49_spill] sm:$0xff] }
 0x188   :  { %8845 = vtanh.f32 %v1203_v14  ;;  %v11818_v14 = vld [vmem:[#allocation51_spill] sm:$0xff] }
 0x189   :  { %8847 = vrcp.f32 %v1191_v12  ;;  %v11813_v12 = vld [vmem:[#allocation46_spill] sm:$0xff] }
 0x192   :  { %v8846_v33 = vpop.eup %8845 }
 0x193   :  { %v1207_v26 = vsub.f32 0.0, %v8846_v33  ;;  %v8848_v7 = vpop.eup %8847 }
 0x195   :  { %v1209_v48 = vmul.f32 %v8848_v7, %v1207_v26  ;;  %v11819_v26 = vld [vmem:[#allocation52_spill] sm:$0xff]  ;;  %v11820_v7 = vld [vmem:[#allocation53_spill] sm:$0xff] }
 0x197   :  { %v9682_v13 = vadd.f32 %v8846_v33, %v1209_v48  ;;  %v11808_v33 = vld [vmem:[#allocation42_spill] sm:$0xff] }
 0x198   :  { %v11821_v48 = vld [vmem:[#allocation54_spill] sm:$0xff] }
 0x199   :  { %v7883_v62 = vpack.c.bf16 %v9682_v13, %v9682_v13 }
 0x19b   :  { %7884 = vmatmul.mubr.msk.bf16.vlgmr.msra.gmra.mrb[8].mxu0 %vm9687_vm1, %v7883_v62  ;;  %7887 = vmatmul.mubr.msk.bf16.vlgmr.msra.gmra.mrb[8].mxu1 %vm9687_vm1, %v7883_v62 }
 0x19c   :  { %1313 = vmatpush1.bf16.msra.mxu0 %v11805_v5  ;;  %1354 = vmatpush1.bf16.msra.mxu1 %v11806_v8 }
 0x19d   :  { %1314 = vmatprep.subr.bf16.mxu0 %v11807_v18  ;;  %1355 = vmatprep.subr.bf16.mxu1 %v11808_v33 }
 0x19e   :  { %1344 = vmatprep.mubr.bf16.mxu0 %v11809_v56  ;;  %1385 = vmatprep.mubr.bf16.mxu1 %v11809_v56 }
 0x1a0   :  { %1315 = vmatpush1.bf16.msra.mxu0 %v11810_v57  ;;  %1356 = vmatpush1.bf16.msra.mxu1 %v11811_v47  ;;  %v11822_v47 = vld [vmem:[#allocation55_spill] sm:$0xff] }
 0x1a1   :  { %1316 = vmatprep.subr.bf16.mxu0 %v11812_v23  ;;  %1357 = vmatprep.subr.bf16.mxu1 %v11813_v12  ;;  %v11823_v23 = vld [vmem:[#allocation56_spill] sm:$0xff]  ;;  %v11824_v12 = vld [vmem:[#allocation57_spill] sm:$0xff] }
 0x1a4   :  { %1317 = vmatpush1.bf16.msra.mxu0 %v11814_v3  ;;  %1358 = vmatpush1.bf16.msra.mxu1 %v11815_v34  ;;  %v11825_v3 = vld [vmem:[#allocation58_spill] sm:$0xff]  ;;  %v11826_v34 = vld [vmem:[#allocation59_spill] sm:$0xff] }
 0x1a5   :  { %1318 = vmatprep.subr.bf16.mxu0 %v11816_v25  ;;  %1359 = vmatprep.subr.bf16.mxu1 %v11817_v40  ;;  %v11827_v25 = vld [vmem:[#allocation60_spill] sm:$0xff]  ;;  %v11828_v40 = vld [vmem:[#allocation61_spill] sm:$0xff] }
 0x1a8   :  { %1319 = vmatpush1.bf16.msra.mxu0 %v11818_v14  ;;  %1360 = vmatpush1.bf16.msra.mxu1 %v11819_v26  ;;  %v11829_v14 = vld [vmem:[#allocation62_spill] sm:$0xff]  ;;  %v11830_v26 = vld [vmem:[#allocation63_spill] sm:$0xff] }
 0x1a9   :  { %1320 = vmatprep.subr.bf16.mxu0 %v11820_v7  ;;  %1361 = vmatprep.subr.bf16.mxu1 %v11821_v48  ;;  %v11831_v7 = vld [vmem:[#allocation64_spill] sm:$0xff]  ;;  %v11832_v48 = vld [vmem:[#allocation65_spill] sm:$0xff] }
 0x1ac   :  { %1321 = vmatpush1.bf16.msra.mxu0 %v11822_v47  ;;  %1362 = vmatpush1.bf16.msra.mxu1 %v11823_v23  ;;  %v11833_v47 = vld [vmem:[#allocation66_spill] sm:$0xff]  ;;  %v11834_v23 = vld [vmem:[#allocation67_spill] sm:$0xff] }
 0x1ad   :  { %1322 = vmatprep.subr.bf16.mxu0 %v11824_v12  ;;  %1363 = vmatprep.subr.bf16.mxu1 %v11825_v3  ;;  %v11835_v12 = vld [vmem:[#allocation68_spill] sm:$0xff]  ;;  %v11836_v3 = vld [vmem:[#allocation69_spill] sm:$0xff] }
 0x1b0   :  { %1323 = vmatpush1.bf16.msra.mxu0 %v11826_v34  ;;  %1364 = vmatpush1.bf16.msra.mxu1 %v11827_v25  ;;  %v11837_v34 = vld [vmem:[#allocation70_spill] sm:$0xff] }
 0x1b1   :  { %1324 = vmatprep.subr.bf16.mxu0 %v11828_v40  ;;  %1365 = vmatprep.subr.bf16.mxu1 %v11829_v14 }
 0x1b4   :  { %1325 = vmatpush1.bf16.msra.mxu0 %v11830_v26  ;;  %1366 = vmatpush1.bf16.msra.mxu1 %v11831_v7  ;;  %v11838_v26 = vld [vmem:[#allocation71_spill] sm:$0xff] }
 0x1b5   :  { %1326 = vmatprep.subr.bf16.mxu0 %v11832_v48  ;;  %1367 = vmatprep.subr.bf16.mxu1 %v11833_v47 }
 0x1b8   :  { %1327 = vmatpush1.bf16.msra.mxu0 %v11834_v23  ;;  %1368 = vmatpush1.bf16.msra.mxu1 %v11835_v12 }
 0x1b9   :  { %1328 = vmatprep.subr.bf16.mxu0 %v11836_v3  ;;  %1369 = vmatprep.subr.bf16.mxu1 %v11837_v34 }
 0x1bc   :  { %1329 = vmatpush1.bf16.msra.mxu0 %v9532_v2  ;;  %1370 = vmatpush1.bf16.msra.mxu1 %v9536_v42 }
 0x1bd   :  { %1330 = vmatprep.subr.bf16.mxu0 %v9538_v1  ;;  %1371 = vmatprep.subr.bf16.mxu1 %v11838_v26 }
 0x1c0   :  { %1331 = vmatpush1.bf16.msra.mxu0 %v9544_v32  ;;  %1372 = vmatpush1.bf16.msra.mxu1 %v9548_v0 }
 0x1c1   :  { %1332 = vmatprep.subr.bf16.mxu0 %v9550_v31  ;;  %1373 = vmatprep.subr.bf16.mxu1 %v9553_v41 }
 0x1c4   :  { %1333 = vmatpush1.bf16.msra.mxu0 %v9556_v49  ;;  %1374 = vmatpush1.bf16.msra.mxu1 %v9560_v16 }
 0x1c5   :  { %1334 = vmatprep.subr.bf16.mxu0 %v9562_v17  ;;  %1375 = vmatprep.subr.bf16.mxu1 %v9565_v50 }
 0x1c8   :  { %1335 = vmatpush1.bf16.msra.mxu0 %v9568_v55  ;;  %1376 = vmatpush1.bf16.msra.mxu1 %v9572_v63 }
 0x1c9   :  { %1450 = vmatprep.subr.bf16.mxu0 %v9273_v4  ;;  %1491 = vmatprep.subr.bf16.mxu1 %v9277_v9  ;;  %v11839_v4 = vld [vmem:[#allocation17_spill] sm:$0xff]  ;;  %v11841_v9 = vld [vmem:[#allocation19_spill] sm:$0xff] }
 0x1cb   :  { %7890 = vmatmul.mubr.msk.bf16.vlgmr.msra.gmra.mrb[12].mxu0 %vm9687_vm1, %v7883_v62  ;;  %7893 = vmatmul.mubr.msk.bf16.vlgmr.msra.gmra.mrb[12].mxu1 %vm9687_vm1, %v7883_v62 }
 0x1cc   :  { %1451 = vmatpush1.bf16.msra.mxu0 %v9275_v6  ;;  %1492 = vmatpush1.bf16.msra.mxu1 %v9279_v10  ;;  %v11840_v6 = vld [vmem:[#allocation18_spill] sm:$0xff]  ;;  %v11842_v10 = vld [vmem:[#allocation20_spill] sm:$0xff] }
 0x1cd   :  { %1452 = vmatprep.subr.bf16.mxu0 %v9281_v11  ;;  %1493 = vmatprep.subr.bf16.mxu1 %v9284_v15  ;;  %v11843_v11 = vld [vmem:[#allocation21_spill] sm:$0xff]  ;;  %v11844_v15 = vld [vmem:[#allocation22_spill] sm:$0xff] }
 0x1ce   :  { %1482 = vmatprep.mubr.bf16.mxu0 %v11809_v56  ;;  %1523 = vmatprep.mubr.bf16.mxu1 %v11809_v56 }
 0x1d0   :  { %1453 = vmatpush1.bf16.msra.mxu0 %v9288_v19  ;;  %1494 = vmatpush1.bf16.msra.mxu1 %v9292_v20  ;;  %v11845_v19 = vld [vmem:[#allocation23_spill] sm:$0xff]  ;;  %v11846_v20 = vld [vmem:[#allocation24_spill] sm:$0xff] }
 0x1d1   :  { %1454 = vmatprep.subr.bf16.mxu0 %v9294_v21  ;;  %1495 = vmatprep.subr.bf16.mxu1 %v9297_v22  ;;  %v11847_v21 = vld [vmem:[#allocation25_spill] sm:$0xff]  ;;  %v11848_v22 = vld [vmem:[#allocation26_spill] sm:$0xff] }
 0x1d4   :  { %1455 = vmatpush1.bf16.msra.mxu0 %v9300_v27  ;;  %1496 = vmatpush1.bf16.msra.mxu1 %v9304_v28  ;;  %v11849_v27 = vld [vmem:[#allocation27_spill] sm:$0xff]  ;;  %v11850_v28 = vld [vmem:[#allocation28_spill] sm:$0xff] }
 0x1d5   :  { %1456 = vmatprep.subr.bf16.mxu0 %v9306_v29  ;;  %1497 = vmatprep.subr.bf16.mxu1 %v9309_v30  ;;  %v11851_v29 = vld [vmem:[#allocation29_spill] sm:$0xff]  ;;  %v11852_v30 = vld [vmem:[#allocation30_spill] sm:$0xff] }
 0x1d8   :  { %1457 = vmatpush1.bf16.msra.mxu0 %v9312_v35  ;;  %1498 = vmatpush1.bf16.msra.mxu1 %v9316_v36  ;;  %v11853_v35 = vld [vmem:[#allocation31_spill] sm:$0xff]  ;;  %v11854_v36 = vld [vmem:[#allocation32_spill] sm:$0xff] }
 0x1d9   :  { %1458 = vmatprep.subr.bf16.mxu0 %v9318_v37  ;;  %1499 = vmatprep.subr.bf16.mxu1 %v9321_v38  ;;  %v11855_v37 = vld [vmem:[#allocation33_spill] sm:$0xff]  ;;  %v11856_v38 = vld [vmem:[#allocation34_spill] sm:$0xff] }
 0x1dc   :  { %1459 = vmatpush1.bf16.msra.mxu0 %v9324_v43  ;;  %1500 = vmatpush1.bf16.msra.mxu1 %v9328_v44  ;;  %v11857_v43 = vld [vmem:[#allocation35_spill] sm:$0xff]  ;;  %v11858_v44 = vld [vmem:[#allocation36_spill] sm:$0xff] }
 0x1dd   :  { %1460 = vmatprep.subr.bf16.mxu0 %v9330_v45  ;;  %1501 = vmatprep.subr.bf16.mxu1 %v9333_v46  ;;  %v11859_v45 = vld [vmem:[#allocation37_spill] sm:$0xff]  ;;  %v11860_v46 = vld [vmem:[#allocation38_spill] sm:$0xff] }
 0x1e0   :  { %1461 = vmatpush1.bf16.msra.mxu0 %v9336_v51  ;;  %1502 = vmatpush1.bf16.msra.mxu1 %v9340_v52  ;;  %v100_v51 = vld [vmem:[%s11415_s0 + $0x10] sm:$0xff]  ;;  %v101_v52 = vld [vmem:[%s11415_s0 + $0x18] sm:$0xff] }
 0x1e1   :  { %1462 = vmatprep.subr.bf16.mxu0 %v9342_v53  ;;  %1503 = vmatprep.subr.bf16.mxu1 %v9345_v54 }
 0x1e2   :  { %119 = vperm.xlu1 %8810, %v100_v51  }
 0x1e4   :  { %1463 = vmatpush1.bf16.msra.mxu0 %v9348_v59  ;;  %1504 = vmatpush1.bf16.msra.mxu1 %v9352_v60  ;;  %v103_v59 = vld [vmem:[%s11415_s0 + $0x28] sm:$0xff] }
 0x1e5   :  { %1464 = vmatprep.subr.bf16.mxu0 %v11839_v4  ;;  %1505 = vmatprep.subr.bf16.mxu1 %v11840_v6 }
 0x1e6   :  { %124 = vperm.xlu1 %8810, %v101_v52  }
 0x1e8   :  { %1465 = vmatpush1.bf16.msra.mxu0 %v11841_v9  ;;  %1506 = vmatpush1.bf16.msra.mxu1 %v11842_v10  ;;  %v105_v10 = vld [vmem:[%s11415_s0 + $0x38] sm:$0xff] }
 0x1e9   :  { %1466 = vmatprep.subr.bf16.mxu0 %v11843_v11  ;;  %1507 = vmatprep.subr.bf16.mxu1 %v11844_v15  ;;  %v115_v11 = vpop.permute.xlu0 %114  ;;  %v11861_v15 = vld [vmem:[#allocation74_spill] sm:$0xff] }
 0x1ea   :  { %134 = vperm.xlu1 %8810, %v103_v59  }
 0x1ec   :  { %1467 = vmatpush1.bf16.msra.mxu0 %v11845_v19  ;;  %1508 = vmatpush1.bf16.msra.mxu1 %v11846_v20  ;;  %v196_v19 = vmul.f32 %v11861_v15, %v115_v11  ;;  %v11862_v20 = vld [vmem:[#allocation76_spill] sm:$0xff] }
 0x1ed   :  { %1468 = vmatprep.subr.bf16.mxu0 %v11847_v21  ;;  %1509 = vmatprep.subr.bf16.mxu1 %v11848_v22 }
 0x1ee   :  { %144 = vperm.xlu1 %8810, %v105_v10   ;;  %v302_v21 = vadd.f32 %v11862_v20, %v196_v19 }
 0x1f0   :  { %1469 = vmatpush1.bf16.msra.mxu0 %v11849_v27  ;;  %1510 = vmatpush1.bf16.msra.mxu1 %v11850_v28  ;;  %v11863_v28 = vld [vmem:[#allocation77_spill] sm:$0xff] }
 0x1f1   :  { %1470 = vmatprep.subr.bf16.mxu0 %v11851_v29  ;;  %1511 = vmatprep.subr.bf16.mxu1 %v11852_v30  ;;  %v198_v29 = vmul.f32 %v11863_v28, %v115_v11  ;;  %v11864_v30 = vld [vmem:[#allocation78_spill] sm:$0xff] }
 0x1f4   :  { %1471 = vmatpush1.bf16.msra.mxu0 %v11853_v35  ;;  %1512 = vmatpush1.bf16.msra.mxu1 %v11854_v36  ;;  %v304_v35 = vadd.f32 %v11864_v30, %v198_v29 }
 0x1f5   :  { %1472 = vmatprep.subr.bf16.mxu0 %v11855_v37  ;;  %1513 = vmatprep.subr.bf16.mxu1 %v11856_v38 }
 0x1f8   :  { %1473 = vmatpush1.bf16.msra.mxu0 %v11857_v43  ;;  %1514 = vmatpush1.bf16.msra.mxu1 %v11858_v44  ;;  %v11865_v44 = vld [vmem:[#allocation79_spill] sm:$0xff] }
 0x1f9   :  { %1532 = vmatprep.subr.bf16.mxu0 %v11859_v45  ;;  %1573 = vmatprep.subr.bf16.mxu1 %v11860_v46  ;;  %v200_v45 = vmul.f32 %v11865_v44, %v115_v11  ;;  %v11866_v46 = vld [vmem:[#allocation80_spill] sm:$0xff] }
 0x1fa   :  { %v202_v51 = vmul.f32 %v11866_v46, %v115_v11 }
 0x1fb   :  { %v306_v52 = vadd.f32 %v9671_v39, %v200_v45 }
 0x26e   :  { %v1264_v53 = vpop.f32.mrb[8].mxu0  ;;  %v1305_v54 = vpop.f32.mrb[8].mxu1 }
 0x26f   :  { %v1266_v60 = vpop.f32.mrb[9].mxu0  ;;  %v1307_v61 = vpop.f32.mrb[9].mxu1  ;;  %v1265_v22 = vadd.f32 %v1264_v53, %v302_v21  ;;  %v1306_v36 = vadd.f32 %v1305_v54, %v304_v35 }
 0x270   :  { %v1268_v62 = vpop.f32.mrb[10].mxu0  ;;  %v1309_v4 = vpop.f32.mrb[10].mxu1 }
 0x271   :  { %v1269_v6 = vpop.f32.mrb[11].mxu0  ;;  %v1310_v9 = vpop.f32.mrb[11].mxu1  ;;  %v7894_v27 = vmul.f32 -1.442695, %v1265_v22  ;;  %v7896_v38 = vmul.f32 -1.442695, %v1306_v36  ;;  %v308_v62 = vadd.f32 %v9675_v58, %v202_v51 }
 0x272   :  { %v1215_v36 = vsel %vm1213_vm0, %v9682_v13, 0.0  ;;  %v11868_v13 = vld [vmem:[#allocation45_spill] sm:$0xff] }
 0x273   :  { %8849 = vpow2.f32 %v7894_v27 }
 0x274   :  { %8851 = vpow2.f32 %v7896_v38 }
 0x27d   :  { %v8850_v37 = vpop.eup %8849 }
 0x27e   :  { %v1406_v43 = vadd.f32 1.0, %v8850_v37  ;;  %v8852_v60 = vpop.eup %8851 }
 0x27f   :  { %v1408_v29 = vadd.f32 1.0, %v8852_v60  ;;  %v11878_v60 = vld [vmem:[#allocation55_spill] sm:$0xff] }
 0x280   :  { %8853 = vrcp.f32 %v1406_v43 }
 0x28a   :  { %v8854_v54 = vpop.eup %8853 }
 0x29e   :  { %v1346_v59 = vpop.f32.mrb[12].mxu0  ;;  %v1387_v53 = vpop.f32.mrb[12].mxu1 }
 0x29f   :  { %v1347_v61 = vadd.f32 %v1346_v59, %v306_v52  ;;  %v1348_v4 = vpop.f32.mrb[13].mxu0  ;;  %v1389_v6 = vpop.f32.mrb[13].mxu1  ;;  %v1388_v21 = vadd.f32 %v1387_v53, %v308_v62  ;;  %v11869_v52 = vld [vmem:[#allocation46_spill] sm:$0xff]  ;;  %v11870_v59 = vld [vmem:[#allocation47_spill] sm:$0xff]  ;;  %v11875_v53 = vld [vmem:[#allocation52_spill] sm:$0xff] }
 0x2a0   :  { %v1350_v9 = vpop.f32.mrb[14].mxu0  ;;  %v1391_v10 = vpop.f32.mrb[14].mxu1  ;;  %v11880_v62 = vld [vmem:[#allocation57_spill] sm:$0xff]  ;;  %v11881_v4 = vld [vmem:[#allocation58_spill] sm:$0xff]  ;;  %v11882_v6 = vld [vmem:[#allocation59_spill] sm:$0xff] }
 0x2a1   :  { %v1418_v19 = vmul.f32 %v8854_v54, %v1347_v61  ;;  %v1351_v22 = vpop.f32.mrb[15].mxu0  ;;  %v1392_v27 = vpop.f32.mrb[15].mxu1  ;;  %v11879_v61 = vld [vmem:[#allocation56_spill] sm:$0xff]  ;;  %v11883_v54 = vld [vmem:[#allocation63_spill] sm:$0xff]  ;;  %v1689_v9 = vld [vmem:[#allocation4 + $0xc8] sm:$0xff] }
 0x2a2   :  { %v1693_v10 = vld [vmem:[#allocation4 + $0xe8] sm:$0xff] }
 0x2a3   :  { %v1420_v35 = vadd.f32 %v1418_v19, %v1388_v21  ;;  %v9912_v27 = vcombine.high %v1689_v9, %v1693_v10 }
 0x2a5   :  { %8855 = vtanh.f32 %v1420_v35  ;;  %v1700_v35 = vld [vmem:[#allocation4 + $0x120] sm:$0xff] }
 0x2a6   :  { %8857 = vrcp.f32 %v1408_v29  ;;  %v1696_v29 = vld [vmem:[#allocation4 + $0x100] sm:$0xff] }
 0x2af   :  { %v8856_v11 = vpop.eup %8855 }
 0x2b0   :  { %v1424_v37 = vsub.f32 %v1215_v36, %v8856_v11  ;;  %v8858_v38 = vpop.eup %8857  ;;  %v1701_v36 = vld [vmem:[#allocation4 + $0x128] sm:$0xff] }
 0x2b2   :  { %v1426_v43 = vmul.f32 %v8858_v38, %v1424_v37  ;;  %v9919_v38 = vcombine.low %v1689_v9, %v1693_v10 }
 0x2b4   :  { %v9824_v45 = vadd.f32 %v8856_v11, %v1426_v43  ;;  %v1697_v11 = vld [vmem:[#allocation4 + $0x108] sm:$0xff]  ;;  %v9921_v43 = vcombine.high %v1696_v29, %v1700_v35 }
 0x2b6   :  { %v1445_v51 = vpack.c.bf16 %v9824_v45, %v9824_v45 }
 0x2b8   :  { %1483 = vmatmul.mubr.bf16.vlgmr.msra.gmra.mrb[16].mxu0 %v1445_v51  ;;  %1524 = vmatmul.mubr.bf16.vlgmr.msra.gmra.mrb[16].mxu1 %v1445_v51 }
 0x2b9   :  { %1533 = vmatpush1.bf16.msra.mxu0 %v11805_v5  ;;  %1574 = vmatpush1.bf16.msra.mxu1 %v11806_v8  ;;  %v11871_v5 = vld [vmem:[#allocation48_spill] sm:$0xff]  ;;  %v11872_v8 = vld [vmem:[#allocation49_spill] sm:$0xff] }
 0x2ba   :  { %1534 = vmatprep.subr.bf16.mxu0 %v11807_v18  ;;  %1575 = vmatprep.subr.bf16.mxu1 %v11808_v33  ;;  %v11873_v18 = vld [vmem:[#allocation50_spill] sm:$0xff]  ;;  %v11874_v33 = vld [vmem:[#allocation51_spill] sm:$0xff] }
 0x2bb   :  { %1564 = vmatprep.mubr.bf16.mxu0 %v11809_v56  ;;  %1605 = vmatprep.mubr.bf16.mxu1 %v11809_v56  ;;  %v11876_v56 = vld [vmem:[#allocation53_spill] sm:$0xff] }
 0x2bd   :  { %1535 = vmatpush1.bf16.msra.mxu0 %v11810_v57  ;;  %1576 = vmatpush1.bf16.msra.mxu1 %v11867_v24  ;;  %v11877_v57 = vld [vmem:[#allocation54_spill] sm:$0xff]  ;;  %v1704_v24 = vld [vmem:[#allocation4 + $0x140] sm:$0xff] }
 0x2be   :  { %1536 = vmatprep.subr.bf16.mxu0 %v11868_v13  ;;  %1577 = vmatprep.subr.bf16.mxu1 %v11869_v52  ;;  %v1708_v13 = vld [vmem:[#allocation4 + $0x160] sm:$0xff]  ;;  %v1705_v52 = vld [vmem:[#allocation4 + $0x148] sm:$0xff] }
 0x2c1   :  { %1537 = vmatpush1.bf16.msra.mxu0 %v11870_v59  ;;  %1578 = vmatpush1.bf16.msra.mxu1 %v11871_v5  ;;  %v1709_v59 = vld [vmem:[#allocation4 + $0x168] sm:$0xff]  ;;  %v9927_v5 = vcombine.low %v1696_v29, %v1700_v35  ;;  %v1736_v35 = vld [vmem:[#allocation4 + $0x240] sm:$0xff] }
 0x2c2   :  { %1538 = vmatprep.subr.bf16.mxu0 %v11872_v8  ;;  %1579 = vmatprep.subr.bf16.mxu1 %v11873_v18  ;;  %v9931_v8 = vcombine.low %v1697_v11, %v1701_v36  ;;  %v9933_v18 = vcombine.high %v1704_v24, %v1708_v13 }
 0x2c5   :  { %1539 = vmatpush1.bf16.msra.mxu0 %v11874_v33  ;;  %1580 = vmatpush1.bf16.msra.mxu1 %v11875_v53  ;;  %v9936_v33 = vcombine.high %v1705_v52, %v1709_v59  ;;  %v9939_v53 = vcombine.low %v1704_v24, %v1708_v13  ;;  %v1741_v13 = vld [vmem:[#allocation4 + $0x268] sm:$0xff] }
 0x2c6   :  { %1540 = vmatprep.subr.bf16.mxu0 %v11876_v56  ;;  %1581 = vmatprep.subr.bf16.mxu1 %v11877_v57  ;;  %v9943_v56 = vcombine.low %v1705_v52, %v1709_v59  ;;  %v1712_v57 = vld [vmem:[#allocation4 + $0x180] sm:$0xff] }
 0x2c9   :  { %1541 = vmatpush1.bf16.msra.mxu0 %v11878_v60  ;;  %1582 = vmatpush1.bf16.msra.mxu1 %v11879_v61  ;;  %v1716_v60 = vld [vmem:[#allocation4 + $0x1a0] sm:$0xff]  ;;  %v1713_v61 = vld [vmem:[#allocation4 + $0x188] sm:$0xff] }
 0x2ca   :  { %1542 = vmatprep.subr.bf16.mxu0 %v11880_v62  ;;  %1583 = vmatprep.subr.bf16.mxu1 %v11881_v4  ;;  %v9948_v62 = vcombine.high %v1712_v57, %v1716_v60  ;;  %v1717_v4 = vld [vmem:[#allocation4 + $0x1a8] sm:$0xff] }
 0x2cd   :  { %1543 = vmatpush1.bf16.msra.mxu0 %v11882_v6  ;;  %1584 = vmatpush1.bf16.msra.mxu1 %v11827_v25  ;;  %v9950_v6 = vcombine.low %v1712_v57, %v1716_v60  ;;  %v1744_v60 = vld [vmem:[#allocation4 + $0x280] sm:$0xff] }
 0x2ce   :  { %1544 = vmatprep.subr.bf16.mxu0 %v11828_v40  ;;  %1585 = vmatprep.subr.bf16.mxu1 %v11829_v14 }
 0x2d1   :  { %1545 = vmatpush1.bf16.msra.mxu0 %v11883_v54  ;;  %1586 = vmatpush1.bf16.msra.mxu1 %v11831_v7  ;;  %v1688_v7 = vld [vmem:[#allocation4 + $0xc0] sm:$0xff]  ;;  %v9952_v54 = vcombine.low %v1713_v61, %v1717_v4 }
 0x2d2   :  { %1546 = vmatprep.subr.bf16.mxu0 %v11832_v48  ;;  %1587 = vmatprep.subr.bf16.mxu1 %v11833_v47  ;;  %v1680_v47 = vld [vmem:[#allocation4 + $0x80] sm:$0xff] }
 0x2d3   :  { %v1692_v48 = vld [vmem:[#allocation4 + $0xe0] sm:$0xff] }
 0x2d4   :  { %v9909_v22 = vcombine.high %v1688_v7, %v1692_v48  ;;  %v9915_v37 = vcombine.low %v1688_v7, %v1692_v48  ;;  %v1733_v48 = vld [vmem:[#allocation4 + $0x228] sm:$0xff] }
 0x2d5   :  { %1547 = vmatpush1.bf16.msra.mxu0 %v11834_v23  ;;  %1588 = vmatpush1.bf16.msra.mxu1 %v11835_v12  ;;  %v1684_v12 = vld [vmem:[#allocation4 + $0xa0] sm:$0xff] }
 0x2d6   :  { %1548 = vmatprep.subr.bf16.mxu0 %v11836_v3  ;;  %1589 = vmatprep.subr.bf16.mxu1 %v11837_v34  ;;  %v1681_v3 = vld [vmem:[#allocation4 + $0x88] sm:$0xff]  ;;  %v9897_v14 = vcombine.high %v1680_v47, %v1684_v12  ;;  %v9903_v19 = vcombine.low %v1680_v47, %v1684_v12  ;;  %v1728_v12 = vld [vmem:[#allocation4 + $0x200] sm:$0xff] }
 0x2d7   :  { %v1685_v34 = vld [vmem:[#allocation4 + $0xa8] sm:$0xff] }
 0x2d8   :  { %v9907_v21 = vcombine.low %v1681_v3, %v1685_v34 }
 0x2d9   :  { %1549 = vmatpush1.bf16.msra.mxu0 %v9532_v2  ;;  %1590 = vmatpush1.bf16.msra.mxu1 %v9536_v42  ;;  %v1664_v2 = vld [vmem:[#allocation4] sm:$0xff] }
 0x2da   :  { %1550 = vmatprep.subr.bf16.mxu0 %v9538_v1  ;;  %1591 = vmatprep.subr.bf16.mxu1 %v11838_v26  ;;  %v1668_v42 = vld [vmem:[#allocation4 + $0x20] sm:$0xff]  ;;  %v1665_v1 = vld [vmem:[#allocation4 + $0x8] sm:$0xff]  ;;  %v9900_v26 = vcombine.high %v1681_v3, %v1685_v34 }
 0x2db   :  { %v1732_v3 = vld [vmem:[#allocation4 + $0x220] sm:$0xff]  ;;  %v1729_v34 = vld [vmem:[#allocation4 + $0x208] sm:$0xff] }
 0x2dc   :  { %v9972_v7 = vcombine.high %v1728_v12, %v1732_v3  ;;  %v9974_v9 = vcombine.low %v1728_v12, %v1732_v3  ;;  %v9976_v10 = vcombine.low %v1729_v34, %v1733_v48  ;;  %v9978_v29 = vcombine.high %v1729_v34, %v1733_v48  ;;  %v1752_v3 = vld [vmem:[#allocation4 + $0x2c0] sm:$0xff]  ;;  %v1753_v48 = vld [vmem:[#allocation4 + $0x2c8] sm:$0xff] }
 0x2dd   :  { %1551 = vmatpush1.bf16.msra.mxu0 %v9544_v32  ;;  %1592 = vmatpush1.bf16.msra.mxu1 %v9548_v0  ;;  %v9876_v32 = vcombine.low %v1664_v2, %v1668_v42  ;;  %v9878_v0 = vcombine.high %v1664_v2, %v1668_v42  ;;  %v9954_v2 = vcombine.high %v1713_v61, %v1717_v4  ;;  %v1720_v42 = vld [vmem:[#allocation4 + $0x1c0] sm:$0xff]  ;;  %v1745_v4 = vld [vmem:[#allocation4 + $0x288] sm:$0xff] }
 0x2de   :  { %1552 = vmatprep.subr.bf16.mxu0 %v9550_v31  ;;  %1593 = vmatprep.subr.bf16.mxu1 %v9553_v41  ;;  %v1669_v31 = vld [vmem:[#allocation4 + $0x28] sm:$0xff]  ;;  %v1672_v41 = vld [vmem:[#allocation4 + $0x40] sm:$0xff]  ;;  %11884 = vst [vmem:[#allocation39_spill] sm:$0xff] %v9972_v7  ;;  %11885 = vst [vmem:[#allocation40_spill] sm:$0xff] %v9974_v9 }
 0x2df   :  { %11886 = vst [vmem:[#allocation41_spill] sm:$0xff] %v9976_v10  ;;  %11887 = vst [vmem:[#allocation42_spill] sm:$0xff] %v9978_v29  ;;  %v1748_v61 = vld [vmem:[#allocation4 + $0x2a0] sm:$0xff] }
 0x2e0   :  { %v1756_v34 = vld [vmem:[#allocation4 + $0x2e0] sm:$0xff] }
 0x2e1   :  { %1553 = vmatpush1.bf16.msra.mxu0 %v9556_v49  ;;  %1594 = vmatpush1.bf16.msra.mxu1 %v9560_v16  ;;  %v1676_v49 = vld [vmem:[#allocation4 + $0x60] sm:$0xff]  ;;  %v9880_v16 = vcombine.low %v1665_v1, %v1669_v31 }
 0x2e2   :  { %1554 = vmatprep.subr.bf16.mxu0 %v9562_v17  ;;  %1595 = vmatprep.subr.bf16.mxu1 %v9565_v50  ;;  %v9882_v17 = vcombine.high %v1665_v1, %v1669_v31  ;;  %v9884_v50 = vcombine.high %v1672_v41, %v1676_v49  ;;  %v9891_v25 = vcombine.low %v1672_v41, %v1676_v49  ;;  %v1724_v1 = vld [vmem:[#allocation4 + $0x1e0] sm:$0xff]  ;;  %v1721_v31 = vld [vmem:[#allocation4 + $0x1c8] sm:$0xff] }
 0x2e3   :  { %v9960_v41 = vcombine.high %v1720_v42, %v1724_v1  ;;  %v1725_v49 = vld [vmem:[#allocation4 + $0x1e8] sm:$0xff] }
 0x2e4   :  { %v9966_v47 = vcombine.high %v1721_v31, %v1725_v49 }
 0x2e5   :  { %1555 = vmatpush1.bf16.msra.mxu0 %v9568_v55  ;;  %1596 = vmatpush1.bf16.msra.mxu1 %v9572_v63  ;;  %v1673_v55 = vld [vmem:[#allocation4 + $0x48] sm:$0xff] }
 0x2e6   :  { %v1677_v63 = vld [vmem:[#allocation4 + $0x68] sm:$0xff]  ;;  %2243 = vmatprep.subr.bf16.mxu0 %v9878_v0  ;;  %2284 = vmatprep.subr.bf16.mxu1 %v9882_v17 }
 0x2e7   :  { %v9887_v23 = vcombine.high %v1673_v55, %v1677_v63  ;;  %v9895_v40 = vcombine.low %v1673_v55, %v1677_v63  ;;  %v9962_v55 = vcombine.low %v1720_v42, %v1724_v1  ;;  %v9964_v63 = vcombine.low %v1721_v31, %v1725_v49  ;;  %v1749_v1 = vld [vmem:[#allocation4 + $0x2a8] sm:$0xff] }
 0x2e8   :  { %1565 = vmatmul.mubr.bf16.vlgmr.msra.gmra.mrb[20].mxu0 %v1445_v51  ;;  %1606 = vmatmul.mubr.bf16.vlgmr.msra.gmra.mrb[20].mxu1 %v1445_v51  ;;  %v9924_v51 = vcombine.high %v1697_v11, %v1701_v36  ;;  %v1740_v11 = vld [vmem:[#allocation4 + $0x260] sm:$0xff]  ;;  %v1737_v36 = vld [vmem:[#allocation4 + $0x248] sm:$0xff]  ;;  %v9996_v42 = vcombine.high %v1744_v60, %v1748_v61  ;;  %v9998_v31 = vcombine.low %v1744_v60, %v1748_v61  ;;  %v1666_v61 = vld [vmem:[#allocation4 + $0x10] sm:$0xff] }
 0x2e9   :  { %2244 = vmatpush1.bf16.msra.mxu0 %v9876_v32  ;;  %2285 = vmatpush1.bf16.msra.mxu1 %v9880_v16  ;;  %v9984_v24 = vcombine.high %v1736_v35, %v1740_v11  ;;  %v9986_v52 = vcombine.low %v1736_v35, %v1740_v11  ;;  %v9988_v59 = vcombine.low %v1737_v36, %v1741_v13  ;;  %v1757_v11 = vld [vmem:[#allocation4 + $0x2e8] sm:$0xff] }
 0x2ea   :  { %2245 = vmatprep.subr.bf16.mxu0 %v9884_v50  ;;  %2286 = vmatprep.subr.bf16.mxu1 %v9887_v23  ;;  %v9990_v57 = vcombine.high %v1737_v36, %v1741_v13  ;;  %11892 = vst [vmem:[#allocation64_spill] sm:$0xff] %v9996_v42  ;;  %11893 = vst [vmem:[#allocation65_spill] sm:$0xff] %v9998_v31  ;;  %v10000_v49 = vcombine.low %v1745_v4, %v1749_v1 }
 0x2eb   :  { %11888 = vst [vmem:[#allocation43_spill] sm:$0xff] %v9984_v24  ;;  %11889 = vst [vmem:[#allocation60_spill] sm:$0xff] %v9986_v52  ;;  %v10002_v12 = vcombine.high %v1745_v4, %v1749_v1  ;;  %v10005_v35 = vcombine.high %v1752_v3, %v1756_v34  ;;  %v10009_v36 = vcombine.low %v1752_v3, %v1756_v34  ;;  %v1670_v4 = vld [vmem:[#allocation4 + $0x30] sm:$0xff]  ;;  %v1667_v1 = vld [vmem:[#allocation4 + $0x18] sm:$0xff] }
 0x2ec   :  { %11890 = vst [vmem:[#allocation61_spill] sm:$0xff] %v9988_v59  ;;  %11891 = vst [vmem:[#allocation62_spill] sm:$0xff] %v9990_v57  ;;  %v10011_v13 = vcombine.high %v1753_v48, %v1757_v11  ;;  %v10015_v60 = vcombine.low %v1753_v48, %v1757_v11  ;;  %v1671_v3 = vld [vmem:[#allocation4 + $0x38] sm:$0xff]  ;;  %v10022_v34 = vcombine.low %v1666_v61, %v1670_v4 }
 0x2ed   :  { %2246 = vmatpush1.bf16.msra.mxu0 %v9891_v25  ;;  %2287 = vmatpush1.bf16.msra.mxu1 %v9895_v40  ;;  %11894 = vst [vmem:[#allocation66_spill] sm:$0xff] %v10000_v49  ;;  %11895 = vst [vmem:[#allocation67_spill] sm:$0xff] %v10002_v12 }
 0x2ee   :  { %2247 = vmatprep.subr.bf16.mxu0 %v9897_v14  ;;  %2288 = vmatprep.subr.bf16.mxu1 %v9900_v26  ;;  %11896 = vst [vmem:[#allocation68_spill] sm:$0xff] %v10005_v35  ;;  %11897 = vst [vmem:[#allocation69_spill] sm:$0xff] %v10009_v36 }
 0x2ef   :  { %11898 = vst [vmem:[#allocation70_spill] sm:$0xff] %v10011_v13  ;;  %11899 = vst [vmem:[#allocation71_spill] sm:$0xff] %v10015_v60 }
 0x2f1   :  { %2248 = vmatpush1.bf16.msra.mxu0 %v9903_v19  ;;  %2289 = vmatpush1.bf16.msra.mxu1 %v9907_v21 }
 0x2f2   :  { %2249 = vmatprep.subr.bf16.mxu0 %v9909_v22  ;;  %2290 = vmatprep.subr.bf16.mxu1 %v9912_v27 }
 0x2f5   :  { %2250 = vmatpush1.bf16.msra.mxu0 %v9915_v37  ;;  %2291 = vmatpush1.bf16.msra.mxu1 %v9919_v38 }
 0x2f6   :  { %2251 = vmatprep.subr.bf16.mxu0 %v9921_v43  ;;  %2292 = vmatprep.subr.bf16.mxu1 %v9924_v51 }
 0x2f9   :  { %2252 = vmatpush1.bf16.msra.mxu0 %v9927_v5  ;;  %2293 = vmatpush1.bf16.msra.mxu1 %v9931_v8 }
 0x2fa   :  { %2253 = vmatprep.subr.bf16.mxu0 %v9933_v18  ;;  %2294 = vmatprep.subr.bf16.mxu1 %v9936_v33 }
 0x2fd   :  { %2254 = vmatpush1.bf16.msra.mxu0 %v9939_v53  ;;  %2295 = vmatpush1.bf16.msra.mxu1 %v9943_v56 }
 0x2fe   :  { %2255 = vmatprep.subr.bf16.mxu0 %v9948_v62  ;;  %2296 = vmatprep.subr.bf16.mxu1 %v9954_v2 }
 0x301   :  { %2256 = vmatpush1.bf16.msra.mxu0 %v9950_v6  ;;  %2297 = vmatpush1.bf16.msra.mxu1 %v9952_v54 }
 0x302   :  { %2257 = vmatprep.subr.bf16.mxu0 %v9960_v41  ;;  %2298 = vmatprep.subr.bf16.mxu1 %v9966_v47 }
 0x305   :  { %2258 = vmatpush1.bf16.msra.mxu0 %v9962_v55  ;;  %2299 = vmatpush1.bf16.msra.mxu1 %v9964_v63 }
 0x306   :  { %2259 = vmatprep.subr.bf16.mxu0 %v9972_v7  ;;  %2300 = vmatprep.subr.bf16.mxu1 %v9978_v29 }
 0x309   :  { %2260 = vmatpush1.bf16.msra.mxu0 %v9974_v9  ;;  %2301 = vmatpush1.bf16.msra.mxu1 %v9976_v10 }
 0x30a   :  { %2261 = vmatprep.subr.bf16.mxu0 %v9984_v24  ;;  %2302 = vmatprep.subr.bf16.mxu1 %v9990_v57 }
 0x30d   :  { %2262 = vmatpush1.bf16.msra.mxu0 %v9986_v52  ;;  %2303 = vmatpush1.bf16.msra.mxu1 %v9988_v59 }
 0x30e   :  { %2263 = vmatprep.subr.bf16.mxu0 %v9996_v42  ;;  %2304 = vmatprep.subr.bf16.mxu1 %v10002_v12  ;;  %v10024_v12 = vcombine.low %v1667_v1, %v1671_v3 }
 0x311   :  { %2264 = vmatpush1.bf16.msra.mxu0 %v9998_v31  ;;  %2305 = vmatpush1.bf16.msra.mxu1 %v10000_v49  ;;  %v10020_v31 = vcombine.high %v1666_v61, %v1670_v4  ;;  %v10026_v49 = vcombine.high %v1667_v1, %v1671_v3  ;;  %v120_v61 = vpop.permute.xlu1 %119  ;;  %v11903_v4 = vld [vmem:[#allocation73_spill] sm:$0xff] }
 0x312   :  { %2265 = vmatprep.subr.bf16.mxu0 %v10005_v35  ;;  %2306 = vmatprep.subr.bf16.mxu1 %v10011_v13  ;;  %v11902_v35 = vld [vmem:[#allocation72_spill] sm:$0xff]  ;;  %v204_v1 = vmul.f32 %v11861_v15, %v120_v61  ;;  %v206_v15 = vmul.f32 %v11863_v28, %v120_v61 }
 0x313   :  { %11900 = vst [vmem:[#allocation17_spill] sm:$0xff] %v10020_v31  ;;  %11901 = vst [vmem:[#allocation18_spill] sm:$0xff] %v10026_v49  ;;  %v154_v42 = vsub.s32 1, %v11902_v35 }
 0x314   :  { %v310_v10 = vadd.f32 %v11862_v20, %v204_v1  ;;  %v312_v1 = vadd.f32 %v11864_v30, %v206_v15 }
 0x315   :  { %2266 = vmatpush1.bf16.msra.mxu0 %v10009_v36  ;;  %2307 = vmatpush1.bf16.msra.mxu1 %v10015_v60  ;;  %v10032_v24 = vrot.slane %v11903_v4, %v154_v42 }
 0x316   :  { %2325 = vmatprep.subr.bf16.mxu0 %v10020_v31  ;;  %2366 = vmatprep.subr.bf16.mxu1 %v10026_v49  ;;  %v11905_v31 = vld [vmem:[#allocation75_spill] sm:$0xff] }
 0x317   :  { %11904 = vst [vmem:[#allocation19_spill] sm:$0xff] %v10032_v24  ;;  %v205_v3 = vmul.f32 %v10032_v24, %v120_v61  ;;  %v10037_v49 = vrot.slane %v11905_v31, %v154_v42 }
 0x319   :  { %11906 = vst [vmem:[#allocation20_spill] sm:$0xff] %v10037_v49  ;;  %v311_v9 = vadd.f32 %v10037_v49, %v205_v3 }
 0x38b   :  { %v1484_v48 = vpop.f32.mrb[16].mxu0  ;;  %v1525_v11 = vpop.f32.mrb[16].mxu1 }
 0x38c   :  { %v1486_v36 = vpop.f32.mrb[17].mxu0  ;;  %v1527_v13 = vpop.f32.mrb[17].mxu1  ;;  %v1485_v29 = vadd.f32 %v1484_v48, %v310_v10  ;;  %v1526_v10 = vadd.f32 %v1525_v11, %v312_v1 }
 0x38d   :  { %v1488_v60 = vpop.f32.mrb[18].mxu0  ;;  %v1529_v59 = vpop.f32.mrb[18].mxu1 }
 0x38e   :  { %v1489_v52 = vpop.f32.mrb[19].mxu0  ;;  %v1530_v57 = vpop.f32.mrb[19].mxu1  ;;  %v1487_v60 = vadd.f32 %v1486_v36, %v311_v9  ;;  %v7898_v59 = vmul.f32 -1.442695, %v1485_v29  ;;  %v7900_v3 = vmul.f32 -1.442695, %v1526_v10 }
 0x38f   :  { %v162_v52 = vsub.s32 3, %v11902_v35 }
 0x390   :  { %v7899_v57 = vmul.f32 -1.442695, %v1487_v60  ;;  %8859 = vpow2.f32 %v7898_v59  ;;  %v170_v59 = vsub.s32 5, %v11902_v35 }
 0x391   :  { %v10043_v7 = vrot.slane %v11903_v4, %v162_v52  ;;  %v10048_v42 = vrot.slane %v11905_v31, %v162_v52  ;;  %v178_v52 = vsub.s32 7, %v11902_v35 }
 0x392   :  { %8861 = vpow2.f32 %v7899_v57  ;;  %v10055_v15 = vrot.slane %v11903_v4, %v170_v59  ;;  %v210_v57 = vmul.f32 %v11866_v46, %v120_v61  ;;  %v10064_v1 = vrot.slane %v11905_v31, %v170_v59 }
 0x393   :  { %11907 = vst [vmem:[#allocation21_spill] sm:$0xff] %v10043_v7  ;;  %v207_v24 = vmul.f32 %v10043_v7, %v120_v61  ;;  %11908 = vst [vmem:[#allocation22_spill] sm:$0xff] %v10048_v42  ;;  %8863 = vpow2.f32 %v7900_v3  ;;  %v10060_v11 = vrot.slane %v11903_v4, %v178_v52 }
 0x394   :  { %11909 = vst [vmem:[#allocation23_spill] sm:$0xff] %v10055_v15  ;;  %11911 = vst [vmem:[#allocation25_spill] sm:$0xff] %v10064_v1  ;;  %v316_v3 = vadd.f32 %v9675_v58, %v210_v57 }
 0x395   :  { %v313_v9 = vadd.f32 %v10048_v42, %v207_v24  ;;  %v208_v24 = vmul.f32 %v11865_v44, %v120_v61  ;;  %11910 = vst [vmem:[#allocation24_spill] sm:$0xff] %v10060_v11 }
 0x397   :  { %v1528_v36 = vadd.f32 %v1527_v13, %v313_v9  ;;  %v209_v13 = vmul.f32 %v10055_v15, %v120_v61  ;;  %v314_v35 = vadd.f32 %v9671_v39, %v208_v24 }
 0x399   :  { %v7901_v60 = vmul.f32 -1.442695, %v1528_v36  ;;  %v315_v36 = vadd.f32 %v10064_v1, %v209_v13 }
 0x39a   :  { %v8860_v29 = vpop.eup %8859 }
 0x39b   :  { %v1626_v49 = vadd.f32 1.0, %v8860_v29  ;;  %8865 = vpow2.f32 %v7901_v60  ;;  %v10070_v29 = vrot.slane %v11905_v31, %v178_v52 }
 0x39c   :  { %v8862_v48 = vpop.eup %8861 }
 0x39d   :  { %v1627_v20 = vadd.f32 1.0, %v8862_v48  ;;  %8867 = vrcp.f32 %v1626_v49  ;;  %v211_v49 = vmul.f32 %v10060_v11, %v120_v61 }
 0x39f   :  { %8869 = vrcp.f32 %v1627_v20  ;;  %v8864_v20 = vpop.eup %8863  ;;  %v317_v61 = vadd.f32 %v10070_v29, %v211_v49 }
 0x3a0   :  { %v1628_v52 = vadd.f32 1.0, %v8864_v20  ;;  %v1682_v20 = vld [vmem:[#allocation4 + $0x90] sm:$0xff] }
 0x3a5   :  { %v8866_v48 = vpop.eup %8865 }
 0x3a7   :  { %v8868_v59 = vpop.eup %8867 }
 0x3a9   :  { %v8870_v39 = vpop.eup %8869 }
 0x3bb   :  { %v1566_v9 = vpop.f32.mrb[20].mxu0  ;;  %v1607_v10 = vpop.f32.mrb[20].mxu1 }
 0x3bc   :  { %v1567_v4 = vadd.f32 %v1566_v9, %v314_v35  ;;  %v1568_v60 = vpop.f32.mrb[21].mxu0  ;;  %v1609_v46 = vpop.f32.mrb[21].mxu1  ;;  %v1608_v42 = vadd.f32 %v1607_v10, %v316_v3  ;;  %v1629_v35 = vadd.f32 1.0, %v8866_v48 }
 0x3bd   :  { %v1569_v15 = vadd.f32 %v1568_v60, %v315_v36  ;;  %v1570_v11 = vpop.f32.mrb[22].mxu0  ;;  %v1611_v24 = vpop.f32.mrb[22].mxu1  ;;  %v1610_v31 = vadd.f32 %v1609_v46, %v317_v61  ;;  %v1683_v61 = vld [vmem:[#allocation4 + $0x98] sm:$0xff] }
 0x3be   :  { %v1638_v44 = vmul.f32 %v8868_v59, %v1567_v4  ;;  %v1571_v30 = vpop.f32.mrb[23].mxu0  ;;  %v1612_v13 = vpop.f32.mrb[23].mxu1  ;;  %v1686_v59 = vld [vmem:[#allocation4 + $0xb0] sm:$0xff]  ;;  %v1687_v24 = vld [vmem:[#allocation4 + $0xb8] sm:$0xff] }
 0x3bf   :  { %v1639_v1 = vmul.f32 %v8870_v39, %v1569_v15  ;;  %v1679_v15 = vld [vmem:[#allocation4 + $0x78] sm:$0xff] }
 0x3c0   :  { %v1640_v7 = vadd.f32 %v1638_v44, %v1608_v42  ;;  %v1674_v44 = vld [vmem:[#allocation4 + $0x50] sm:$0xff] }
 0x3c1   :  { %v1641_v9 = vadd.f32 %v1639_v1, %v1610_v31  ;;  %v1678_v42 = vld [vmem:[#allocation4 + $0x70] sm:$0xff] }
 0x3c2   :  { %8871 = vtanh.f32 %v1640_v7  ;;  %v1675_v7 = vld [vmem:[#allocation4 + $0x58] sm:$0xff]  ;;  %v10089_v48 = vcombine.high %v1674_v44, %v1678_v42  ;;  %v10097_v13 = vcombine.low %v1674_v44, %v1678_v42  ;;  %v1702_v44 = vld [vmem:[#allocation4 + $0x130] sm:$0xff] }
 0x3c3   :  { %8873 = vtanh.f32 %v1641_v9  ;;  %v10091_v3 = vcombine.high %v1675_v7, %v1679_v15  ;;  %v10099_v31 = vcombine.low %v1675_v7, %v1679_v15  ;;  %v1690_v9 = vld [vmem:[#allocation4 + $0xd0] sm:$0xff]  ;;  %v1699_v42 = vld [vmem:[#allocation4 + $0x118] sm:$0xff] }
 0x3c4   :  { %8875 = vrcp.f32 %v1628_v52  ;;  %v10103_v52 = vcombine.high %v1682_v20, %v1686_v59  ;;  %v1703_v7 = vld [vmem:[#allocation4 + $0x138] sm:$0xff] }
 0x3c5   :  { %8877 = vrcp.f32 %v1629_v35  ;;  %v10105_v35 = vcombine.high %v1683_v61, %v1687_v24 }
 0x3c6   :  { %11912 = vst [vmem:[#allocation26_spill] sm:$0xff] %v10103_v52 }
 0x3c7   :  { %11913 = vst [vmem:[#allocation27_spill] sm:$0xff] %v10105_v35 }
 0x3cc   :  { %v8872_v57 = vpop.eup %8871 }
 0x3cd   :  { %v8874_v36 = vpop.eup %8873  ;;  %v1644_v11 = vsub.f32 %v9824_v45, %v8872_v57 }
 0x3ce   :  { %v8876_v49 = vpop.eup %8875  ;;  %v1645_v60 = vsub.f32 0.0, %v8874_v36 }
 0x3cf   :  { %v8878_v4 = vpop.eup %8877  ;;  %v1646_v10 = vmul.f32 %v8876_v49, %v1644_v11  ;;  %v1695_v11 = vld [vmem:[#allocation4 + $0xf8] sm:$0xff]  ;;  %v10111_v49 = vcombine.low %v1682_v20, %v1686_v59  ;;  %v10131_v59 = vcombine.high %v1699_v42, %v1703_v7 }
 0x3d0   :  { %v1647_v30 = vmul.f32 %v8878_v4, %v1645_v60  ;;  %v10113_v60 = vcombine.low %v1683_v61, %v1687_v24  ;;  %v1706_v61 = vld [vmem:[#allocation4 + $0x150] sm:$0xff] }
 0x3d1   :  { %v10075_v39 = vadd.f32 %v8872_v57, %v1646_v10  ;;  %v1694_v57 = vld [vmem:[#allocation4 + $0xf0] sm:$0xff]  ;;  %11914 = vst [vmem:[#allocation28_spill] sm:$0xff] %v10111_v49  ;;  %11921 = vst [vmem:[#allocation35_spill] sm:$0xff] %v10131_v59 }
 0x3d2   :  { %v10077_v46 = vadd.f32 %v8874_v36, %v1647_v30  ;;  %v1691_v36 = vld [vmem:[#allocation4 + $0xd8] sm:$0xff]  ;;  %11915 = vst [vmem:[#allocation29_spill] sm:$0xff] %v10113_v60  ;;  %v10117_v4 = vcombine.high %v1690_v9, %v1694_v57  ;;  %v1698_v30 = vld [vmem:[#allocation4 + $0x110] sm:$0xff]  ;;  %v10123_v15 = vcombine.low %v1690_v9, %v1694_v57  ;;  %v10137_v57 = vcombine.low %v1699_v42, %v1703_v7 }
 0x3d3   :  { %v10085_v1 = vpack.c.bf16 %v10075_v39, %v10075_v39  ;;  %v10119_v10 = vcombine.high %v1691_v36, %v1695_v11  ;;  %v10129_v20 = vcombine.high %v1698_v30, %v1702_v44  ;;  %v1710_v24 = vld [vmem:[#allocation4 + $0x170] sm:$0xff]  ;;  %v10135_v9 = vcombine.low %v1698_v30, %v1702_v44 }
 0x3d4   :  { %1650 = vst.msk [vmem:[#allocation3] sm:$0xff] %vm1009_vm2, %v10077_v46  ;;  %v1663_v45 = vpack.c.bf16 %v10077_v46, %v10077_v46  ;;  %11916 = vst [vmem:[#allocation30_spill] sm:$0xff] %v10117_v4  ;;  %v10147_v30 = vcombine.low %v1706_v61, %v1710_v24 }
 0x3d5   :  { %11917 = vst [vmem:[#allocation31_spill] sm:$0xff] %v10119_v10  ;;  %11918 = vst [vmem:[#allocation32_spill] sm:$0xff] %v10123_v15 }
 0x3d6   :  { %7998 = vmatprep.mubr.msk.bf16.mxu0 %vm1009_vm2, %v1663_v45  ;;  %7999 = vmatprep.mubr.msk.bf16.mxu1 %vm1009_vm2, %v1663_v45  ;;  %11920 = vst [vmem:[#allocation34_spill] sm:$0xff] %v10129_v20  ;;  %11922 = vst [vmem:[#allocation36_spill] sm:$0xff] %v10135_v9 }
 0x3d7   :  { %2276 = vmatmul.mubr.bf16.vlgmr.msra.gmra.mrb[24].mxu0 %v10085_v1  ;;  %2317 = vmatmul.mubr.bf16.vlgmr.msra.gmra.mrb[24].mxu1 %v10085_v1  ;;  %11923 = vst [vmem:[#allocation37_spill] sm:$0xff] %v10137_v57  ;;  %11926 = vst [vmem:[#allocation44_spill] sm:$0xff] %v10147_v30 }
 0x3d8   :  { %2326 = vmatpush1.bf16.msra.mxu0 %v10022_v34  ;;  %2367 = vmatpush1.bf16.msra.mxu1 %v10024_v12 }
 0x3d9   :  { %8000 = vmatprep.mubr.msk.bf16.mxu0 %vm1009_vm2, %v1663_v45  ;;  %8001 = vmatprep.mubr.msk.bf16.mxu1 %vm1009_vm2, %v1663_v45  ;;  %v10125_v45 = vcombine.low %v1691_v36, %v1695_v11  ;;  %v10141_v36 = vcombine.high %v1706_v61, %v1710_v24 }
 0x3da   :  { %2327 = vmatprep.subr.bf16.mxu0 %v10089_v48  ;;  %2368 = vmatprep.subr.bf16.mxu1 %v10091_v3 }
 0x3db   :  { %11919 = vst [vmem:[#allocation33_spill] sm:$0xff] %v10125_v45  ;;  %11924 = vst [vmem:[#allocation38_spill] sm:$0xff] %v10141_v36 }
 0x3dc   :  { %2328 = vmatpush1.bf16.msra.mxu0 %v10097_v13  ;;  %2369 = vmatpush1.bf16.msra.mxu1 %v10099_v31 }
 0x3dd   :  { %2329 = vmatprep.subr.bf16.mxu0 %v10103_v52  ;;  %2370 = vmatprep.subr.bf16.mxu1 %v10105_v35  ;;  %v1707_v35 = vld [vmem:[#allocation4 + $0x158] sm:$0xff] }
 0x3de   :  { %v1711_v52 = vld [vmem:[#allocation4 + $0x178] sm:$0xff] }
 0x3df   :  { %v10143_v11 = vcombine.high %v1707_v35, %v1711_v52  ;;  %v10149_v44 = vcombine.low %v1707_v35, %v1711_v52 }
 0x3e0   :  { %2330 = vmatpush1.bf16.msra.mxu0 %v10111_v49  ;;  %2371 = vmatpush1.bf16.msra.mxu1 %v10113_v60  ;;  %v1715_v60 = vld [vmem:[#allocation4 + $0x198] sm:$0xff] }
 0x3e1   :  { %2331 = vmatprep.subr.bf16.mxu0 %v10117_v4  ;;  %2372 = vmatprep.subr.bf16.mxu1 %v10119_v10  ;;  %11925 = vst [vmem:[#allocation77_spill] sm:$0xff] %v10143_v11  ;;  %v1714_v10 = vld [vmem:[#allocation4 + $0x190] sm:$0xff]  ;;  %v1719_v49 = vld [vmem:[#allocation4 + $0x1b8] sm:$0xff]  ;;  %11927 = vst [vmem:[#allocation45_spill] sm:$0xff] %v10149_v44 }
 0x3e2   :  { %v1718_v4 = vld [vmem:[#allocation4 + $0x1b0] sm:$0xff]  ;;  %v10155_v7 = vcombine.high %v1715_v60, %v1719_v49  ;;  %v10161_v52 = vcombine.low %v1715_v60, %v1719_v49 }
 0x3e3   :  { %v10153_v42 = vcombine.high %v1714_v10, %v1718_v4  ;;  %v10159_v61 = vcombine.low %v1714_v10, %v1718_v4 }
 0x3e4   :  { %2332 = vmatpush1.bf16.msra.mxu0 %v10123_v15  ;;  %2373 = vmatpush1.bf16.msra.mxu1 %v10125_v45  ;;  %11929 = vst [vmem:[#allocation47_spill] sm:$0xff] %v10155_v7  ;;  %v1723_v45 = vld [vmem:[#allocation4 + $0x1d8] sm:$0xff]  ;;  %11931 = vst [vmem:[#allocation49_spill] sm:$0xff] %v10161_v52 }
 0x3e5   :  { %2333 = vmatprep.subr.bf16.mxu0 %v10129_v20  ;;  %2374 = vmatprep.subr.bf16.mxu1 %v10131_v59  ;;  %11928 = vst [vmem:[#allocation46_spill] sm:$0xff] %v10153_v42  ;;  %v1722_v59 = vld [vmem:[#allocation4 + $0x1d0] sm:$0xff]  ;;  %v1727_v15 = vld [vmem:[#allocation4 + $0x1f8] sm:$0xff]  ;;  %11930 = vst [vmem:[#allocation48_spill] sm:$0xff] %v10159_v61 }
 0x3e6   :  { %v1726_v20 = vld [vmem:[#allocation4 + $0x1f0] sm:$0xff]  ;;  %v10167_v24 = vcombine.high %v1723_v45, %v1727_v15  ;;  %v10173_v49 = vcombine.low %v1723_v45, %v1727_v15 }
 0x3e7   :  { %v10165_v35 = vcombine.high %v1722_v59, %v1726_v20  ;;  %v10171_v4 = vcombine.low %v1722_v59, %v1726_v20 }
 0x3e8   :  { %2334 = vmatpush1.bf16.msra.mxu0 %v10135_v9  ;;  %2375 = vmatpush1.bf16.msra.mxu1 %v10137_v57  ;;  %11933 = vst [vmem:[#allocation51_spill] sm:$0xff] %v10167_v24  ;;  %v1731_v57 = vld [vmem:[#allocation4 + $0x218] sm:$0xff]  ;;  %11935 = vst [vmem:[#allocation53_spill] sm:$0xff] %v10173_v49 }
 0x3e9   :  { %2335 = vmatprep.subr.bf16.mxu0 %v10141_v36  ;;  %2376 = vmatprep.subr.bf16.mxu1 %v10143_v11  ;;  %11932 = vst [vmem:[#allocation50_spill] sm:$0xff] %v10165_v35  ;;  %v1730_v11 = vld [vmem:[#allocation4 + $0x210] sm:$0xff]  ;;  %v1735_v9 = vld [vmem:[#allocation4 + $0x238] sm:$0xff]  ;;  %11934 = vst [vmem:[#allocation52_spill] sm:$0xff] %v10171_v4 }
 0x3ea   :  { %v1734_v36 = vld [vmem:[#allocation4 + $0x230] sm:$0xff]  ;;  %v10179_v10 = vcombine.high %v1731_v57, %v1735_v9  ;;  %v10185_v15 = vcombine.low %v1731_v57, %v1735_v9 }
 0x3eb   :  { %v10177_v60 = vcombine.high %v1730_v11, %v1734_v36  ;;  %v10183_v20 = vcombine.low %v1730_v11, %v1734_v36 }
 0x3ec   :  { %2336 = vmatpush1.bf16.msra.mxu0 %v10147_v30  ;;  %2377 = vmatpush1.bf16.msra.mxu1 %v10149_v44  ;;  %11937 = vst [vmem:[#allocation55_spill] sm:$0xff] %v10179_v10  ;;  %v1739_v44 = vld [vmem:[#allocation4 + $0x258] sm:$0xff] }
 0x3ed   :  { %2337 = vmatprep.subr.bf16.mxu0 %v10153_v42  ;;  %2378 = vmatprep.subr.bf16.mxu1 %v10155_v7  ;;  %11936 = vst [vmem:[#allocation54_spill] sm:$0xff] %v10177_v60  ;;  %v1738_v7 = vld [vmem:[#allocation4 + $0x250] sm:$0xff]  ;;  %v1743_v30 = vld [vmem:[#allocation4 + $0x278] sm:$0xff] }
 0x3ee   :  { %v1742_v42 = vld [vmem:[#allocation4 + $0x270] sm:$0xff]  ;;  %v10191_v59 = vcombine.high %v1739_v44, %v1743_v30  ;;  %v10197_v9 = vcombine.low %v1739_v44, %v1743_v30 }
 0x3ef   :  { %v10189_v45 = vcombine.high %v1738_v7, %v1742_v42  ;;  %v10195_v36 = vcombine.low %v1738_v7, %v1742_v42 }
 0x3f0   :  { %2338 = vmatpush1.bf16.msra.mxu0 %v10159_v61  ;;  %2379 = vmatpush1.bf16.msra.mxu1 %v10161_v52  ;;  %11938 = vst [vmem:[#allocation56_spill] sm:$0xff] %v10191_v59  ;;  %v1747_v52 = vld [vmem:[#allocation4 + $0x298] sm:$0xff] }
 0x3f1   :  { %2339 = vmatprep.subr.bf16.mxu0 %v10165_v35  ;;  %2380 = vmatprep.subr.bf16.mxu1 %v10167_v24  ;;  %v1746_v24 = vld [vmem:[#allocation4 + $0x290] sm:$0xff]  ;;  %v1751_v61 = vld [vmem:[#allocation4 + $0x2b8] sm:$0xff]  ;;  %11939 = vst [vmem:[#allocation57_spill] sm:$0xff] %v10195_v36 }
 0x3f2   :  { %v1750_v35 = vld [vmem:[#allocation4 + $0x2b0] sm:$0xff]  ;;  %v10203_v11 = vcombine.high %v1747_v52, %v1751_v61  ;;  %v10209_v30 = vcombine.low %v1747_v52, %v1751_v61  ;;  %v11961_v61 = vld [vmem:[#allocation20_spill] sm:$0xff] }
 0x3f3   :  { %v10201_v57 = vcombine.high %v1746_v24, %v1750_v35  ;;  %v10207_v42 = vcombine.low %v1746_v24, %v1750_v35 }
 0x3f4   :  { %2340 = vmatpush1.bf16.msra.mxu0 %v10171_v4  ;;  %2381 = vmatpush1.bf16.msra.mxu1 %v10173_v49  ;;  %v1755_v49 = vld [vmem:[#allocation4 + $0x2d8] sm:$0xff] }
 0x3f5   :  { %2341 = vmatprep.subr.bf16.mxu0 %v10177_v60  ;;  %2382 = vmatprep.subr.bf16.mxu1 %v10179_v10  ;;  %v1754_v10 = vld [vmem:[#allocation4 + $0x2d0] sm:$0xff]  ;;  %v1759_v4 = vld [vmem:[#allocation4 + $0x2f8] sm:$0xff] }
 0x3f6   :  { %v1758_v60 = vld [vmem:[#allocation4 + $0x2f0] sm:$0xff]  ;;  %v10215_v7 = vcombine.high %v1755_v49, %v1759_v4 }
 0x3f7   :  { %v10213_v44 = vcombine.high %v1754_v10, %v1758_v60 }
 0x3f8   :  { %2342 = vmatpush1.bf16.msra.mxu0 %v10183_v20  ;;  %2383 = vmatpush1.bf16.msra.mxu1 %v10185_v15 }
 0x3f9   :  { %2343 = vmatprep.subr.bf16.mxu0 %v10189_v45  ;;  %2384 = vmatprep.subr.bf16.mxu1 %v10191_v59  ;;  %v10219_v59 = vcombine.low %v1754_v10, %v1758_v60  ;;  %v11962_v10 = vld [vmem:[#allocation21_spill] sm:$0xff] }
 0x3fc   :  { %2344 = vmatpush1.bf16.msra.mxu0 %v10195_v36  ;;  %2385 = vmatpush1.bf16.msra.mxu1 %v10197_v9  ;;  %v10221_v36 = vcombine.low %v1755_v49, %v1759_v4 }
 0x3fd   :  { %2345 = vmatprep.subr.bf16.mxu0 %v10201_v57  ;;  %2386 = vmatprep.subr.bf16.mxu1 %v10203_v11 }
 0x400   :  { %2346 = vmatpush1.bf16.msra.mxu0 %v10207_v42  ;;  %2387 = vmatpush1.bf16.msra.mxu1 %v10209_v30 }
 0x401   :  { %2347 = vmatprep.subr.bf16.mxu0 %v10213_v44  ;;  %2388 = vmatprep.subr.bf16.mxu1 %v10215_v7 }
 0x404   :  { %2348 = vmatpush1.bf16.msra.mxu0 %v10219_v59  ;;  %2389 = vmatpush1.bf16.msra.mxu1 %v10221_v36 }
 0x405   :  { %3037 = vmatprep.subr.bf16.mxu0 %v9878_v0  ;;  %3078 = vmatprep.subr.bf16.mxu1 %v9882_v17  ;;  %v11941_v0 = vld [vmem:[#allocation42_spill] sm:$0xff]  ;;  %v11943_v17 = vld [vmem:[#allocation41_spill] sm:$0xff] }
 0x407   :  { %2358 = vmatmul.mubr.bf16.vlgmr.msra.gmra.mrb[28].mxu0 %v10085_v1  ;;  %2399 = vmatmul.mubr.bf16.vlgmr.msra.gmra.mrb[28].mxu1 %v10085_v1 }
 0x408   :  { %3038 = vmatpush1.bf16.msra.mxu0 %v9876_v32  ;;  %3079 = vmatpush1.bf16.msra.mxu1 %v9880_v16  ;;  %v11940_v32 = vld [vmem:[#allocation39_spill] sm:$0xff]  ;;  %v11942_v16 = vld [vmem:[#allocation40_spill] sm:$0xff] }
 0x409   :  { %3039 = vmatprep.subr.bf16.mxu0 %v9884_v50  ;;  %3080 = vmatprep.subr.bf16.mxu1 %v9887_v23  ;;  %v11944_v50 = vld [vmem:[#allocation43_spill] sm:$0xff]  ;;  %v11945_v23 = vld [vmem:[#allocation62_spill] sm:$0xff] }
 0x40c   :  { %3040 = vmatpush1.bf16.msra.mxu0 %v9891_v25  ;;  %3081 = vmatpush1.bf16.msra.mxu1 %v9895_v40  ;;  %v11946_v25 = vld [vmem:[#allocation60_spill] sm:$0xff]  ;;  %v11947_v40 = vld [vmem:[#allocation61_spill] sm:$0xff] }
 0x40d   :  { %3041 = vmatprep.subr.bf16.mxu0 %v9897_v14  ;;  %3082 = vmatprep.subr.bf16.mxu1 %v9900_v26  ;;  %v11948_v14 = vld [vmem:[#allocation64_spill] sm:$0xff]  ;;  %v11949_v26 = vld [vmem:[#allocation67_spill] sm:$0xff] }
 0x410   :  { %3042 = vmatpush1.bf16.msra.mxu0 %v9903_v19  ;;  %3083 = vmatpush1.bf16.msra.mxu1 %v9907_v21  ;;  %v11950_v19 = vld [vmem:[#allocation65_spill] sm:$0xff]  ;;  %v11951_v21 = vld [vmem:[#allocation66_spill] sm:$0xff] }
 0x411   :  { %3043 = vmatprep.subr.bf16.mxu0 %v9909_v22  ;;  %3084 = vmatprep.subr.bf16.mxu1 %v9912_v27  ;;  %v11952_v22 = vld [vmem:[#allocation68_spill] sm:$0xff]  ;;  %v11953_v27 = vld [vmem:[#allocation70_spill] sm:$0xff] }
 0x414   :  { %3044 = vmatpush1.bf16.msra.mxu0 %v9915_v37  ;;  %3085 = vmatpush1.bf16.msra.mxu1 %v9919_v38  ;;  %v11954_v37 = vld [vmem:[#allocation69_spill] sm:$0xff]  ;;  %v11955_v38 = vld [vmem:[#allocation71_spill] sm:$0xff] }
 0x415   :  { %3045 = vmatprep.subr.bf16.mxu0 %v9921_v43  ;;  %3086 = vmatprep.subr.bf16.mxu1 %v9924_v51  ;;  %v11956_v43 = vld [vmem:[#allocation17_spill] sm:$0xff]  ;;  %v11957_v51 = vld [vmem:[#allocation18_spill] sm:$0xff] }
 0x418   :  { %3046 = vmatpush1.bf16.msra.mxu0 %v9927_v5  ;;  %3087 = vmatpush1.bf16.msra.mxu1 %v9931_v8 }
 0x419   :  { %3047 = vmatprep.subr.bf16.mxu0 %v9933_v18  ;;  %3088 = vmatprep.subr.bf16.mxu1 %v9936_v33 }
 0x41c   :  { %3048 = vmatpush1.bf16.msra.mxu0 %v9939_v53  ;;  %3089 = vmatpush1.bf16.msra.mxu1 %v9943_v56 }
 0x41d   :  { %3049 = vmatprep.subr.bf16.mxu0 %v9948_v62  ;;  %3090 = vmatprep.subr.bf16.mxu1 %v9954_v2  ;;  %v11958_v2 = vld [vmem:[#allocation74_spill] sm:$0xff] }
 0x420   :  { %3050 = vmatpush1.bf16.msra.mxu0 %v9950_v6  ;;  %3091 = vmatpush1.bf16.msra.mxu1 %v9952_v54  ;;  %v125_v54 = vpop.permute.xlu1 %124 }
 0x421   :  { %3051 = vmatprep.subr.bf16.mxu0 %v9960_v41  ;;  %3092 = vmatprep.subr.bf16.mxu1 %v9966_v47  ;;  %v212_v41 = vmul.f32 %v11958_v2, %v125_v54  ;;  %v11960_v47 = vld [vmem:[#allocation76_spill] sm:$0xff]  ;;  %v214_v60 = vmul.f32 %v11863_v28, %v125_v54 }
 0x423   :  { %v318_v1 = vadd.f32 %v11960_v47, %v212_v41  ;;  %v11970_v41 = vld [vmem:[#allocation25_spill] sm:$0xff] }
 0x424   :  { %3052 = vmatpush1.bf16.msra.mxu0 %v9962_v55  ;;  %3093 = vmatpush1.bf16.msra.mxu1 %v9964_v63  ;;  %v11959_v55 = vld [vmem:[#allocation19_spill] sm:$0xff] }
 0x425   :  { %3053 = vmatprep.subr.bf16.mxu0 %v11940_v32  ;;  %3094 = vmatprep.subr.bf16.mxu1 %v11941_v0  ;;  %v213_v63 = vmul.f32 %v11959_v55, %v125_v54  ;;  %v215_v32 = vmul.f32 %v11962_v10, %v125_v54  ;;  %v11963_v0 = vld [vmem:[#allocation78_spill] sm:$0xff] }
 0x427   :  { %v319_v52 = vadd.f32 %v11961_v61, %v213_v63 }
 0x428   :  { %3054 = vmatpush1.bf16.msra.mxu0 %v11942_v16  ;;  %3095 = vmatpush1.bf16.msra.mxu1 %v11943_v17  ;;  %v320_v16 = vadd.f32 %v11963_v0, %v214_v60  ;;  %v11964_v17 = vld [vmem:[#allocation22_spill] sm:$0xff] }
 0x429   :  { %3055 = vmatprep.subr.bf16.mxu0 %v11944_v50  ;;  %3096 = vmatprep.subr.bf16.mxu1 %v11945_v23  ;;  %v321_v50 = vadd.f32 %v11964_v17, %v215_v32 }
 0x42c   :  { %3056 = vmatpush1.bf16.msra.mxu0 %v11946_v25  ;;  %3097 = vmatpush1.bf16.msra.mxu1 %v11947_v40 }
 0x42d   :  { %3057 = vmatprep.subr.bf16.mxu0 %v11948_v14  ;;  %3098 = vmatprep.subr.bf16.mxu1 %v11949_v26 }
 0x430   :  { %3058 = vmatpush1.bf16.msra.mxu0 %v11950_v19  ;;  %3099 = vmatpush1.bf16.msra.mxu1 %v11951_v21 }
 0x431   :  { %3059 = vmatprep.subr.bf16.mxu0 %v11952_v22  ;;  %3100 = vmatprep.subr.bf16.mxu1 %v11953_v27  ;;  %v11965_v27 = vld [vmem:[#allocation79_spill] sm:$0xff] }
 0x434   :  { %3060 = vmatpush1.bf16.msra.mxu0 %v11954_v37  ;;  %3101 = vmatpush1.bf16.msra.mxu1 %v11955_v38  ;;  %v216_v37 = vmul.f32 %v11965_v27, %v125_v54  ;;  %v11966_v38 = vld [vmem:[#allocation23_spill] sm:$0xff] }
 0x435   :  { %3119 = vmatprep.subr.bf16.mxu0 %v11956_v43  ;;  %3160 = vmatprep.subr.bf16.mxu1 %v11957_v51  ;;  %v217_v43 = vmul.f32 %v11966_v38, %v125_v54  ;;  %v11967_v51 = vld [vmem:[#allocation80_spill] sm:$0xff] }
 0x437   :  { %v323_v63 = vadd.f32 %v11970_v41, %v217_v43 }
 0x4aa   :  { %v2277_v5 = vpop.f32.mrb[24].mxu0  ;;  %v2318_v8 = vpop.f32.mrb[24].mxu1 }
 0x4ab   :  { %v2279_v18 = vpop.f32.mrb[25].mxu0  ;;  %v2320_v33 = vpop.f32.mrb[25].mxu1  ;;  %v2278_v35 = vadd.f32 %v2277_v5, %v318_v1  ;;  %v2319_v23 = vadd.f32 %v2318_v8, %v320_v16  ;;  %v218_v5 = vmul.f32 %v11967_v51, %v125_v54  ;;  %v11969_v8 = vld [vmem:[#allocation81_spill] sm:$0xff] }
 0x4ac   :  { %v2281_v53 = vpop.f32.mrb[26].mxu0  ;;  %v2322_v56 = vpop.f32.mrb[26].mxu1  ;;  %v2280_v24 = vadd.f32 %v2279_v18, %v319_v52  ;;  %v2321_v25 = vadd.f32 %v2320_v33, %v321_v50  ;;  %v11968_v18 = vld [vmem:[#allocation24_spill] sm:$0xff]  ;;  %v322_v33 = vadd.f32 %v11969_v8, %v216_v37 }
 0x4ad   :  { %v2282_v62 = vpop.f32.mrb[27].mxu0  ;;  %v2323_v6 = vpop.f32.mrb[27].mxu1  ;;  %v8002_v4 = vmul.f32 -1.442695, %v2278_v35  ;;  %v8004_v26 = vmul.f32 -1.442695, %v2319_v23  ;;  %v219_v53 = vmul.f32 %v11968_v18, %v125_v54  ;;  %v324_v35 = vadd.f32 %v9675_v58, %v218_v5 }
 0x4ae   :  { %v8003_v49 = vmul.f32 -1.442695, %v2280_v24  ;;  %v8005_v19 = vmul.f32 -1.442695, %v2321_v25 }
 0x4af   :  { %8879 = vpow2.f32 %v8002_v4  ;;  %v325_v32 = vadd.f32 %v10070_v29, %v219_v53 }
 0x4b0   :  { %8881 = vpow2.f32 %v8003_v49 }
 0x4b1   :  { %8883 = vpow2.f32 %v8004_v26 }
 0x4b2   :  { %8885 = vpow2.f32 %v8005_v19 }
 0x4b9   :  { %v8880_v40 = vpop.eup %8879 }
 0x4ba   :  { %v8882_v14 = vpop.eup %8881  ;;  %v2419_v21 = vadd.f32 1.0, %v8880_v40 }
 0x4bb   :  { %v2420_v22 = vadd.f32 1.0, %v8882_v14  ;;  %v8884_v56 = vpop.eup %8883 }
 0x4bc   :  { %8887 = vrcp.f32 %v2419_v21  ;;  %v8886_v1 = vpop.eup %8885  ;;  %v2421_v21 = vadd.f32 1.0, %v8884_v56 }
 0x4bd   :  { %8889 = vrcp.f32 %v2420_v22  ;;  %v2422_v37 = vadd.f32 1.0, %v8886_v1 }
 0x4c6   :  { %v8888_v49 = vpop.eup %8887 }
 0x4c7   :  { %v8890_v54 = vpop.eup %8889 }
 0x4da   :  { %v2359_v62 = vpop.f32.mrb[28].mxu0  ;;  %v2400_v6 = vpop.f32.mrb[28].mxu1 }
 0x4db   :  { %v2360_v52 = vadd.f32 %v2359_v62, %v322_v33  ;;  %v2361_v24 = vpop.f32.mrb[29].mxu0  ;;  %v2402_v4 = vpop.f32.mrb[29].mxu1  ;;  %v2401_v25 = vadd.f32 %v2400_v6, %v324_v35 }
 0x4dc   :  { %v2362_v60 = vadd.f32 %v2361_v24, %v323_v63  ;;  %v2363_v16 = vpop.f32.mrb[30].mxu0  ;;  %v2404_v50 = vpop.f32.mrb[30].mxu1  ;;  %v2403_v19 = vadd.f32 %v2402_v4, %v325_v32  ;;  %v11977_v32 = vld [vmem:[#allocation32_spill] sm:$0xff] }
 0x4dd   :  { %v2431_v23 = vmul.f32 %v8888_v49, %v2360_v52  ;;  %v2364_v40 = vpop.f32.mrb[31].mxu0  ;;  %v2405_v14 = vpop.f32.mrb[31].mxu1  ;;  %v11973_v49 = vld [vmem:[#allocation28_spill] sm:$0xff]  ;;  %v11982_v16 = vld [vmem:[#allocation37_spill] sm:$0xff]  ;;  %v11983_v50 = vld [vmem:[#allocation38_spill] sm:$0xff] }
 0x4de   :  { %v2432_v26 = vmul.f32 %v8890_v54, %v2362_v60  ;;  %v11976_v60 = vld [vmem:[#allocation31_spill] sm:$0xff]  ;;  %v11984_v54 = vld [vmem:[#allocation77_spill] sm:$0xff]  ;;  %v11987_v40 = vld [vmem:[#allocation46_spill] sm:$0xff] }
 0x4df   :  { %v2433_v22 = vadd.f32 %v2431_v23, %v2401_v25  ;;  %v11985_v23 = vld [vmem:[#allocation44_spill] sm:$0xff]  ;;  %v11986_v25 = vld [vmem:[#allocation45_spill] sm:$0xff]  ;;  %v11988_v14 = vld [vmem:[#allocation47_spill] sm:$0xff] }
 0x4e0   :  { %v2434_v43 = vadd.f32 %v2432_v26, %v2403_v19  ;;  %v11989_v26 = vld [vmem:[#allocation48_spill] sm:$0xff]  ;;  %v11990_v19 = vld [vmem:[#allocation49_spill] sm:$0xff] }
 0x4e1   :  { %8891 = vtanh.f32 %v2433_v22  ;;  %v11992_v22 = vld [vmem:[#allocation51_spill] sm:$0xff] }
 0x4e2   :  { %8893 = vtanh.f32 %v2434_v43  ;;  %v11994_v43 = vld [vmem:[#allocation53_spill] sm:$0xff] }
 0x4e3   :  { %8895 = vrcp.f32 %v2421_v21  ;;  %v11991_v21 = vld [vmem:[#allocation50_spill] sm:$0xff] }
 0x4e4   :  { %8897 = vrcp.f32 %v2422_v37  ;;  %v11993_v37 = vld [vmem:[#allocation52_spill] sm:$0xff] }
 0x4eb   :  { %v8892_v5 = vpop.eup %8891 }
 0x4ec   :  { %v8894_v33 = vpop.eup %8893  ;;  %v2437_v53 = vsub.f32 %v10075_v39, %v8892_v5  ;;  %v11971_v39 = vld [vmem:[#allocation26_spill] sm:$0xff] }
 0x4ed   :  { %v8896_v62 = vpop.eup %8895  ;;  %v2438_v63 = vsub.f32 %v10077_v46, %v8894_v33  ;;  %v11972_v46 = vld [vmem:[#allocation27_spill] sm:$0xff] }
 0x4ee   :  { %v8898_v6 = vpop.eup %8897  ;;  %v2439_v52 = vmul.f32 %v8896_v62, %v2437_v53  ;;  %v11997_v53 = vld [vmem:[#allocation56_spill] sm:$0xff]  ;;  %v11998_v62 = vld [vmem:[#allocation57_spill] sm:$0xff] }
 0x4ef   :  { %v2440_v35 = vmul.f32 %v8898_v6, %v2438_v63  ;;  %v3268_v6 = vld [vmem:[#allocation4 + $0x80] sm:$0xff] }
 0x4f0   :  { %v10297_v24 = vadd.f32 %v8892_v5, %v2439_v52  ;;  %v11995_v5 = vld [vmem:[#allocation54_spill] sm:$0xff] }
 0x4f1   :  { %v10299_v56 = vadd.f32 %v8894_v33, %v2440_v35  ;;  %v11996_v33 = vld [vmem:[#allocation55_spill] sm:$0xff]  ;;  %v3272_v35 = vld [vmem:[#allocation4 + $0xa0] sm:$0xff] }
 0x4f2   :  { %v2456_v4 = vpack.c.bf16 %v10297_v24, %v10297_v24 }
 0x4f3   :  { %2444 = vst.msk [vmem:[#allocation3 + $0x8] sm:$0xff] %vm1009_vm2, %v10299_v56  ;;  %v2457_v1 = vpack.c.bf16 %v10299_v56, %v10299_v56 }
 0x4f5   :  { %8102 = vmatprep.mubr.msk.bf16.mxu0 %vm1009_vm2, %v2457_v1  ;;  %8103 = vmatprep.mubr.msk.bf16.mxu1 %vm1009_vm2, %v2457_v1 }
 0x4f6   :  { %3070 = vmatmul.mubr.bf16.vlgmr.msra.gmra.mrb[32].mxu0 %v2456_v4  ;;  %3111 = vmatmul.mubr.bf16.vlgmr.msra.gmra.mrb[32].mxu1 %v2456_v4 }
 0x4f7   :  { %3120 = vmatpush1.bf16.msra.mxu0 %v10022_v34  ;;  %3161 = vmatpush1.bf16.msra.mxu1 %v10024_v12  ;;  %v11974_v34 = vld [vmem:[#allocation29_spill] sm:$0xff]  ;;  %v11975_v12 = vld [vmem:[#allocation30_spill] sm:$0xff] }
 0x4f8   :  { %8104 = vmatprep.mubr.msk.bf16.mxu0 %vm1009_vm2, %v2457_v1  ;;  %8105 = vmatprep.mubr.msk.bf16.mxu1 %vm1009_vm2, %v2457_v1  ;;  %v3269_v1 = vld [vmem:[#allocation4 + $0x88] sm:$0xff] }
 0x4f9   :  { %3121 = vmatprep.subr.bf16.mxu0 %v10089_v48  ;;  %3162 = vmatprep.subr.bf16.mxu1 %v10091_v3  ;;  %v11978_v48 = vld [vmem:[#allocation33_spill] sm:$0xff]  ;;  %v11979_v3 = vld [vmem:[#allocation34_spill] sm:$0xff] }
 0x4fb   :  { %3122 = vmatpush1.bf16.msra.mxu0 %v10097_v13  ;;  %3163 = vmatpush1.bf16.msra.mxu1 %v10099_v31  ;;  %v11980_v13 = vld [vmem:[#allocation35_spill] sm:$0xff]  ;;  %v11981_v31 = vld [vmem:[#allocation36_spill] sm:$0xff] }
 0x4fc   :  { %3123 = vmatprep.subr.bf16.mxu0 %v11971_v39  ;;  %3164 = vmatprep.subr.bf16.mxu1 %v11972_v46 }
 0x4ff   :  { %3124 = vmatpush1.bf16.msra.mxu0 %v11973_v49  ;;  %3165 = vmatpush1.bf16.msra.mxu1 %v11974_v34  ;;  %v10378_v49 = vcombine.high %v3268_v6, %v3272_v35 }
 0x500   :  { %3125 = vmatprep.subr.bf16.mxu0 %v11975_v12  ;;  %3166 = vmatprep.subr.bf16.mxu1 %v11976_v60  ;;  %v3276_v12 = vld [vmem:[#allocation4 + $0xc0] sm:$0xff] }
 0x501   :  { %v3280_v60 = vld [vmem:[#allocation4 + $0xe0] sm:$0xff] }
 0x503   :  { %3126 = vmatpush1.bf16.msra.mxu0 %v11977_v32  ;;  %3167 = vmatpush1.bf16.msra.mxu1 %v11978_v48  ;;  %v3277_v32 = vld [vmem:[#allocation4 + $0xc8] sm:$0xff] }
 0x504   :  { %3127 = vmatprep.subr.bf16.mxu0 %v11979_v3  ;;  %3168 = vmatprep.subr.bf16.mxu1 %v11980_v13  ;;  %v3281_v48 = vld [vmem:[#allocation4 + $0xe8] sm:$0xff]  ;;  %v10384_v3 = vcombine.low %v3268_v6, %v3272_v35 }
 0x507   :  { %3128 = vmatpush1.bf16.msra.mxu0 %v11981_v31  ;;  %3169 = vmatpush1.bf16.msra.mxu1 %v11982_v16  ;;  %v10390_v31 = vcombine.high %v3276_v12, %v3280_v60  ;;  %v10393_v16 = vcombine.high %v3277_v32, %v3281_v48 }
 0x508   :  { %3129 = vmatprep.subr.bf16.mxu0 %v11983_v50  ;;  %3170 = vmatprep.subr.bf16.mxu1 %v11984_v54  ;;  %v3284_v50 = vld [vmem:[#allocation4 + $0x100] sm:$0xff] }
 0x509   :  { %v3288_v54 = vld [vmem:[#allocation4 + $0x120] sm:$0xff] }
 0x50b   :  { %3130 = vmatpush1.bf16.msra.mxu0 %v11985_v23  ;;  %3171 = vmatpush1.bf16.msra.mxu1 %v11986_v25  ;;  %v3285_v23 = vld [vmem:[#allocation4 + $0x108] sm:$0xff] }
 0x50c   :  { %3131 = vmatprep.subr.bf16.mxu0 %v11987_v40  ;;  %3172 = vmatprep.subr.bf16.mxu1 %v11988_v14  ;;  %v3289_v25 = vld [vmem:[#allocation4 + $0x128] sm:$0xff]  ;;  %v10396_v40 = vcombine.low %v3276_v12, %v3280_v60  ;;  %v10400_v14 = vcombine.low %v3277_v32, %v3281_v48 }
 0x50d   :  { %v3309_v12 = vld [vmem:[#allocation4 + $0x1c8] sm:$0xff] }
 0x50e   :  { %v3313_v32 = vld [vmem:[#allocation4 + $0x1e8] sm:$0xff] }
 0x50f   :  { %3132 = vmatpush1.bf16.msra.mxu0 %v11989_v26  ;;  %3173 = vmatpush1.bf16.msra.mxu1 %v11990_v19  ;;  %v10402_v26 = vcombine.high %v3284_v50, %v3288_v54  ;;  %v10405_v19 = vcombine.high %v3285_v23, %v3289_v25 }
 0x510   :  { %3133 = vmatprep.subr.bf16.mxu0 %v11991_v21  ;;  %3174 = vmatprep.subr.bf16.mxu1 %v11992_v22  ;;  %v3292_v21 = vld [vmem:[#allocation4 + $0x140] sm:$0xff] }
 0x511   :  { %v3296_v22 = vld [vmem:[#allocation4 + $0x160] sm:$0xff] }
 0x513   :  { %3134 = vmatpush1.bf16.msra.mxu0 %v11993_v37  ;;  %3175 = vmatpush1.bf16.msra.mxu1 %v11994_v43  ;;  %v3293_v37 = vld [vmem:[#allocation4 + $0x148] sm:$0xff] }
 0x514   :  { %3135 = vmatprep.subr.bf16.mxu0 %v11995_v5  ;;  %3176 = vmatprep.subr.bf16.mxu1 %v11996_v33  ;;  %v3297_v43 = vld [vmem:[#allocation4 + $0x168] sm:$0xff]  ;;  %v10408_v5 = vcombine.low %v3284_v50, %v3288_v54  ;;  %v10412_v33 = vcombine.low %v3285_v23, %v3289_v25  ;;  %v10445_v50 = vcombine.low %v3309_v12, %v3313_v32  ;;  %v3316_v23 = vld [vmem:[#allocation4 + $0x200] sm:$0xff] }
 0x515   :  { %v10447_v54 = vcombine.high %v3309_v12, %v3313_v32  ;;  %v3320_v25 = vld [vmem:[#allocation4 + $0x220] sm:$0xff]  ;;  %v3329_v12 = vld [vmem:[#allocation4 + $0x268] sm:$0xff] }
 0x516   :  { %12003 = vst [vmem:[#allocation73_spill] sm:$0xff] %v10445_v50 }
 0x517   :  { %3136 = vmatpush1.bf16.msra.mxu0 %v10183_v20  ;;  %3177 = vmatpush1.bf16.msra.mxu1 %v10185_v15  ;;  %v3252_v20 = vld [vmem:[#allocation4] sm:$0xff]  ;;  %12004 = vst [vmem:[#allocation75_spill] sm:$0xff] %v10447_v54 }
 0x518   :  { %3137 = vmatprep.subr.bf16.mxu0 %v10189_v45  ;;  %3178 = vmatprep.subr.bf16.mxu1 %v11997_v53  ;;  %v3256_v15 = vld [vmem:[#allocation4 + $0x20] sm:$0xff]  ;;  %v3253_v45 = vld [vmem:[#allocation4 + $0x8] sm:$0xff]  ;;  %v10414_v53 = vcombine.high %v3292_v21, %v3296_v22 }
 0x51b   :  { %3138 = vmatpush1.bf16.msra.mxu0 %v11998_v62  ;;  %3179 = vmatpush1.bf16.msra.mxu1 %v10197_v9  ;;  %v10357_v9 = vcombine.low %v3252_v20, %v3256_v15  ;;  %v10417_v62 = vcombine.high %v3293_v37, %v3297_v43 }
 0x51c   :  { %3139 = vmatprep.subr.bf16.mxu0 %v10201_v57  ;;  %3180 = vmatprep.subr.bf16.mxu1 %v10203_v11  ;;  %v10359_v57 = vcombine.high %v3252_v20, %v3256_v15  ;;  %v3257_v11 = vld [vmem:[#allocation4 + $0x28] sm:$0xff]  ;;  %v10420_v20 = vcombine.low %v3292_v21, %v3296_v22  ;;  %v10424_v15 = vcombine.low %v3293_v37, %v3297_v43 }
 0x51d   :  { %v10361_v63 = vcombine.low %v3253_v45, %v3257_v11  ;;  %v3317_v21 = vld [vmem:[#allocation4 + $0x208] sm:$0xff]  ;;  %v10453_v22 = vcombine.high %v3316_v23, %v3320_v25  ;;  %v10455_v43 = vcombine.low %v3316_v23, %v3320_v25 }
 0x51e   :  { %v3321_v37 = vld [vmem:[#allocation4 + $0x228] sm:$0xff] }
 0x51f   :  { %3140 = vmatpush1.bf16.msra.mxu0 %v10207_v42  ;;  %3181 = vmatpush1.bf16.msra.mxu1 %v10209_v30  ;;  %v3260_v42 = vld [vmem:[#allocation4 + $0x40] sm:$0xff]  ;;  %12005 = vst [vmem:[#allocation39_spill] sm:$0xff] %v10453_v22  ;;  %12006 = vst [vmem:[#allocation42_spill] sm:$0xff] %v10455_v43 }
 0x520   :  { %3141 = vmatprep.subr.bf16.mxu0 %v10213_v44  ;;  %3182 = vmatprep.subr.bf16.mxu1 %v10215_v7  ;;  %v3264_v30 = vld [vmem:[#allocation4 + $0x60] sm:$0xff]  ;;  %v10363_v44 = vcombine.high %v3253_v45, %v3257_v11 }
 0x521   :  { %v10365_v7 = vcombine.high %v3260_v42, %v3264_v30  ;;  %v10372_v39 = vcombine.low %v3260_v42, %v3264_v30  ;;  %v3300_v45 = vld [vmem:[#allocation4 + $0x180] sm:$0xff]  ;;  %v3301_v42 = vld [vmem:[#allocation4 + $0x188] sm:$0xff] }
 0x522   :  { %v3304_v11 = vld [vmem:[#allocation4 + $0x1a0] sm:$0xff] }
 0x523   :  { %3142 = vmatpush1.bf16.msra.mxu0 %v10219_v59  ;;  %3183 = vmatpush1.bf16.msra.mxu1 %v10221_v36  ;;  %v3261_v59 = vld [vmem:[#allocation4 + $0x48] sm:$0xff]  ;;  %v10429_v30 = vcombine.high %v3300_v45, %v3304_v11 }
 0x524   :  { %v3265_v36 = vld [vmem:[#allocation4 + $0x68] sm:$0xff]  ;;  %3831 = vmatprep.subr.bf16.mxu0 %v10359_v57  ;;  %3872 = vmatprep.subr.bf16.mxu1 %v10363_v44 }
 0x525   :  { %v10368_v52 = vcombine.high %v3261_v59, %v3265_v36  ;;  %v10376_v46 = vcombine.low %v3261_v59, %v3265_v36  ;;  %v3305_v59 = vld [vmem:[#allocation4 + $0x1a8] sm:$0xff]  ;;  %v10431_v36 = vcombine.low %v3300_v45, %v3304_v11  ;;  %v10457_v45 = vcombine.low %v3317_v21, %v3321_v37 }
 0x526   :  { %3152 = vmatmul.mubr.bf16.vlgmr.msra.gmra.mrb[36].mxu0 %v2456_v4  ;;  %3193 = vmatmul.mubr.bf16.vlgmr.msra.gmra.mrb[36].mxu1 %v2456_v4  ;;  %v3273_v4 = vld [vmem:[#allocation4 + $0xa8] sm:$0xff]  ;;  %v10433_v6 = vcombine.low %v3301_v42, %v3305_v59  ;;  %v10435_v35 = vcombine.high %v3301_v42, %v3305_v59  ;;  %v10459_v11 = vcombine.high %v3317_v21, %v3321_v37  ;;  %v3324_v42 = vld [vmem:[#allocation4 + $0x240] sm:$0xff] }
 0x527   :  { %3832 = vmatpush1.bf16.msra.mxu0 %v10357_v9  ;;  %3873 = vmatpush1.bf16.msra.mxu1 %v10361_v63  ;;  %v10381_v34 = vcombine.high %v3269_v1, %v3273_v4  ;;  %v10388_v13 = vcombine.low %v3269_v1, %v3273_v4  ;;  %11999 = vst [vmem:[#allocation58_spill] sm:$0xff] %v10431_v36  ;;  %v3308_v1 = vld [vmem:[#allocation4 + $0x1c0] sm:$0xff]  ;;  %12007 = vst [vmem:[#allocation40_spill] sm:$0xff] %v10457_v45 }
 0x528   :  { %3833 = vmatprep.subr.bf16.mxu0 %v10365_v7  ;;  %3874 = vmatprep.subr.bf16.mxu1 %v10368_v52  ;;  %12000 = vst [vmem:[#allocation59_spill] sm:$0xff] %v10433_v6  ;;  %v3312_v4 = vld [vmem:[#allocation4 + $0x1e0] sm:$0xff]  ;;  %12008 = vst [vmem:[#allocation41_spill] sm:$0xff] %v10459_v11 }
 0x529   :  { %v10441_v60 = vcombine.high %v3308_v1, %v3312_v4  ;;  %v10443_v48 = vcombine.low %v3308_v1, %v3312_v4  ;;  %v3328_v59 = vld [vmem:[#allocation4 + $0x260] sm:$0xff]  ;;  %v3325_v1 = vld [vmem:[#allocation4 + $0x248] sm:$0xff] }
 0x52a   :  { %v10465_v4 = vcombine.high %v3324_v42, %v3328_v59  ;;  %v10467_v32 = vcombine.low %v3324_v42, %v3328_v59  ;;  %v10469_v23 = vcombine.low %v3325_v1, %v3329_v12  ;;  %v10471_v25 = vcombine.high %v3325_v1, %v3329_v12  ;;  %v3332_v21 = vld [vmem:[#allocation4 + $0x280] sm:$0xff] }
 0x52b   :  { %3834 = vmatpush1.bf16.msra.mxu0 %v10372_v39  ;;  %3875 = vmatpush1.bf16.msra.mxu1 %v10376_v46  ;;  %12001 = vst [vmem:[#allocation63_spill] sm:$0xff] %v10441_v60  ;;  %12002 = vst [vmem:[#allocation72_spill] sm:$0xff] %v10443_v48  ;;  %v3336_v37 = vld [vmem:[#allocation4 + $0x2a0] sm:$0xff] }
 0x52c   :  { %3835 = vmatprep.subr.bf16.mxu0 %v10378_v49  ;;  %3876 = vmatprep.subr.bf16.mxu1 %v10381_v34  ;;  %12009 = vst [vmem:[#allocation43_spill] sm:$0xff] %v10465_v4  ;;  %12010 = vst [vmem:[#allocation62_spill] sm:$0xff] %v10467_v32  ;;  %v10479_v42 = vcombine.low %v3332_v21, %v3336_v37  ;;  %v3340_v12 = vld [vmem:[#allocation4 + $0x2c0] sm:$0xff] }
 0x52d   :  { %12011 = vst [vmem:[#allocation60_spill] sm:$0xff] %v10469_v23  ;;  %12012 = vst [vmem:[#allocation61_spill] sm:$0xff] %v10471_v25 }
 0x52e   :  { %12014 = vst [vmem:[#allocation67_spill] sm:$0xff] %v10479_v42 }
 0x52f   :  { %3836 = vmatpush1.bf16.msra.mxu0 %v10384_v3  ;;  %3877 = vmatpush1.bf16.msra.mxu1 %v10388_v13 }
 0x530   :  { %3837 = vmatprep.subr.bf16.mxu0 %v10390_v31  ;;  %3878 = vmatprep.subr.bf16.mxu1 %v10393_v16 }
 0x533   :  { %3838 = vmatpush1.bf16.msra.mxu0 %v10396_v40  ;;  %3879 = vmatpush1.bf16.msra.mxu1 %v10400_v14 }
 0x534   :  { %3839 = vmatprep.subr.bf16.mxu0 %v10402_v26  ;;  %3880 = vmatprep.subr.bf16.mxu1 %v10405_v19 }
 0x537   :  { %3840 = vmatpush1.bf16.msra.mxu0 %v10408_v5  ;;  %3881 = vmatpush1.bf16.msra.mxu1 %v10412_v33 }
 0x538   :  { %3841 = vmatprep.subr.bf16.mxu0 %v10414_v53  ;;  %3882 = vmatprep.subr.bf16.mxu1 %v10417_v62 }
 0x53b   :  { %3842 = vmatpush1.bf16.msra.mxu0 %v10420_v20  ;;  %3883 = vmatpush1.bf16.msra.mxu1 %v10424_v15 }
 0x53c   :  { %3843 = vmatprep.subr.bf16.mxu0 %v10429_v30  ;;  %3884 = vmatprep.subr.bf16.mxu1 %v10435_v35 }
 0x53f   :  { %3844 = vmatpush1.bf16.msra.mxu0 %v10431_v36  ;;  %3885 = vmatpush1.bf16.msra.mxu1 %v10433_v6 }
 0x540   :  { %3845 = vmatprep.subr.bf16.mxu0 %v10441_v60  ;;  %3886 = vmatprep.subr.bf16.mxu1 %v10447_v54  ;;  %v130_v54 = vpop.permute.xlu0 %129 }
 0x541   :  { %v222_v36 = vmul.f32 %v11863_v28, %v130_v54 }
 0x543   :  { %3846 = vmatpush1.bf16.msra.mxu0 %v10443_v48  ;;  %3887 = vmatpush1.bf16.msra.mxu1 %v10445_v50 }
 0x544   :  { %3847 = vmatprep.subr.bf16.mxu0 %v10453_v22  ;;  %3888 = vmatprep.subr.bf16.mxu1 %v10459_v11  ;;  %v3337_v11 = vld [vmem:[#allocation4 + $0x2a8] sm:$0xff] }
 0x545   :  { %v3341_v22 = vld [vmem:[#allocation4 + $0x2c8] sm:$0xff] }
 0x547   :  { %3848 = vmatpush1.bf16.msra.mxu0 %v10455_v43  ;;  %3889 = vmatpush1.bf16.msra.mxu1 %v10457_v45  ;;  %v3333_v43 = vld [vmem:[#allocation4 + $0x288] sm:$0xff]  ;;  %v10477_v45 = vcombine.high %v3332_v21, %v3336_v37  ;;  %v3258_v37 = vld [vmem:[#allocation4 + $0x30] sm:$0xff] }
 0x548   :  { %3849 = vmatprep.subr.bf16.mxu0 %v10465_v4  ;;  %3890 = vmatprep.subr.bf16.mxu1 %v10471_v25  ;;  %v10481_v59 = vcombine.low %v3333_v43, %v3337_v11  ;;  %v10483_v1 = vcombine.high %v3333_v43, %v3337_v11  ;;  %v3344_v4 = vld [vmem:[#allocation4 + $0x2e0] sm:$0xff]  ;;  %v3345_v25 = vld [vmem:[#allocation4 + $0x2e8] sm:$0xff]  ;;  %v3254_v11 = vld [vmem:[#allocation4 + $0x10] sm:$0xff] }
 0x549   :  { %12013 = vst [vmem:[#allocation64_spill] sm:$0xff] %v10477_v45  ;;  %v10492_v21 = vcombine.high %v3341_v22, %v3345_v25  ;;  %v10496_v43 = vcombine.low %v3341_v22, %v3345_v25 }
 0x54a   :  { %12015 = vst [vmem:[#allocation65_spill] sm:$0xff] %v10481_v59  ;;  %12016 = vst [vmem:[#allocation66_spill] sm:$0xff] %v10483_v1 }
 0x54b   :  { %3850 = vmatpush1.bf16.msra.mxu0 %v10467_v32  ;;  %3891 = vmatpush1.bf16.msra.mxu1 %v10469_v23  ;;  %v10486_v32 = vcombine.high %v3340_v12, %v3344_v4  ;;  %v10490_v23 = vcombine.low %v3340_v12, %v3344_v4  ;;  %12019 = vst [vmem:[#allocation69_spill] sm:$0xff] %v10492_v21  ;;  %12020 = vst [vmem:[#allocation71_spill] sm:$0xff] %v10496_v43  ;;  %v3259_v4 = vld [vmem:[#allocation4 + $0x38] sm:$0xff] }
 0x54c   :  { %3851 = vmatprep.subr.bf16.mxu0 %v10477_v45  ;;  %3892 = vmatprep.subr.bf16.mxu1 %v10483_v1  ;;  %v3255_v45 = vld [vmem:[#allocation4 + $0x18] sm:$0xff]  ;;  %v10503_v12 = vcombine.low %v3254_v11, %v3258_v37 }
 0x54d   :  { %12017 = vst [vmem:[#allocation68_spill] sm:$0xff] %v10486_v32  ;;  %12018 = vst [vmem:[#allocation70_spill] sm:$0xff] %v10490_v23  ;;  %v10505_v1 = vcombine.low %v3255_v45, %v3259_v4 }
 0x54f   :  { %3852 = vmatpush1.bf16.msra.mxu0 %v10479_v42  ;;  %3893 = vmatpush1.bf16.msra.mxu1 %v10481_v59  ;;  %v10501_v42 = vcombine.high %v3254_v11, %v3258_v37  ;;  %v10507_v59 = vcombine.high %v3255_v45, %v3259_v4  ;;  %v220_v11 = vmul.f32 %v11958_v2, %v130_v54 }
 0x550   :  { %3853 = vmatprep.subr.bf16.mxu0 %v10486_v32  ;;  %3894 = vmatprep.subr.bf16.mxu1 %v10492_v21  ;;  %v221_v37 = vmul.f32 %v11959_v55, %v130_v54 }
 0x551   :  { %12021 = vst [vmem:[#allocation17_spill] sm:$0xff] %v10501_v42  ;;  %12022 = vst [vmem:[#allocation18_spill] sm:$0xff] %v10507_v59  ;;  %v326_v45 = vadd.f32 %v11960_v47, %v220_v11 }
 0x552   :  { %v327_v4 = vadd.f32 %v11961_v61, %v221_v37 }
 0x553   :  { %3854 = vmatpush1.bf16.msra.mxu0 %v10490_v23  ;;  %3895 = vmatpush1.bf16.msra.mxu1 %v10496_v43 }
 0x554   :  { %3913 = vmatprep.subr.bf16.mxu0 %v10501_v42  ;;  %3954 = vmatprep.subr.bf16.mxu1 %v10507_v59 }
 0x5c9   :  { %v3071_v22 = vpop.f32.mrb[32].mxu0  ;;  %v3112_v25 = vpop.f32.mrb[32].mxu1 }
 0x5ca   :  { %v3073_v23 = vpop.f32.mrb[33].mxu0  ;;  %v3114_v21 = vpop.f32.mrb[33].mxu1  ;;  %v3072_v42 = vadd.f32 %v3071_v22, %v326_v45 }
 0x5cb   :  { %v3075_v32 = vpop.f32.mrb[34].mxu0  ;;  %v3116_v50 = vpop.f32.mrb[34].mxu1  ;;  %v3074_v60 = vadd.f32 %v3073_v23, %v327_v4 }
 0x5cc   :  { %v3076_v43 = vpop.f32.mrb[35].mxu0  ;;  %v3117_v48 = vpop.f32.mrb[35].mxu1  ;;  %v8106_v59 = vmul.f32 -1.442695, %v3072_v42  ;;  %v223_v50 = vmul.f32 %v11962_v10, %v130_v54  ;;  %v227_v42 = vmul.f32 %v11968_v18, %v130_v54 }
 0x5cd   :  { %v8107_v6 = vmul.f32 -1.442695, %v3074_v60  ;;  %v328_v48 = vadd.f32 %v11963_v0, %v222_v36  ;;  %v225_v60 = vmul.f32 %v11966_v38, %v130_v54  ;;  %v226_v36 = vmul.f32 %v11967_v51, %v130_v54 }
 0x5ce   :  { %8899 = vpow2.f32 %v8106_v59  ;;  %v329_v32 = vadd.f32 %v11964_v17, %v223_v50 }
 0x5cf   :  { %8901 = vpow2.f32 %v8107_v6  ;;  %v3113_v43 = vadd.f32 %v3112_v25, %v328_v48  ;;  %v224_v6 = vmul.f32 %v11965_v27, %v130_v54  ;;  %v332_v4 = vadd.f32 %v9675_v58, %v226_v36 }
 0x5d0   :  { %v3115_v55 = vadd.f32 %v3114_v21, %v329_v32 }
 0x5d1   :  { %v8108_v47 = vmul.f32 -1.442695, %v3113_v43  ;;  %v330_v59 = vadd.f32 %v11969_v8, %v224_v6 }
 0x5d2   :  { %v8109_v37 = vmul.f32 -1.442695, %v3115_v55 }
 0x5d3   :  { %8903 = vpow2.f32 %v8108_v47 }
 0x5d4   :  { %8905 = vpow2.f32 %v8109_v37 }
 0x5d8   :  { %v8900_v2 = vpop.eup %8899 }
 0x5d9   :  { %v8902_v11 = vpop.eup %8901  ;;  %v3213_v22 = vadd.f32 1.0, %v8900_v2  ;;  %v331_v2 = vadd.f32 %v11970_v41, %v225_v60 }
 0x5da   :  { %v3214_v23 = vadd.f32 1.0, %v8902_v11  ;;  %v333_v11 = vadd.f32 %v10070_v29, %v227_v42 }
 0x5db   :  { %8907 = vrcp.f32 %v3213_v22 }
 0x5dc   :  { %8909 = vrcp.f32 %v3214_v23 }
 0x5dd   :  { %v8904_v21 = vpop.eup %8903 }
 0x5de   :  { %v8906_v55 = vpop.eup %8905  ;;  %v3215_v60 = vadd.f32 1.0, %v8904_v21 }
 0x5e5   :  { %v8908_v32 = vpop.eup %8907 }
 0x5e6   :  { %v8910_v54 = vpop.eup %8909 }
 0x5f9   :  { %v3153_v25 = vpop.f32.mrb[36].mxu0  ;;  %v3194_v45 = vpop.f32.mrb[36].mxu1 }
 0x5fa   :  { %v3154_v47 = vadd.f32 %v3153_v25, %v330_v59  ;;  %v3155_v50 = vpop.f32.mrb[37].mxu0  ;;  %v3196_v48 = vpop.f32.mrb[37].mxu1  ;;  %v3195_v6 = vadd.f32 %v3194_v45, %v332_v4  ;;  %v3216_v59 = vadd.f32 1.0, %v8906_v55  ;;  %v3262_v55 = vld [vmem:[#allocation4 + $0x50] sm:$0xff] }
 0x5fb   :  { %v3156_v43 = vadd.f32 %v3155_v50, %v331_v2  ;;  %v3157_v37 = vpop.f32.mrb[38].mxu0  ;;  %v3198_v22 = vpop.f32.mrb[38].mxu1  ;;  %v3197_v38 = vadd.f32 %v3196_v48, %v333_v11  ;;  %v3270_v48 = vld [vmem:[#allocation4 + $0x90] sm:$0xff] }
 0x5fc   :  { %v3225_v23 = vmul.f32 %v8908_v32, %v3154_v47  ;;  %v3158_v8 = vpop.f32.mrb[39].mxu0  ;;  %v3199_v18 = vpop.f32.mrb[39].mxu1  ;;  %v3274_v11 = vld [vmem:[#allocation4 + $0xb0] sm:$0xff]  ;;  %v3271_v37 = vld [vmem:[#allocation4 + $0x98] sm:$0xff] }
 0x5fd   :  { %v3226_v51 = vmul.f32 %v8910_v54, %v3156_v43  ;;  %v3275_v22 = vld [vmem:[#allocation4 + $0xb8] sm:$0xff] }
 0x5fe   :  { %v3227_v41 = vadd.f32 %v3225_v23, %v3195_v6  ;;  %v10557_v6 = vcombine.high %v3270_v48, %v3274_v11 }
 0x5ff   :  { %v3228_v25 = vadd.f32 %v3226_v51, %v3197_v38  ;;  %v3266_v38 = vld [vmem:[#allocation4 + $0x70] sm:$0xff]  ;;  %v3263_v51 = vld [vmem:[#allocation4 + $0x58] sm:$0xff] }
 0x600   :  { %8911 = vtanh.f32 %v3227_v41  ;;  %v3267_v41 = vld [vmem:[#allocation4 + $0x78] sm:$0xff]  ;;  %v10543_v32 = vcombine.high %v3262_v55, %v3266_v38  ;;  %v10551_v54 = vcombine.low %v3262_v55, %v3266_v38 }
 0x601   :  { %8913 = vtanh.f32 %v3228_v25  ;;  %v10545_v43 = vcombine.high %v3263_v51, %v3267_v41  ;;  %v10553_v23 = vcombine.low %v3263_v51, %v3267_v41  ;;  %v3282_v25 = vld [vmem:[#allocation4 + $0xf0] sm:$0xff]  ;;  %v3287_v55 = vld [vmem:[#allocation4 + $0x118] sm:$0xff] }
 0x602   :  { %8915 = vrcp.f32 %v3215_v60  ;;  %v10559_v60 = vcombine.high %v3271_v37, %v3275_v22  ;;  %v3291_v38 = vld [vmem:[#allocation4 + $0x138] sm:$0xff] }
 0x603   :  { %8917 = vrcp.f32 %v3216_v59  ;;  %v3278_v59 = vld [vmem:[#allocation4 + $0xd0] sm:$0xff] }
 0x604   :  { %12023 = vst [vmem:[#allocation20_spill] sm:$0xff] %v10559_v60  ;;  %v10577_v51 = vcombine.low %v3278_v59, %v3282_v25 }
 0x606   :  { %12028 = vst [vmem:[#allocation26_spill] sm:$0xff] %v10577_v51 }
 0x60a   :  { %v8912_v36 = vpop.eup %8911 }
 0x60b   :  { %v8914_v2 = vpop.eup %8913  ;;  %v3231_v42 = vsub.f32 %v10297_v24, %v8912_v36 }
 0x60c   :  { %v8916_v50 = vpop.eup %8915  ;;  %v3232_v47 = vsub.f32 %v10299_v56, %v8914_v2 }
 0x60d   :  { %v8918_v45 = vpop.eup %8917  ;;  %v3233_v8 = vmul.f32 %v8916_v50, %v3231_v42  ;;  %v10565_v42 = vcombine.low %v3270_v48, %v3274_v11  ;;  %v10567_v50 = vcombine.low %v3271_v37, %v3275_v22  ;;  %v10585_v48 = vcombine.high %v3287_v55, %v3291_v38  ;;  %v3294_v11 = vld [vmem:[#allocation4 + $0x150] sm:$0xff]  ;;  %v3295_v22 = vld [vmem:[#allocation4 + $0x158] sm:$0xff] }
 0x60e   :  { %v3234_v18 = vmul.f32 %v8918_v45, %v3232_v47  ;;  %v10571_v47 = vcombine.high %v3278_v59, %v3282_v25  ;;  %v3298_v37 = vld [vmem:[#allocation4 + $0x170] sm:$0xff]  ;;  %v10591_v25 = vcombine.low %v3287_v55, %v3291_v38 }
 0x60f   :  { %v10529_v4 = vadd.f32 %v8912_v36, %v3233_v8  ;;  %v3279_v36 = vld [vmem:[#allocation4 + $0xd8] sm:$0xff]  ;;  %12024 = vst [vmem:[#allocation21_spill] sm:$0xff] %v10565_v42  ;;  %12025 = vst [vmem:[#allocation78_spill] sm:$0xff] %v10567_v50  ;;  %v3286_v8 = vld [vmem:[#allocation4 + $0x110] sm:$0xff] }
 0x610   :  { %v10531_v21 = vadd.f32 %v8914_v2, %v3234_v18  ;;  %v3283_v2 = vld [vmem:[#allocation4 + $0xf8] sm:$0xff]  ;;  %12026 = vst [vmem:[#allocation22_spill] sm:$0xff] %v10571_v47  ;;  %v3290_v18 = vld [vmem:[#allocation4 + $0x130] sm:$0xff]  ;;  %12031 = vst [vmem:[#allocation29_spill] sm:$0xff] %v10585_v48 }
 0x611   :  { %v10539_v56 = vpack.c.bf16 %v10529_v4, %v10529_v4  ;;  %v10573_v45 = vcombine.high %v3279_v36, %v3283_v2  ;;  %v10579_v41 = vcombine.low %v3279_v36, %v3283_v2  ;;  %v10589_v59 = vcombine.low %v3286_v8, %v3290_v18  ;;  %12033 = vst [vmem:[#allocation31_spill] sm:$0xff] %v10591_v25 }
 0x612   :  { %3238 = vst.msk [vmem:[#allocation3 + $0x10] sm:$0xff] %vm1009_vm2, %v10531_v21  ;;  %v3251_v24 = vpack.c.bf16 %v10531_v21, %v10531_v21  ;;  %v10595_v36 = vcombine.high %v3294_v11, %v3298_v37 }
 0x613   :  { %12027 = vst [vmem:[#allocation79_spill] sm:$0xff] %v10573_v45  ;;  %12029 = vst [vmem:[#allocation27_spill] sm:$0xff] %v10579_v41 }
 0x614   :  { %8206 = vmatprep.mubr.msk.bf16.mxu0 %vm1009_vm2, %v3251_v24  ;;  %8207 = vmatprep.mubr.msk.bf16.mxu1 %vm1009_vm2, %v3251_v24  ;;  %12032 = vst [vmem:[#allocation30_spill] sm:$0xff] %v10589_v59  ;;  %12034 = vst [vmem:[#allocation32_spill] sm:$0xff] %v10595_v36 }
 0x615   :  { %3864 = vmatmul.mubr.bf16.vlgmr.msra.gmra.mrb[40].mxu0 %v10539_v56  ;;  %3905 = vmatmul.mubr.bf16.vlgmr.msra.gmra.mrb[40].mxu1 %v10539_v56 }
 0x616   :  { %3914 = vmatpush1.bf16.msra.mxu0 %v10503_v12  ;;  %3955 = vmatpush1.bf16.msra.mxu1 %v10505_v1 }
 0x617   :  { %8208 = vmatprep.mubr.msk.bf16.mxu0 %vm1009_vm2, %v3251_v24  ;;  %8209 = vmatprep.mubr.msk.bf16.mxu1 %vm1009_vm2, %v3251_v24  ;;  %v10583_v24 = vcombine.high %v3286_v8, %v3290_v18  ;;  %v10601_v8 = vcombine.low %v3294_v11, %v3298_v37 }
 0x618   :  { %3915 = vmatprep.subr.bf16.mxu0 %v10543_v32  ;;  %3956 = vmatprep.subr.bf16.mxu1 %v10545_v43 }
 0x619   :  { %12030 = vst [vmem:[#allocation28_spill] sm:$0xff] %v10583_v24  ;;  %12036 = vst [vmem:[#allocation34_spill] sm:$0xff] %v10601_v8 }
 0x61a   :  { %3916 = vmatpush1.bf16.msra.mxu0 %v10551_v54  ;;  %3957 = vmatpush1.bf16.msra.mxu1 %v10553_v23 }
 0x61b   :  { %3917 = vmatprep.subr.bf16.mxu0 %v10557_v6  ;;  %3958 = vmatprep.subr.bf16.mxu1 %v10559_v60  ;;  %v3299_v60 = vld [vmem:[#allocation4 + $0x178] sm:$0xff] }
 0x61c   :  { %v10597_v2 = vcombine.high %v3295_v22, %v3299_v60  ;;  %v10603_v18 = vcombine.low %v3295_v22, %v3299_v60 }
 0x61e   :  { %3918 = vmatpush1.bf16.msra.mxu0 %v10565_v42  ;;  %3959 = vmatpush1.bf16.msra.mxu1 %v10567_v50  ;;  %12035 = vst [vmem:[#allocation33_spill] sm:$0xff] %v10597_v2  ;;  %v3303_v50 = vld [vmem:[#allocation4 + $0x198] sm:$0xff]  ;;  %12037 = vst [vmem:[#allocation35_spill] sm:$0xff] %v10603_v18 }
 0x61f   :  { %3919 = vmatprep.subr.bf16.mxu0 %v10571_v47  ;;  %3960 = vmatprep.subr.bf16.mxu1 %v10573_v45  ;;  %v3302_v45 = vld [vmem:[#allocation4 + $0x190] sm:$0xff]  ;;  %v3307_v42 = vld [vmem:[#allocation4 + $0x1b8] sm:$0xff] }
 0x620   :  { %v3306_v47 = vld [vmem:[#allocation4 + $0x1b0] sm:$0xff]  ;;  %v10609_v38 = vcombine.high %v3303_v50, %v3307_v42  ;;  %v10615_v60 = vcombine.low %v3303_v50, %v3307_v42 }
 0x621   :  { %v10607_v55 = vcombine.high %v3302_v45, %v3306_v47  ;;  %v10613_v11 = vcombine.low %v3302_v45, %v3306_v47 }
 0x622   :  { %3920 = vmatpush1.bf16.msra.mxu0 %v10577_v51  ;;  %3961 = vmatpush1.bf16.msra.mxu1 %v10579_v41  ;;  %12039 = vst [vmem:[#allocation37_spill] sm:$0xff] %v10609_v38  ;;  %v3311_v41 = vld [vmem:[#allocation4 + $0x1d8] sm:$0xff]  ;;  %12041 = vst [vmem:[#allocation77_spill] sm:$0xff] %v10615_v60 }
 0x623   :  { %3921 = vmatprep.subr.bf16.mxu0 %v10583_v24  ;;  %3962 = vmatprep.subr.bf16.mxu1 %v10585_v48  ;;  %12038 = vst [vmem:[#allocation36_spill] sm:$0xff] %v10607_v55  ;;  %v3310_v48 = vld [vmem:[#allocation4 + $0x1d0] sm:$0xff]  ;;  %v3315_v51 = vld [vmem:[#allocation4 + $0x1f8] sm:$0xff]  ;;  %12040 = vst [vmem:[#allocation38_spill] sm:$0xff] %v10613_v11 }
 0x624   :  { %v3314_v24 = vld [vmem:[#allocation4 + $0x1f0] sm:$0xff]  ;;  %v10621_v22 = vcombine.high %v3311_v41, %v3315_v51  ;;  %v10627_v42 = vcombine.low %v3311_v41, %v3315_v51 }
 0x625   :  { %v10619_v37 = vcombine.high %v3310_v48, %v3314_v24  ;;  %v10625_v47 = vcombine.low %v3310_v48, %v3314_v24 }
 0x626   :  { %3922 = vmatpush1.bf16.msra.mxu0 %v10589_v59  ;;  %3963 = vmatpush1.bf16.msra.mxu1 %v10591_v25  ;;  %12043 = vst [vmem:[#allocation45_spill] sm:$0xff] %v10621_v22  ;;  %v3319_v25 = vld [vmem:[#allocation4 + $0x218] sm:$0xff]  ;;  %12045 = vst [vmem:[#allocation47_spill] sm:$0xff] %v10627_v42 }
 0x627   :  { %3923 = vmatprep.subr.bf16.mxu0 %v10595_v36  ;;  %3964 = vmatprep.subr.bf16.mxu1 %v10597_v2  ;;  %12042 = vst [vmem:[#allocation44_spill] sm:$0xff] %v10619_v37  ;;  %v3318_v2 = vld [vmem:[#allocation4 + $0x210] sm:$0xff]  ;;  %v3323_v59 = vld [vmem:[#allocation4 + $0x238] sm:$0xff]  ;;  %12044 = vst [vmem:[#allocation46_spill] sm:$0xff] %v10625_v47 }
 0x628   :  { %v3322_v36 = vld [vmem:[#allocation4 + $0x230] sm:$0xff]  ;;  %v10633_v45 = vcombine.high %v3319_v25, %v3323_v59  ;;  %v10639_v51 = vcombine.low %v3319_v25, %v3323_v59 }
 0x629   :  { %v10631_v50 = vcombine.high %v3318_v2, %v3322_v36  ;;  %v10637_v24 = vcombine.low %v3318_v2, %v3322_v36 }
 0x62a   :  { %3924 = vmatpush1.bf16.msra.mxu0 %v10601_v8  ;;  %3965 = vmatpush1.bf16.msra.mxu1 %v10603_v18  ;;  %12047 = vst [vmem:[#allocation49_spill] sm:$0xff] %v10633_v45  ;;  %v3327_v18 = vld [vmem:[#allocation4 + $0x258] sm:$0xff] }
 0x62b   :  { %3925 = vmatprep.subr.bf16.mxu0 %v10607_v55  ;;  %3966 = vmatprep.subr.bf16.mxu1 %v10609_v38  ;;  %12046 = vst [vmem:[#allocation48_spill] sm:$0xff] %v10631_v50  ;;  %v3326_v38 = vld [vmem:[#allocation4 + $0x250] sm:$0xff]  ;;  %v3331_v8 = vld [vmem:[#allocation4 + $0x278] sm:$0xff] }
 0x62c   :  { %v3330_v55 = vld [vmem:[#allocation4 + $0x270] sm:$0xff]  ;;  %v10645_v48 = vcombine.high %v3327_v18, %v3331_v8  ;;  %v10651_v59 = vcombine.low %v3327_v18, %v3331_v8 }
 0x62d   :  { %v10643_v41 = vcombine.high %v3326_v38, %v3330_v55  ;;  %v10649_v36 = vcombine.low %v3326_v38, %v3330_v55 }
 0x62e   :  { %3926 = vmatpush1.bf16.msra.mxu0 %v10613_v11  ;;  %3967 = vmatpush1.bf16.msra.mxu1 %v10615_v60  ;;  %12048 = vst [vmem:[#allocation50_spill] sm:$0xff] %v10645_v48  ;;  %v3335_v60 = vld [vmem:[#allocation4 + $0x298] sm:$0xff] }
 0x62f   :  { %3927 = vmatprep.subr.bf16.mxu0 %v10619_v37  ;;  %3968 = vmatprep.subr.bf16.mxu1 %v10621_v22  ;;  %v3334_v22 = vld [vmem:[#allocation4 + $0x290] sm:$0xff]  ;;  %v3339_v11 = vld [vmem:[#allocation4 + $0x2b8] sm:$0xff]  ;;  %12049 = vst [vmem:[#allocation51_spill] sm:$0xff] %v10649_v36 }
 0x630   :  { %v3338_v37 = vld [vmem:[#allocation4 + $0x2b0] sm:$0xff]  ;;  %v10657_v2 = vcombine.high %v3335_v60, %v3339_v11  ;;  %v10663_v8 = vcombine.low %v3335_v60, %v3339_v11 }
 0x631   :  { %v10655_v25 = vcombine.high %v3334_v22, %v3338_v37  ;;  %v10661_v55 = vcombine.low %v3334_v22, %v3338_v37 }
 0x632   :  { %3928 = vmatpush1.bf16.msra.mxu0 %v10625_v47  ;;  %3969 = vmatpush1.bf16.msra.mxu1 %v10627_v42  ;;  %v3343_v42 = vld [vmem:[#allocation4 + $0x2d8] sm:$0xff] }
 0x633   :  { %3929 = vmatprep.subr.bf16.mxu0 %v10631_v50  ;;  %3970 = vmatprep.subr.bf16.mxu1 %v10633_v45  ;;  %v3342_v45 = vld [vmem:[#allocation4 + $0x2d0] sm:$0xff]  ;;  %v3347_v47 = vld [vmem:[#allocation4 + $0x2f8] sm:$0xff] }
 0x634   :  { %v3346_v50 = vld [vmem:[#allocation4 + $0x2f0] sm:$0xff]  ;;  %v10669_v38 = vcombine.high %v3343_v42, %v3347_v47 }
 0x635   :  { %v10667_v18 = vcombine.high %v3342_v45, %v3346_v50 }
 0x636   :  { %3930 = vmatpush1.bf16.msra.mxu0 %v10637_v24  ;;  %3971 = vmatpush1.bf16.msra.mxu1 %v10639_v51 }
 0x637   :  { %3931 = vmatprep.subr.bf16.mxu0 %v10643_v41  ;;  %3972 = vmatprep.subr.bf16.mxu1 %v10645_v48  ;;  %v10673_v48 = vcombine.low %v3342_v45, %v3346_v50  ;;  %v12074_v50 = vld [vmem:[#allocation74_spill] sm:$0xff] }
 0x63a   :  { %3932 = vmatpush1.bf16.msra.mxu0 %v10649_v36  ;;  %3973 = vmatpush1.bf16.msra.mxu1 %v10651_v59  ;;  %v10675_v36 = vcombine.low %v3343_v42, %v3347_v47  ;;  %v135_v42 = vpop.permute.xlu1 %134 }
 0x63b   :  { %3933 = vmatprep.subr.bf16.mxu0 %v10655_v25  ;;  %3974 = vmatprep.subr.bf16.mxu1 %v10657_v2  ;;  %v228_v45 = vmul.f32 %v12074_v50, %v135_v42 }
 0x63e   :  { %3934 = vmatpush1.bf16.msra.mxu0 %v10661_v55  ;;  %3975 = vmatpush1.bf16.msra.mxu1 %v10663_v8 }
 0x63f   :  { %3935 = vmatprep.subr.bf16.mxu0 %v10667_v18  ;;  %3976 = vmatprep.subr.bf16.mxu1 %v10669_v38 }
 0x642   :  { %3936 = vmatpush1.bf16.msra.mxu0 %v10673_v48  ;;  %3977 = vmatpush1.bf16.msra.mxu1 %v10675_v36 }
 0x643   :  { %4625 = vmatprep.subr.bf16.mxu0 %v10359_v57  ;;  %4666 = vmatprep.subr.bf16.mxu1 %v10363_v44  ;;  %v12051_v57 = vld [vmem:[#allocation59_spill] sm:$0xff] }
 0x644   :  { %v12053_v44 = vld [vmem:[#allocation75_spill] sm:$0xff] }
 0x645   :  { %3946 = vmatmul.mubr.bf16.vlgmr.msra.gmra.mrb[44].mxu0 %v10539_v56  ;;  %3987 = vmatmul.mubr.bf16.vlgmr.msra.gmra.mrb[44].mxu1 %v10539_v56 }
 0x646   :  { %4626 = vmatpush1.bf16.msra.mxu0 %v10357_v9  ;;  %4667 = vmatpush1.bf16.msra.mxu1 %v10361_v63  ;;  %v12050_v9 = vld [vmem:[#allocation58_spill] sm:$0xff]  ;;  %v12052_v63 = vld [vmem:[#allocation63_spill] sm:$0xff] }
 0x647   :  { %4627 = vmatprep.subr.bf16.mxu0 %v10365_v7  ;;  %4668 = vmatprep.subr.bf16.mxu1 %v10368_v52  ;;  %v12054_v7 = vld [vmem:[#allocation72_spill] sm:$0xff]  ;;  %v12055_v52 = vld [vmem:[#allocation73_spill] sm:$0xff] }
 0x64a   :  { %4628 = vmatpush1.bf16.msra.mxu0 %v10372_v39  ;;  %4669 = vmatpush1.bf16.msra.mxu1 %v10376_v46  ;;  %v12056_v39 = vld [vmem:[#allocation39_spill] sm:$0xff]  ;;  %v12057_v46 = vld [vmem:[#allocation41_spill] sm:$0xff] }
 0x64b   :  { %4629 = vmatprep.subr.bf16.mxu0 %v10378_v49  ;;  %4670 = vmatprep.subr.bf16.mxu1 %v10381_v34  ;;  %v12058_v49 = vld [vmem:[#allocation42_spill] sm:$0xff]  ;;  %v12059_v34 = vld [vmem:[#allocation40_spill] sm:$0xff] }
 0x64e   :  { %4630 = vmatpush1.bf16.msra.mxu0 %v10384_v3  ;;  %4671 = vmatpush1.bf16.msra.mxu1 %v10388_v13  ;;  %v12060_v3 = vld [vmem:[#allocation43_spill] sm:$0xff]  ;;  %v12061_v13 = vld [vmem:[#allocation61_spill] sm:$0xff] }
 0x64f   :  { %4631 = vmatprep.subr.bf16.mxu0 %v10390_v31  ;;  %4672 = vmatprep.subr.bf16.mxu1 %v10393_v16  ;;  %v12062_v31 = vld [vmem:[#allocation62_spill] sm:$0xff]  ;;  %v12063_v16 = vld [vmem:[#allocation60_spill] sm:$0xff] }
 0x652   :  { %4632 = vmatpush1.bf16.msra.mxu0 %v10396_v40  ;;  %4673 = vmatpush1.bf16.msra.mxu1 %v10400_v14  ;;  %v12064_v40 = vld [vmem:[#allocation64_spill] sm:$0xff]  ;;  %v12065_v14 = vld [vmem:[#allocation66_spill] sm:$0xff] }
 0x653   :  { %4633 = vmatprep.subr.bf16.mxu0 %v10402_v26  ;;  %4674 = vmatprep.subr.bf16.mxu1 %v10405_v19  ;;  %v12066_v26 = vld [vmem:[#allocation67_spill] sm:$0xff]  ;;  %v12067_v19 = vld [vmem:[#allocation65_spill] sm:$0xff] }
 0x656   :  { %4634 = vmatpush1.bf16.msra.mxu0 %v10408_v5  ;;  %4675 = vmatpush1.bf16.msra.mxu1 %v10412_v33  ;;  %v12068_v5 = vld [vmem:[#allocation68_spill] sm:$0xff]  ;;  %v12069_v33 = vld [vmem:[#allocation69_spill] sm:$0xff] }
 0x657   :  { %4635 = vmatprep.subr.bf16.mxu0 %v10414_v53  ;;  %4676 = vmatprep.subr.bf16.mxu1 %v10417_v62  ;;  %v12070_v53 = vld [vmem:[#allocation70_spill] sm:$0xff]  ;;  %v12071_v62 = vld [vmem:[#allocation71_spill] sm:$0xff] }
 0x65a   :  { %4636 = vmatpush1.bf16.msra.mxu0 %v10420_v20  ;;  %4677 = vmatpush1.bf16.msra.mxu1 %v10424_v15  ;;  %v12072_v20 = vld [vmem:[#allocation17_spill] sm:$0xff]  ;;  %v12073_v15 = vld [vmem:[#allocation18_spill] sm:$0xff] }
 0x65b   :  { %4637 = vmatprep.subr.bf16.mxu0 %v10429_v30  ;;  %4678 = vmatprep.subr.bf16.mxu1 %v10435_v35 }
 0x65e   :  { %4638 = vmatpush1.bf16.msra.mxu0 %v12050_v9  ;;  %4679 = vmatpush1.bf16.msra.mxu1 %v12051_v57  ;;  %v12075_v9 = vld [vmem:[#allocation19_spill] sm:$0xff] }
 0x65f   :  { %4639 = vmatprep.subr.bf16.mxu0 %v12052_v63  ;;  %4680 = vmatprep.subr.bf16.mxu1 %v12053_v44  ;;  %v229_v57 = vmul.f32 %v12075_v9, %v135_v42  ;;  %v12076_v63 = vld [vmem:[#allocation76_spill] sm:$0xff] }
 0x660   :  { %v334_v44 = vadd.f32 %v12076_v63, %v228_v45 }
 0x662   :  { %4640 = vmatpush1.bf16.msra.mxu0 %v12054_v7  ;;  %4681 = vmatpush1.bf16.msra.mxu1 %v12055_v52  ;;  %v335_v7 = vadd.f32 %v11961_v61, %v229_v57  ;;  %v12081_v57 = vld [vmem:[#allocation25_spill] sm:$0xff] }
 0x663   :  { %4641 = vmatprep.subr.bf16.mxu0 %v12056_v39  ;;  %4682 = vmatprep.subr.bf16.mxu1 %v12057_v46 }
 0x666   :  { %4642 = vmatpush1.bf16.msra.mxu0 %v12058_v49  ;;  %4683 = vmatpush1.bf16.msra.mxu1 %v12059_v34  ;;  %v230_v34 = vmul.f32 %v11863_v28, %v135_v42 }
 0x667   :  { %4643 = vmatprep.subr.bf16.mxu0 %v12060_v3  ;;  %4684 = vmatprep.subr.bf16.mxu1 %v12061_v13  ;;  %v231_v3 = vmul.f32 %v11962_v10, %v135_v42 }
 0x668   :  { %v336_v13 = vadd.f32 %v11963_v0, %v230_v34 }
 0x66a   :  { %4644 = vmatpush1.bf16.msra.mxu0 %v12062_v31  ;;  %4685 = vmatpush1.bf16.msra.mxu1 %v12063_v16  ;;  %v337_v31 = vadd.f32 %v11964_v17, %v231_v3 }
 0x66b   :  { %4645 = vmatprep.subr.bf16.mxu0 %v12064_v40  ;;  %4686 = vmatprep.subr.bf16.mxu1 %v12065_v14 }
 0x66e   :  { %4646 = vmatpush1.bf16.msra.mxu0 %v12066_v26  ;;  %4687 = vmatpush1.bf16.msra.mxu1 %v12067_v19 }
 0x66f   :  { %4647 = vmatprep.subr.bf16.mxu0 %v12068_v5  ;;  %4688 = vmatprep.subr.bf16.mxu1 %v12069_v33 }
 0x672   :  { %4648 = vmatpush1.bf16.msra.mxu0 %v12070_v53  ;;  %4689 = vmatpush1.bf16.msra.mxu1 %v12071_v62  ;;  %v232_v62 = vmul.f32 %v11965_v27, %v135_v42 }
 0x673   :  { %4707 = vmatprep.subr.bf16.mxu0 %v12072_v20  ;;  %4748 = vmatprep.subr.bf16.mxu1 %v12073_v15  ;;  %v12077_v20 = vld [vmem:[#allocation23_spill] sm:$0xff] }
 0x674   :  { %v233_v15 = vmul.f32 %v12077_v20, %v135_v42 }
 0x6e8   :  { %v3865_v30 = vpop.f32.mrb[40].mxu0  ;;  %v3906_v35 = vpop.f32.mrb[40].mxu1 }
 0x6e9   :  { %v3867_v56 = vpop.f32.mrb[41].mxu0  ;;  %v3908_v11 = vpop.f32.mrb[41].mxu1  ;;  %v3866_v52 = vadd.f32 %v3865_v30, %v334_v44  ;;  %v3907_v16 = vadd.f32 %v3906_v35, %v336_v13  ;;  %v12078_v30 = vld [vmem:[#allocation80_spill] sm:$0xff]  ;;  %v12080_v35 = vld [vmem:[#allocation81_spill] sm:$0xff]  ;;  %v339_v44 = vadd.f32 %v12081_v57, %v233_v15 }
 0x6ea   :  { %v3869_v60 = vpop.f32.mrb[42].mxu0  ;;  %v3910_v37 = vpop.f32.mrb[42].mxu1  ;;  %v3868_v39 = vadd.f32 %v3867_v56, %v335_v7  ;;  %v3909_v40 = vadd.f32 %v3908_v11, %v337_v31  ;;  %v234_v56 = vmul.f32 %v12078_v30, %v135_v42  ;;  %v338_v11 = vadd.f32 %v12080_v35, %v232_v62 }
 0x6eb   :  { %v3870_v22 = vpop.f32.mrb[43].mxu0  ;;  %v3911_v47 = vpop.f32.mrb[43].mxu1  ;;  %v8210_v46 = vmul.f32 -1.442695, %v3866_v52  ;;  %v8212_v19 = vmul.f32 -1.442695, %v3907_v16 }
 0x6ec   :  { %v8211_v49 = vmul.f32 -1.442695, %v3868_v39  ;;  %v8213_v5 = vmul.f32 -1.442695, %v3909_v40  ;;  %v12079_v60 = vld [vmem:[#allocation24_spill] sm:$0xff]  ;;  %v340_v39 = vadd.f32 %v9675_v58, %v234_v56 }
 0x6ed   :  { %8919 = vpow2.f32 %v8210_v46  ;;  %v235_v37 = vmul.f32 %v12079_v60, %v135_v42 }
 0x6ee   :  { %8921 = vpow2.f32 %v8211_v49 }
 0x6ef   :  { %8923 = vpow2.f32 %v8212_v19  ;;  %v341_v13 = vadd.f32 %v10070_v29, %v235_v37 }
 0x6f0   :  { %8925 = vpow2.f32 %v8213_v5 }
 0x6f7   :  { %v8920_v14 = vpop.eup %8919 }
 0x6f8   :  { %v8922_v26 = vpop.eup %8921  ;;  %v4007_v33 = vadd.f32 1.0, %v8920_v14 }
 0x6f9   :  { %v4008_v53 = vadd.f32 1.0, %v8922_v26  ;;  %v8924_v22 = vpop.eup %8923 }
 0x6fa   :  { %8927 = vrcp.f32 %v4007_v33  ;;  %v8926_v7 = vpop.eup %8925 }
 0x6fb   :  { %8929 = vrcp.f32 %v4008_v53  ;;  %v4009_v53 = vadd.f32 1.0, %v8924_v22  ;;  %v4010_v15 = vadd.f32 1.0, %v8926_v7 }
 0x704   :  { %v8928_v34 = vpop.eup %8927 }
 0x705   :  { %v8930_v42 = vpop.eup %8929 }
 0x718   :  { %v3947_v47 = vpop.f32.mrb[44].mxu0  ;;  %v3988_v45 = vpop.f32.mrb[44].mxu1 }
 0x719   :  { %v3948_v52 = vadd.f32 %v3947_v47, %v338_v11  ;;  %v3949_v46 = vpop.f32.mrb[45].mxu0  ;;  %v3990_v49 = vpop.f32.mrb[45].mxu1  ;;  %v3989_v14 = vadd.f32 %v3988_v45, %v340_v39 }
 0x71a   :  { %v3950_v3 = vadd.f32 %v3949_v46, %v339_v44  ;;  %v3951_v31 = vpop.f32.mrb[46].mxu0  ;;  %v3992_v16 = vpop.f32.mrb[46].mxu1  ;;  %v3991_v33 = vadd.f32 %v3990_v49, %v341_v13  ;;  %v12087_v13 = vld [vmem:[#allocation26_spill] sm:$0xff] }
 0x71b   :  { %v4019_v40 = vmul.f32 %v8928_v34, %v3948_v52  ;;  %v3952_v26 = vpop.f32.mrb[47].mxu0  ;;  %v3993_v19 = vpop.f32.mrb[47].mxu1  ;;  %v12093_v31 = vld [vmem:[#allocation32_spill] sm:$0xff]  ;;  %v12094_v16 = vld [vmem:[#allocation33_spill] sm:$0xff] }
 0x71c   :  { %v4020_v5 = vmul.f32 %v8930_v42, %v3950_v3  ;;  %v12086_v3 = vld [vmem:[#allocation79_spill] sm:$0xff]  ;;  %v12095_v42 = vld [vmem:[#allocation34_spill] sm:$0xff]  ;;  %v12098_v26 = vld [vmem:[#allocation37_spill] sm:$0xff] }
 0x71d   :  { %v4021_v62 = vadd.f32 %v4019_v40, %v3989_v14  ;;  %v12096_v40 = vld [vmem:[#allocation35_spill] sm:$0xff]  ;;  %v12097_v14 = vld [vmem:[#allocation36_spill] sm:$0xff]  ;;  %v12099_v19 = vld [vmem:[#allocation38_spill] sm:$0xff] }
 0x71e   :  { %v4022_v11 = vadd.f32 %v4020_v5, %v3991_v33  ;;  %v12100_v5 = vld [vmem:[#allocation77_spill] sm:$0xff]  ;;  %v12101_v33 = vld [vmem:[#allocation44_spill] sm:$0xff] }
 0x71f   :  { %8931 = vtanh.f32 %v4021_v62  ;;  %v12103_v62 = vld [vmem:[#allocation46_spill] sm:$0xff] }
 0x720   :  { %8933 = vtanh.f32 %v4022_v11  ;;  %v12105_v11 = vld [vmem:[#allocation48_spill] sm:$0xff] }
 0x721   :  { %8935 = vrcp.f32 %v4009_v53  ;;  %v12102_v53 = vld [vmem:[#allocation45_spill] sm:$0xff] }
 0x722   :  { %8937 = vrcp.f32 %v4010_v15  ;;  %v12104_v15 = vld [vmem:[#allocation47_spill] sm:$0xff] }
 0x729   :  { %v8932_v56 = vpop.eup %8931 }
 0x72a   :  { %v8934_v47 = vpop.eup %8933  ;;  %v4025_v37 = vsub.f32 %v10529_v4, %v8932_v56  ;;  %v12082_v4 = vld [vmem:[#allocation20_spill] sm:$0xff] }
 0x72b   :  { %v8936_v44 = vpop.eup %8935  ;;  %v4026_v52 = vsub.f32 %v10531_v21, %v8934_v47  ;;  %v12083_v21 = vld [vmem:[#allocation21_spill] sm:$0xff] }
 0x72c   :  { %v8938_v45 = vpop.eup %8937  ;;  %v4027_v39 = vmul.f32 %v8936_v44, %v4025_v37  ;;  %v12108_v37 = vld [vmem:[#allocation51_spill] sm:$0xff] }
 0x72d   :  { %v4028_v46 = vmul.f32 %v8938_v45, %v4026_v52  ;;  %v4856_v52 = vld [vmem:[#allocation4 + $0x80] sm:$0xff] }
 0x72e   :  { %v10751_v34 = vadd.f32 %v8932_v56, %v4027_v39  ;;  %v12106_v56 = vld [vmem:[#allocation49_spill] sm:$0xff] }
 0x72f   :  { %v10753_v22 = vadd.f32 %v8934_v47, %v4028_v46  ;;  %v12107_v47 = vld [vmem:[#allocation50_spill] sm:$0xff]  ;;  %v4860_v39 = vld [vmem:[#allocation4 + $0xa0] sm:$0xff] }
 0x730   :  { %v4044_v49 = vpack.c.bf16 %v10751_v34, %v10751_v34  ;;  %v4857_v46 = vld [vmem:[#allocation4 + $0x88] sm:$0xff] }
 0x731   :  { %4032 = vst.msk [vmem:[#allocation3 + $0x18] sm:$0xff] %vm1009_vm2, %v10753_v22  ;;  %v4045_v7 = vpack.c.bf16 %v10753_v22, %v10753_v22 }
 0x733   :  { %8310 = vmatprep.mubr.msk.bf16.mxu0 %vm1009_vm2, %v4045_v7  ;;  %8311 = vmatprep.mubr.msk.bf16.mxu1 %vm1009_vm2, %v4045_v7 }
 0x734   :  { %4658 = vmatmul.mubr.bf16.vlgmr.msra.gmra.mrb[48].mxu0 %v4044_v49  ;;  %4699 = vmatmul.mubr.bf16.vlgmr.msra.gmra.mrb[48].mxu1 %v4044_v49 }
 0x735   :  { %4708 = vmatpush1.bf16.msra.mxu0 %v10503_v12  ;;  %4749 = vmatpush1.bf16.msra.mxu1 %v10505_v1  ;;  %v12084_v12 = vld [vmem:[#allocation78_spill] sm:$0xff] }
 0x736   :  { %8312 = vmatprep.mubr.msk.bf16.mxu0 %vm1009_vm2, %v4045_v7  ;;  %8313 = vmatprep.mubr.msk.bf16.mxu1 %vm1009_vm2, %v4045_v7  ;;  %v12085_v1 = vld [vmem:[#allocation22_spill] sm:$0xff] }
 0x737   :  { %4709 = vmatprep.subr.bf16.mxu0 %v10543_v32  ;;  %4750 = vmatprep.subr.bf16.mxu1 %v10545_v43  ;;  %v12088_v32 = vld [vmem:[#allocation27_spill] sm:$0xff]  ;;  %v12089_v43 = vld [vmem:[#allocation28_spill] sm:$0xff]  ;;  %v4861_v7 = vld [vmem:[#allocation4 + $0xa8] sm:$0xff] }
 0x739   :  { %4710 = vmatpush1.bf16.msra.mxu0 %v10551_v54  ;;  %4751 = vmatpush1.bf16.msra.mxu1 %v10553_v23  ;;  %v12090_v54 = vld [vmem:[#allocation29_spill] sm:$0xff]  ;;  %v12091_v23 = vld [vmem:[#allocation30_spill] sm:$0xff] }
 0x73a   :  { %4711 = vmatprep.subr.bf16.mxu0 %v10557_v6  ;;  %4752 = vmatprep.subr.bf16.mxu1 %v12082_v4  ;;  %v12092_v6 = vld [vmem:[#allocation31_spill] sm:$0xff] }
 0x73d   :  { %4712 = vmatpush1.bf16.msra.mxu0 %v12083_v21  ;;  %4753 = vmatpush1.bf16.msra.mxu1 %v12084_v12  ;;  %v10832_v21 = vcombine.high %v4856_v52, %v4860_v39  ;;  %v10835_v12 = vcombine.high %v4857_v46, %v4861_v7 }
 0x73e   :  { %4713 = vmatprep.subr.bf16.mxu0 %v12085_v1  ;;  %4754 = vmatprep.subr.bf16.mxu1 %v12086_v3  ;;  %v4864_v1 = vld [vmem:[#allocation4 + $0xc0] sm:$0xff] }
 0x73f   :  { %v4868_v3 = vld [vmem:[#allocation4 + $0xe0] sm:$0xff] }
 0x741   :  { %4714 = vmatpush1.bf16.msra.mxu0 %v12087_v13  ;;  %4755 = vmatpush1.bf16.msra.mxu1 %v12088_v32  ;;  %v4865_v13 = vld [vmem:[#allocation4 + $0xc8] sm:$0xff] }
 0x742   :  { %4715 = vmatprep.subr.bf16.mxu0 %v12089_v43  ;;  %4756 = vmatprep.subr.bf16.mxu1 %v12090_v54  ;;  %v4869_v32 = vld [vmem:[#allocation4 + $0xe8] sm:$0xff]  ;;  %v10838_v43 = vcombine.low %v4856_v52, %v4860_v39  ;;  %v10842_v54 = vcombine.low %v4857_v46, %v4861_v7  ;;  %v4896_v46 = vld [vmem:[#allocation4 + $0x1c0] sm:$0xff] }
 0x743   :  { %v4900_v7 = vld [vmem:[#allocation4 + $0x1e0] sm:$0xff] }
 0x745   :  { %4716 = vmatpush1.bf16.msra.mxu0 %v12091_v23  ;;  %4757 = vmatpush1.bf16.msra.mxu1 %v12092_v6  ;;  %v10844_v23 = vcombine.high %v4864_v1, %v4868_v3  ;;  %v10847_v6 = vcombine.high %v4865_v13, %v4869_v32 }
 0x746   :  { %4717 = vmatprep.subr.bf16.mxu0 %v12093_v31  ;;  %4758 = vmatprep.subr.bf16.mxu1 %v12094_v16  ;;  %v4872_v31 = vld [vmem:[#allocation4 + $0x100] sm:$0xff] }
 0x747   :  { %v4876_v16 = vld [vmem:[#allocation4 + $0x120] sm:$0xff] }
 0x749   :  { %4718 = vmatpush1.bf16.msra.mxu0 %v12095_v42  ;;  %4759 = vmatpush1.bf16.msra.mxu1 %v12096_v40  ;;  %v4873_v42 = vld [vmem:[#allocation4 + $0x108] sm:$0xff] }
 0x74a   :  { %4719 = vmatprep.subr.bf16.mxu0 %v12097_v14  ;;  %4760 = vmatprep.subr.bf16.mxu1 %v12098_v26  ;;  %v4877_v40 = vld [vmem:[#allocation4 + $0x128] sm:$0xff]  ;;  %v10850_v14 = vcombine.low %v4864_v1, %v4868_v3  ;;  %v10854_v26 = vcombine.low %v4865_v13, %v4869_v32  ;;  %v10895_v3 = vcombine.high %v4896_v46, %v4900_v7 }
 0x74b   :  { %v4897_v1 = vld [vmem:[#allocation4 + $0x1c8] sm:$0xff]  ;;  %v10897_v32 = vcombine.low %v4896_v46, %v4900_v7 }
 0x74c   :  { %12111 = vst [vmem:[#allocation54_spill] sm:$0xff] %v10895_v3  ;;  %v4901_v13 = vld [vmem:[#allocation4 + $0x1e8] sm:$0xff] }
 0x74d   :  { %4720 = vmatpush1.bf16.msra.mxu0 %v12099_v19  ;;  %4761 = vmatpush1.bf16.msra.mxu1 %v12100_v5  ;;  %v10856_v19 = vcombine.high %v4872_v31, %v4876_v16  ;;  %v10859_v5 = vcombine.high %v4873_v42, %v4877_v40  ;;  %12112 = vst [vmem:[#allocation55_spill] sm:$0xff] %v10897_v32  ;;  %v4913_v46 = vld [vmem:[#allocation4 + $0x248] sm:$0xff] }
 0x74e   :  { %4721 = vmatprep.subr.bf16.mxu0 %v12101_v33  ;;  %4762 = vmatprep.subr.bf16.mxu1 %v12102_v53  ;;  %v4880_v33 = vld [vmem:[#allocation4 + $0x140] sm:$0xff] }
 0x74f   :  { %v4884_v53 = vld [vmem:[#allocation4 + $0x160] sm:$0xff] }
 0x751   :  { %4722 = vmatpush1.bf16.msra.mxu0 %v12103_v62  ;;  %4763 = vmatpush1.bf16.msra.mxu1 %v12104_v15  ;;  %v4881_v62 = vld [vmem:[#allocation4 + $0x148] sm:$0xff] }
 0x752   :  { %4723 = vmatprep.subr.bf16.mxu0 %v12105_v11  ;;  %4764 = vmatprep.subr.bf16.mxu1 %v12106_v56  ;;  %v4885_v15 = vld [vmem:[#allocation4 + $0x168] sm:$0xff]  ;;  %v10862_v11 = vcombine.low %v4872_v31, %v4876_v16  ;;  %v10866_v56 = vcombine.low %v4873_v42, %v4877_v40  ;;  %v10899_v31 = vcombine.low %v4897_v1, %v4901_v13  ;;  %v4904_v42 = vld [vmem:[#allocation4 + $0x200] sm:$0xff] }
 0x753   :  { %v10901_v16 = vcombine.high %v4897_v1, %v4901_v13  ;;  %v4908_v40 = vld [vmem:[#allocation4 + $0x220] sm:$0xff]  ;;  %v4917_v1 = vld [vmem:[#allocation4 + $0x268] sm:$0xff] }
 0x754   :  { %12113 = vst [vmem:[#allocation56_spill] sm:$0xff] %v10899_v31 }
 0x755   :  { %4724 = vmatpush1.bf16.msra.mxu0 %v10637_v24  ;;  %4765 = vmatpush1.bf16.msra.mxu1 %v10639_v51  ;;  %v4840_v24 = vld [vmem:[#allocation4] sm:$0xff]  ;;  %12114 = vst [vmem:[#allocation57_spill] sm:$0xff] %v10901_v16 }
 0x756   :  { %4725 = vmatprep.subr.bf16.mxu0 %v10643_v41  ;;  %4766 = vmatprep.subr.bf16.mxu1 %v12107_v47  ;;  %v4844_v51 = vld [vmem:[#allocation4 + $0x20] sm:$0xff]  ;;  %v4841_v41 = vld [vmem:[#allocation4 + $0x8] sm:$0xff]  ;;  %v10868_v47 = vcombine.high %v4880_v33, %v4884_v53 }
 0x759   :  { %4726 = vmatpush1.bf16.msra.mxu0 %v12108_v37  ;;  %4767 = vmatpush1.bf16.msra.mxu1 %v10651_v59  ;;  %v10811_v59 = vcombine.low %v4840_v24, %v4844_v51  ;;  %v10871_v37 = vcombine.high %v4881_v62, %v4885_v15 }
 0x75a   :  { %4727 = vmatprep.subr.bf16.mxu0 %v10655_v25  ;;  %4768 = vmatprep.subr.bf16.mxu1 %v10657_v2  ;;  %v10813_v25 = vcombine.high %v4840_v24, %v4844_v51  ;;  %v4845_v2 = vld [vmem:[#allocation4 + $0x28] sm:$0xff]  ;;  %v10874_v24 = vcombine.low %v4880_v33, %v4884_v53  ;;  %v10878_v51 = vcombine.low %v4881_v62, %v4885_v15 }
 0x75b   :  { %v10815_v44 = vcombine.low %v4841_v41, %v4845_v2  ;;  %v4905_v33 = vld [vmem:[#allocation4 + $0x208] sm:$0xff]  ;;  %v10907_v53 = vcombine.high %v4904_v42, %v4908_v40  ;;  %v10909_v15 = vcombine.low %v4904_v42, %v4908_v40  ;;  %v10923_v42 = vcombine.low %v4913_v46, %v4917_v1 }
 0x75c   :  { %v4909_v62 = vld [vmem:[#allocation4 + $0x228] sm:$0xff]  ;;  %v10925_v40 = vcombine.high %v4913_v46, %v4917_v1  ;;  %v4928_v1 = vld [vmem:[#allocation4 + $0x2c0] sm:$0xff] }
 0x75d   :  { %4728 = vmatpush1.bf16.msra.mxu0 %v10661_v55  ;;  %4769 = vmatpush1.bf16.msra.mxu1 %v10663_v8  ;;  %v4848_v55 = vld [vmem:[#allocation4 + $0x40] sm:$0xff]  ;;  %12115 = vst [vmem:[#allocation58_spill] sm:$0xff] %v10907_v53  ;;  %12116 = vst [vmem:[#allocation59_spill] sm:$0xff] %v10909_v15 }
 0x75e   :  { %4729 = vmatprep.subr.bf16.mxu0 %v10667_v18  ;;  %4770 = vmatprep.subr.bf16.mxu1 %v10669_v38  ;;  %v4852_v8 = vld [vmem:[#allocation4 + $0x60] sm:$0xff]  ;;  %v10817_v18 = vcombine.high %v4841_v41, %v4845_v2  ;;  %12121 = vst [vmem:[#allocation39_spill] sm:$0xff] %v10923_v42  ;;  %12122 = vst [vmem:[#allocation41_spill] sm:$0xff] %v10925_v40 }
 0x75f   :  { %v10819_v38 = vcombine.high %v4848_v55, %v4852_v8  ;;  %v4888_v41 = vld [vmem:[#allocation4 + $0x180] sm:$0xff] }
 0x760   :  { %v4892_v2 = vld [vmem:[#allocation4 + $0x1a0] sm:$0xff] }
 0x761   :  { %4730 = vmatpush1.bf16.msra.mxu0 %v10673_v48  ;;  %4771 = vmatpush1.bf16.msra.mxu1 %v10675_v36  ;;  %v4849_v48 = vld [vmem:[#allocation4 + $0x48] sm:$0xff] }
 0x762   :  { %v4853_v36 = vld [vmem:[#allocation4 + $0x68] sm:$0xff]  ;;  %5419 = vmatprep.subr.bf16.mxu0 %v10813_v25  ;;  %5460 = vmatprep.subr.bf16.mxu1 %v10817_v18 }
 0x763   :  { %v10822_v45 = vcombine.high %v4849_v48, %v4853_v36  ;;  %v10830_v4 = vcombine.low %v4849_v48, %v4853_v36  ;;  %v4893_v48 = vld [vmem:[#allocation4 + $0x1a8] sm:$0xff]  ;;  %v10885_v36 = vcombine.low %v4888_v41, %v4892_v2 }
 0x764   :  { %4740 = vmatmul.mubr.bf16.vlgmr.msra.gmra.mrb[52].mxu0 %v4044_v49  ;;  %4781 = vmatmul.mubr.bf16.vlgmr.msra.gmra.mrb[52].mxu1 %v4044_v49  ;;  %v10826_v49 = vcombine.low %v4848_v55, %v4852_v8  ;;  %v4889_v55 = vld [vmem:[#allocation4 + $0x188] sm:$0xff]  ;;  %v10883_v8 = vcombine.high %v4888_v41, %v4892_v2  ;;  %v10911_v41 = vcombine.low %v4905_v33, %v4909_v62 }
 0x765   :  { %5420 = vmatpush1.bf16.msra.mxu0 %v10811_v59  ;;  %5461 = vmatpush1.bf16.msra.mxu1 %v10815_v44  ;;  %12109 = vst [vmem:[#allocation52_spill] sm:$0xff] %v10885_v36  ;;  %v10887_v52 = vcombine.low %v4889_v55, %v4893_v48  ;;  %v10889_v39 = vcombine.high %v4889_v55, %v4893_v48  ;;  %v4912_v55 = vld [vmem:[#allocation4 + $0x240] sm:$0xff] }
 0x766   :  { %5421 = vmatprep.subr.bf16.mxu0 %v10819_v38  ;;  %5462 = vmatprep.subr.bf16.mxu1 %v10822_v45  ;;  %12117 = vst [vmem:[#allocation63_spill] sm:$0xff] %v10911_v41  ;;  %v10913_v2 = vcombine.high %v4905_v33, %v4909_v62  ;;  %v4916_v48 = vld [vmem:[#allocation4 + $0x260] sm:$0xff] }
 0x767   :  { %12110 = vst [vmem:[#allocation53_spill] sm:$0xff] %v10887_v52  ;;  %v10919_v7 = vcombine.high %v4912_v55, %v4916_v48  ;;  %v10921_v13 = vcombine.low %v4912_v55, %v4916_v48  ;;  %v4920_v33 = vld [vmem:[#allocation4 + $0x280] sm:$0xff] }
 0x768   :  { %12118 = vst [vmem:[#allocation75_spill] sm:$0xff] %v10913_v2  ;;  %v4924_v62 = vld [vmem:[#allocation4 + $0x2a0] sm:$0xff] }
 0x769   :  { %5422 = vmatpush1.bf16.msra.mxu0 %v10826_v49  ;;  %5463 = vmatpush1.bf16.msra.mxu1 %v10830_v4  ;;  %12119 = vst [vmem:[#allocation72_spill] sm:$0xff] %v10919_v7  ;;  %12120 = vst [vmem:[#allocation73_spill] sm:$0xff] %v10921_v13  ;;  %v10933_v55 = vcombine.low %v4920_v33, %v4924_v62 }
 0x76a   :  { %5423 = vmatprep.subr.bf16.mxu0 %v10832_v21  ;;  %5464 = vmatprep.subr.bf16.mxu1 %v10835_v12 }
 0x76b   :  { %12124 = vst [vmem:[#allocation40_spill] sm:$0xff] %v10933_v55 }
 0x76d   :  { %5424 = vmatpush1.bf16.msra.mxu0 %v10838_v43  ;;  %5465 = vmatpush1.bf16.msra.mxu1 %v10842_v54 }
 0x76e   :  { %5425 = vmatprep.subr.bf16.mxu0 %v10844_v23  ;;  %5466 = vmatprep.subr.bf16.mxu1 %v10847_v6 }
 0x771   :  { %5426 = vmatpush1.bf16.msra.mxu0 %v10850_v14  ;;  %5467 = vmatpush1.bf16.msra.mxu1 %v10854_v26 }
 0x772   :  { %5427 = vmatprep.subr.bf16.mxu0 %v10856_v19  ;;  %5468 = vmatprep.subr.bf16.mxu1 %v10859_v5 }
 0x775   :  { %5428 = vmatpush1.bf16.msra.mxu0 %v10862_v11  ;;  %5469 = vmatpush1.bf16.msra.mxu1 %v10866_v56 }
 0x776   :  { %5429 = vmatprep.subr.bf16.mxu0 %v10868_v47  ;;  %5470 = vmatprep.subr.bf16.mxu1 %v10871_v37 }
 0x779   :  { %5430 = vmatpush1.bf16.msra.mxu0 %v10874_v24  ;;  %5471 = vmatpush1.bf16.msra.mxu1 %v10878_v51 }
 0x77a   :  { %5431 = vmatprep.subr.bf16.mxu0 %v10883_v8  ;;  %5472 = vmatprep.subr.bf16.mxu1 %v10889_v39 }
 0x77d   :  { %5432 = vmatpush1.bf16.msra.mxu0 %v10885_v36  ;;  %5473 = vmatpush1.bf16.msra.mxu1 %v10887_v52 }
 0x77e   :  { %5433 = vmatprep.subr.bf16.mxu0 %v10895_v3  ;;  %5474 = vmatprep.subr.bf16.mxu1 %v10901_v16  ;;  %v140_v16 = vpop.permute.xlu0 %139 }
 0x77f   :  { %v238_v36 = vmul.f32 %v11863_v28, %v140_v16 }
 0x781   :  { %5434 = vmatpush1.bf16.msra.mxu0 %v10897_v32  ;;  %5475 = vmatpush1.bf16.msra.mxu1 %v10899_v31 }
 0x782   :  { %5435 = vmatprep.subr.bf16.mxu0 %v10907_v53  ;;  %5476 = vmatprep.subr.bf16.mxu1 %v10913_v2  ;;  %v4925_v2 = vld [vmem:[#allocation4 + $0x2a8] sm:$0xff] }
 0x783   :  { %v4929_v53 = vld [vmem:[#allocation4 + $0x2c8] sm:$0xff] }
 0x785   :  { %5436 = vmatpush1.bf16.msra.mxu0 %v10909_v15  ;;  %5477 = vmatpush1.bf16.msra.mxu1 %v10911_v41  ;;  %v4921_v15 = vld [vmem:[#allocation4 + $0x288] sm:$0xff]  ;;  %v10931_v41 = vcombine.high %v4920_v33, %v4924_v62  ;;  %v4846_v62 = vld [vmem:[#allocation4 + $0x30] sm:$0xff] }
 0x786   :  { %5437 = vmatprep.subr.bf16.mxu0 %v10919_v7  ;;  %5478 = vmatprep.subr.bf16.mxu1 %v10925_v40  ;;  %v10935_v48 = vcombine.low %v4921_v15, %v4925_v2  ;;  %v10937_v46 = vcombine.high %v4921_v15, %v4925_v2  ;;  %v4932_v7 = vld [vmem:[#allocation4 + $0x2e0] sm:$0xff]  ;;  %v4933_v40 = vld [vmem:[#allocation4 + $0x2e8] sm:$0xff]  ;;  %v4842_v2 = vld [vmem:[#allocation4 + $0x10] sm:$0xff] }
 0x787   :  { %12123 = vst [vmem:[#allocation42_spill] sm:$0xff] %v10931_v41  ;;  %v10946_v33 = vcombine.high %v4929_v53, %v4933_v40  ;;  %v10950_v15 = vcombine.low %v4929_v53, %v4933_v40 }
 0x788   :  { %12125 = vst [vmem:[#allocation43_spill] sm:$0xff] %v10935_v48  ;;  %12126 = vst [vmem:[#allocation61_spill] sm:$0xff] %v10937_v46 }
 0x789   :  { %5438 = vmatpush1.bf16.msra.mxu0 %v10921_v13  ;;  %5479 = vmatpush1.bf16.msra.mxu1 %v10923_v42  ;;  %v10940_v13 = vcombine.high %v4928_v1, %v4932_v7  ;;  %v10944_v42 = vcombine.low %v4928_v1, %v4932_v7  ;;  %12129 = vst [vmem:[#allocation64_spill] sm:$0xff] %v10946_v33  ;;  %12130 = vst [vmem:[#allocation66_spill] sm:$0xff] %v10950_v15  ;;  %v4847_v7 = vld [vmem:[#allocation4 + $0x38] sm:$0xff] }
 0x78a   :  { %5439 = vmatprep.subr.bf16.mxu0 %v10931_v41  ;;  %5480 = vmatprep.subr.bf16.mxu1 %v10937_v46  ;;  %v4843_v41 = vld [vmem:[#allocation4 + $0x18] sm:$0xff]  ;;  %v10957_v1 = vcombine.low %v4842_v2, %v4846_v62 }
 0x78b   :  { %12127 = vst [vmem:[#allocation62_spill] sm:$0xff] %v10940_v13  ;;  %12128 = vst [vmem:[#allocation60_spill] sm:$0xff] %v10944_v42  ;;  %v10959_v46 = vcombine.low %v4843_v41, %v4847_v7 }
 0x78d   :  { %5440 = vmatpush1.bf16.msra.mxu0 %v10933_v55  ;;  %5481 = vmatpush1.bf16.msra.mxu1 %v10935_v48  ;;  %v10955_v55 = vcombine.high %v4842_v2, %v4846_v62  ;;  %v10961_v48 = vcombine.high %v4843_v41, %v4847_v7  ;;  %v236_v2 = vmul.f32 %v12074_v50, %v140_v16 }
 0x78e   :  { %5441 = vmatprep.subr.bf16.mxu0 %v10940_v13  ;;  %5482 = vmatprep.subr.bf16.mxu1 %v10946_v33  ;;  %v237_v62 = vmul.f32 %v12075_v9, %v140_v16 }
 0x78f   :  { %12131 = vst [vmem:[#allocation67_spill] sm:$0xff] %v10955_v55  ;;  %12132 = vst [vmem:[#allocation65_spill] sm:$0xff] %v10961_v48  ;;  %v342_v41 = vadd.f32 %v12076_v63, %v236_v2 }
 0x790   :  { %v343_v7 = vadd.f32 %v11961_v61, %v237_v62 }
 0x791   :  { %5442 = vmatpush1.bf16.msra.mxu0 %v10944_v42  ;;  %5483 = vmatpush1.bf16.msra.mxu1 %v10950_v15 }
 0x792   :  { %5501 = vmatprep.subr.bf16.mxu0 %v10955_v55  ;;  %5542 = vmatprep.subr.bf16.mxu1 %v10961_v48 }
 0x807   :  { %v4659_v53 = vpop.f32.mrb[48].mxu0  ;;  %v4700_v40 = vpop.f32.mrb[48].mxu1 }
 0x808   :  { %v4661_v42 = vpop.f32.mrb[49].mxu0  ;;  %v4702_v33 = vpop.f32.mrb[49].mxu1  ;;  %v4660_v55 = vadd.f32 %v4659_v53, %v342_v41 }
 0x809   :  { %v4663_v13 = vpop.f32.mrb[50].mxu0  ;;  %v4704_v31 = vpop.f32.mrb[50].mxu1  ;;  %v4662_v3 = vadd.f32 %v4661_v42, %v343_v7 }
 0x80a   :  { %v4664_v15 = vpop.f32.mrb[51].mxu0  ;;  %v4705_v32 = vpop.f32.mrb[51].mxu1  ;;  %v8314_v48 = vmul.f32 -1.442695, %v4660_v55  ;;  %v239_v31 = vmul.f32 %v11962_v10, %v140_v16  ;;  %v243_v55 = vmul.f32 %v12079_v60, %v140_v16 }
 0x80b   :  { %v8315_v52 = vmul.f32 -1.442695, %v4662_v3  ;;  %v344_v32 = vadd.f32 %v11963_v0, %v238_v36  ;;  %v241_v3 = vmul.f32 %v12077_v20, %v140_v16  ;;  %v242_v36 = vmul.f32 %v12078_v30, %v140_v16 }
 0x80c   :  { %8939 = vpow2.f32 %v8314_v48  ;;  %v345_v13 = vadd.f32 %v11964_v17, %v239_v31 }
 0x80d   :  { %8941 = vpow2.f32 %v8315_v52  ;;  %v4701_v15 = vadd.f32 %v4700_v40, %v344_v32  ;;  %v240_v52 = vmul.f32 %v11965_v27, %v140_v16  ;;  %v348_v7 = vadd.f32 %v9675_v58, %v242_v36 }
 0x80e   :  { %v4703_v9 = vadd.f32 %v4702_v33, %v345_v13 }
 0x80f   :  { %v8316_v63 = vmul.f32 -1.442695, %v4701_v15  ;;  %v346_v48 = vadd.f32 %v12080_v35, %v240_v52 }
 0x810   :  { %v8317_v62 = vmul.f32 -1.442695, %v4703_v9 }
 0x811   :  { %8943 = vpow2.f32 %v8316_v63 }
 0x812   :  { %8945 = vpow2.f32 %v8317_v62 }
 0x816   :  { %v8940_v50 = vpop.eup %8939 }
 0x817   :  { %v8942_v2 = vpop.eup %8941  ;;  %v4801_v53 = vadd.f32 1.0, %v8940_v50  ;;  %v347_v50 = vadd.f32 %v12081_v57, %v241_v3 }
 0x818   :  { %v4802_v42 = vadd.f32 1.0, %v8942_v2  ;;  %v349_v2 = vadd.f32 %v10070_v29, %v243_v55 }
 0x819   :  { %8947 = vrcp.f32 %v4801_v53 }
 0x81a   :  { %8949 = vrcp.f32 %v4802_v42 }
 0x81b   :  { %v8944_v33 = vpop.eup %8943 }
 0x81c   :  { %v8946_v9 = vpop.eup %8945  ;;  %v4803_v3 = vadd.f32 1.0, %v8944_v33 }
 0x823   :  { %v8948_v13 = vpop.eup %8947 }
 0x824   :  { %v8950_v16 = vpop.eup %8949 }
 0x837   :  { %v4741_v40 = vpop.f32.mrb[52].mxu0  ;;  %v4782_v41 = vpop.f32.mrb[52].mxu1 }
 0x838   :  { %v4742_v63 = vadd.f32 %v4741_v40, %v346_v48  ;;  %v4743_v31 = vpop.f32.mrb[53].mxu0  ;;  %v4784_v32 = vpop.f32.mrb[53].mxu1  ;;  %v4783_v52 = vadd.f32 %v4782_v41, %v348_v7  ;;  %v4804_v48 = vadd.f32 1.0, %v8946_v9  ;;  %v4850_v9 = vld [vmem:[#allocation4 + $0x50] sm:$0xff] }
 0x839   :  { %v4744_v15 = vadd.f32 %v4743_v31, %v347_v50  ;;  %v4745_v62 = vpop.f32.mrb[54].mxu0  ;;  %v4786_v53 = vpop.f32.mrb[54].mxu1  ;;  %v4785_v20 = vadd.f32 %v4784_v32, %v349_v2  ;;  %v4858_v32 = vld [vmem:[#allocation4 + $0x90] sm:$0xff] }
 0x83a   :  { %v4813_v42 = vmul.f32 %v8948_v13, %v4742_v63  ;;  %v4746_v35 = vpop.f32.mrb[55].mxu0  ;;  %v4787_v60 = vpop.f32.mrb[55].mxu1  ;;  %v4862_v2 = vld [vmem:[#allocation4 + $0xb0] sm:$0xff]  ;;  %v4859_v62 = vld [vmem:[#allocation4 + $0x98] sm:$0xff] }
 0x83b   :  { %v4814_v30 = vmul.f32 %v8950_v16, %v4744_v15  ;;  %v4863_v53 = vld [vmem:[#allocation4 + $0xb8] sm:$0xff] }
 0x83c   :  { %v4815_v57 = vadd.f32 %v4813_v42, %v4783_v52  ;;  %v11011_v52 = vcombine.high %v4858_v32, %v4862_v2 }
 0x83d   :  { %v4816_v40 = vadd.f32 %v4814_v30, %v4785_v20  ;;  %v4854_v20 = vld [vmem:[#allocation4 + $0x70] sm:$0xff]  ;;  %v4851_v30 = vld [vmem:[#allocation4 + $0x58] sm:$0xff] }
 0x83e   :  { %8951 = vtanh.f32 %v4815_v57  ;;  %v4855_v57 = vld [vmem:[#allocation4 + $0x78] sm:$0xff]  ;;  %v10997_v13 = vcombine.high %v4850_v9, %v4854_v20  ;;  %v11005_v16 = vcombine.low %v4850_v9, %v4854_v20 }
 0x83f   :  { %8953 = vtanh.f32 %v4816_v40  ;;  %v10999_v15 = vcombine.high %v4851_v30, %v4855_v57  ;;  %v11007_v42 = vcombine.low %v4851_v30, %v4855_v57  ;;  %v4870_v40 = vld [vmem:[#allocation4 + $0xf0] sm:$0xff]  ;;  %v4875_v9 = vld [vmem:[#allocation4 + $0x118] sm:$0xff] }
 0x840   :  { %8955 = vrcp.f32 %v4803_v3  ;;  %v11013_v3 = vcombine.high %v4859_v62, %v4863_v53  ;;  %v4879_v20 = vld [vmem:[#allocation4 + $0x138] sm:$0xff] }
 0x841   :  { %8957 = vrcp.f32 %v4804_v48  ;;  %v4866_v48 = vld [vmem:[#allocation4 + $0xd0] sm:$0xff] }
 0x842   :  { %12133 = vst [vmem:[#allocation68_spill] sm:$0xff] %v11013_v3  ;;  %v11031_v30 = vcombine.low %v4866_v48, %v4870_v40 }
 0x844   :  { %12138 = vst [vmem:[#allocation18_spill] sm:$0xff] %v11031_v30 }
 0x848   :  { %v8952_v36 = vpop.eup %8951 }
 0x849   :  { %v8954_v50 = vpop.eup %8953  ;;  %v4819_v55 = vsub.f32 %v10751_v34, %v8952_v36 }
 0x84a   :  { %v8956_v31 = vpop.eup %8955  ;;  %v4820_v63 = vsub.f32 %v10753_v22, %v8954_v50 }
 0x84b   :  { %v8958_v41 = vpop.eup %8957  ;;  %v4821_v35 = vmul.f32 %v8956_v31, %v4819_v55  ;;  %v11019_v55 = vcombine.low %v4858_v32, %v4862_v2  ;;  %v11021_v31 = vcombine.low %v4859_v62, %v4863_v53  ;;  %v11039_v32 = vcombine.high %v4875_v9, %v4879_v20  ;;  %v4882_v2 = vld [vmem:[#allocation4 + $0x150] sm:$0xff]  ;;  %v4883_v53 = vld [vmem:[#allocation4 + $0x158] sm:$0xff] }
 0x84c   :  { %v4822_v60 = vmul.f32 %v8958_v41, %v4820_v63  ;;  %v11025_v63 = vcombine.high %v4866_v48, %v4870_v40  ;;  %v4886_v62 = vld [vmem:[#allocation4 + $0x170] sm:$0xff]  ;;  %v11045_v40 = vcombine.low %v4875_v9, %v4879_v20 }
 0x84d   :  { %v10983_v7 = vadd.f32 %v8952_v36, %v4821_v35  ;;  %v4867_v36 = vld [vmem:[#allocation4 + $0xd8] sm:$0xff]  ;;  %12134 = vst [vmem:[#allocation69_spill] sm:$0xff] %v11019_v55  ;;  %12135 = vst [vmem:[#allocation70_spill] sm:$0xff] %v11021_v31  ;;  %v4874_v35 = vld [vmem:[#allocation4 + $0x110] sm:$0xff] }
 0x84e   :  { %v10985_v33 = vadd.f32 %v8954_v50, %v4822_v60  ;;  %v4871_v50 = vld [vmem:[#allocation4 + $0xf8] sm:$0xff]  ;;  %12136 = vst [vmem:[#allocation71_spill] sm:$0xff] %v11025_v63  ;;  %v4878_v60 = vld [vmem:[#allocation4 + $0x130] sm:$0xff]  ;;  %12141 = vst [vmem:[#allocation78_spill] sm:$0xff] %v11039_v32 }
 0x84f   :  { %v10993_v22 = vpack.c.bf16 %v10983_v7, %v10983_v7  ;;  %v11027_v41 = vcombine.high %v4867_v36, %v4871_v50  ;;  %v11033_v57 = vcombine.low %v4867_v36, %v4871_v50  ;;  %v11043_v48 = vcombine.low %v4874_v35, %v4878_v60  ;;  %12143 = vst [vmem:[#allocation79_spill] sm:$0xff] %v11045_v40 }
 0x850   :  { %4826 = vst.msk [vmem:[#allocation3 + $0x20] sm:$0xff] %vm1009_vm2, %v10985_v33  ;;  %v4839_v34 = vpack.c.bf16 %v10985_v33, %v10985_v33  ;;  %v11049_v36 = vcombine.high %v4882_v2, %v4886_v62 }
 0x851   :  { %12137 = vst [vmem:[#allocation17_spill] sm:$0xff] %v11027_v41  ;;  %12139 = vst [vmem:[#allocation20_spill] sm:$0xff] %v11033_v57 }
 0x852   :  { %8414 = vmatprep.mubr.msk.bf16.mxu0 %vm1009_vm2, %v4839_v34  ;;  %8415 = vmatprep.mubr.msk.bf16.mxu1 %vm1009_vm2, %v4839_v34  ;;  %12142 = vst [vmem:[#allocation22_spill] sm:$0xff] %v11043_v48  ;;  %12144 = vst [vmem:[#allocation26_spill] sm:$0xff] %v11049_v36 }
 0x853   :  { %5452 = vmatmul.mubr.bf16.vlgmr.msra.gmra.mrb[56].mxu0 %v10993_v22  ;;  %5493 = vmatmul.mubr.bf16.vlgmr.msra.gmra.mrb[56].mxu1 %v10993_v22 }
 0x854   :  { %5502 = vmatpush1.bf16.msra.mxu0 %v10957_v1  ;;  %5543 = vmatpush1.bf16.msra.mxu1 %v10959_v46 }
 0x855   :  { %8416 = vmatprep.mubr.msk.bf16.mxu0 %vm1009_vm2, %v4839_v34  ;;  %8417 = vmatprep.mubr.msk.bf16.mxu1 %vm1009_vm2, %v4839_v34  ;;  %v11037_v34 = vcombine.high %v4874_v35, %v4878_v60  ;;  %v11055_v35 = vcombine.low %v4882_v2, %v4886_v62 }
 0x856   :  { %5503 = vmatprep.subr.bf16.mxu0 %v10997_v13  ;;  %5544 = vmatprep.subr.bf16.mxu1 %v10999_v15 }
 0x857   :  { %12140 = vst [vmem:[#allocation21_spill] sm:$0xff] %v11037_v34  ;;  %12146 = vst [vmem:[#allocation28_spill] sm:$0xff] %v11055_v35 }
 0x858   :  { %5504 = vmatpush1.bf16.msra.mxu0 %v11005_v16  ;;  %5545 = vmatpush1.bf16.msra.mxu1 %v11007_v42 }
 0x859   :  { %5505 = vmatprep.subr.bf16.mxu0 %v11011_v52  ;;  %5546 = vmatprep.subr.bf16.mxu1 %v11013_v3  ;;  %v4887_v3 = vld [vmem:[#allocation4 + $0x178] sm:$0xff] }
 0x85a   :  { %v11051_v50 = vcombine.high %v4883_v53, %v4887_v3  ;;  %v11057_v60 = vcombine.low %v4883_v53, %v4887_v3 }
 0x85c   :  { %5506 = vmatpush1.bf16.msra.mxu0 %v11019_v55  ;;  %5547 = vmatpush1.bf16.msra.mxu1 %v11021_v31  ;;  %12145 = vst [vmem:[#allocation27_spill] sm:$0xff] %v11051_v50  ;;  %v4891_v31 = vld [vmem:[#allocation4 + $0x198] sm:$0xff]  ;;  %12147 = vst [vmem:[#allocation29_spill] sm:$0xff] %v11057_v60 }
 0x85d   :  { %5507 = vmatprep.subr.bf16.mxu0 %v11025_v63  ;;  %5548 = vmatprep.subr.bf16.mxu1 %v11027_v41  ;;  %v4890_v41 = vld [vmem:[#allocation4 + $0x190] sm:$0xff]  ;;  %v4895_v55 = vld [vmem:[#allocation4 + $0x1b8] sm:$0xff] }
 0x85e   :  { %v4894_v63 = vld [vmem:[#allocation4 + $0x1b0] sm:$0xff]  ;;  %v11063_v20 = vcombine.high %v4891_v31, %v4895_v55  ;;  %v11069_v3 = vcombine.low %v4891_v31, %v4895_v55 }
 0x85f   :  { %v11061_v9 = vcombine.high %v4890_v41, %v4894_v63  ;;  %v11067_v2 = vcombine.low %v4890_v41, %v4894_v63 }
 0x860   :  { %5508 = vmatpush1.bf16.msra.mxu0 %v11031_v30  ;;  %5549 = vmatpush1.bf16.msra.mxu1 %v11033_v57  ;;  %12149 = vst [vmem:[#allocation31_spill] sm:$0xff] %v11063_v20  ;;  %v4899_v57 = vld [vmem:[#allocation4 + $0x1d8] sm:$0xff]  ;;  %12151 = vst [vmem:[#allocation33_spill] sm:$0xff] %v11069_v3 }
 0x861   :  { %5509 = vmatprep.subr.bf16.mxu0 %v11037_v34  ;;  %5550 = vmatprep.subr.bf16.mxu1 %v11039_v32  ;;  %12148 = vst [vmem:[#allocation30_spill] sm:$0xff] %v11061_v9  ;;  %v4898_v32 = vld [vmem:[#allocation4 + $0x1d0] sm:$0xff]  ;;  %v4903_v30 = vld [vmem:[#allocation4 + $0x1f8] sm:$0xff]  ;;  %12150 = vst [vmem:[#allocation32_spill] sm:$0xff] %v11067_v2 }
 0x862   :  { %v4902_v34 = vld [vmem:[#allocation4 + $0x1f0] sm:$0xff]  ;;  %v11075_v53 = vcombine.high %v4899_v57, %v4903_v30  ;;  %v11081_v55 = vcombine.low %v4899_v57, %v4903_v30 }
 0x863   :  { %v11073_v62 = vcombine.high %v4898_v32, %v4902_v34  ;;  %v11079_v63 = vcombine.low %v4898_v32, %v4902_v34 }
 0x864   :  { %5510 = vmatpush1.bf16.msra.mxu0 %v11043_v48  ;;  %5551 = vmatpush1.bf16.msra.mxu1 %v11045_v40  ;;  %12153 = vst [vmem:[#allocation35_spill] sm:$0xff] %v11075_v53  ;;  %v4907_v40 = vld [vmem:[#allocation4 + $0x218] sm:$0xff]  ;;  %12155 = vst [vmem:[#allocation37_spill] sm:$0xff] %v11081_v55 }
 0x865   :  { %5511 = vmatprep.subr.bf16.mxu0 %v11049_v36  ;;  %5552 = vmatprep.subr.bf16.mxu1 %v11051_v50  ;;  %12152 = vst [vmem:[#allocation34_spill] sm:$0xff] %v11073_v62  ;;  %v4906_v50 = vld [vmem:[#allocation4 + $0x210] sm:$0xff]  ;;  %v4911_v48 = vld [vmem:[#allocation4 + $0x238] sm:$0xff]  ;;  %12154 = vst [vmem:[#allocation36_spill] sm:$0xff] %v11079_v63 }
 0x866   :  { %v4910_v36 = vld [vmem:[#allocation4 + $0x230] sm:$0xff]  ;;  %v11087_v41 = vcombine.high %v4907_v40, %v4911_v48  ;;  %v11093_v30 = vcombine.low %v4907_v40, %v4911_v48 }
 0x867   :  { %v11085_v31 = vcombine.high %v4906_v50, %v4910_v36  ;;  %v11091_v34 = vcombine.low %v4906_v50, %v4910_v36 }
 0x868   :  { %5512 = vmatpush1.bf16.msra.mxu0 %v11055_v35  ;;  %5553 = vmatpush1.bf16.msra.mxu1 %v11057_v60  ;;  %12157 = vst [vmem:[#allocation77_spill] sm:$0xff] %v11087_v41  ;;  %v4915_v60 = vld [vmem:[#allocation4 + $0x258] sm:$0xff] }
 0x869   :  { %5513 = vmatprep.subr.bf16.mxu0 %v11061_v9  ;;  %5554 = vmatprep.subr.bf16.mxu1 %v11063_v20  ;;  %12156 = vst [vmem:[#allocation38_spill] sm:$0xff] %v11085_v31  ;;  %v4914_v20 = vld [vmem:[#allocation4 + $0x250] sm:$0xff]  ;;  %v4919_v35 = vld [vmem:[#allocation4 + $0x278] sm:$0xff] }
 0x86a   :  { %v4918_v9 = vld [vmem:[#allocation4 + $0x270] sm:$0xff]  ;;  %v11099_v32 = vcombine.high %v4915_v60, %v4919_v35  ;;  %v11105_v48 = vcombine.low %v4915_v60, %v4919_v35 }
 0x86b   :  { %v11097_v57 = vcombine.high %v4914_v20, %v4918_v9  ;;  %v11103_v36 = vcombine.low %v4914_v20, %v4918_v9 }
 0x86c   :  { %5514 = vmatpush1.bf16.msra.mxu0 %v11067_v2  ;;  %5555 = vmatpush1.bf16.msra.mxu1 %v11069_v3  ;;  %12158 = vst [vmem:[#allocation44_spill] sm:$0xff] %v11099_v32  ;;  %v4923_v3 = vld [vmem:[#allocation4 + $0x298] sm:$0xff] }
 0x86d   :  { %5515 = vmatprep.subr.bf16.mxu0 %v11073_v62  ;;  %5556 = vmatprep.subr.bf16.mxu1 %v11075_v53  ;;  %v4922_v53 = vld [vmem:[#allocation4 + $0x290] sm:$0xff]  ;;  %v4927_v2 = vld [vmem:[#allocation4 + $0x2b8] sm:$0xff]  ;;  %12159 = vst [vmem:[#allocation45_spill] sm:$0xff] %v11103_v36 }
 0x86e   :  { %v4926_v62 = vld [vmem:[#allocation4 + $0x2b0] sm:$0xff]  ;;  %v11111_v50 = vcombine.high %v4923_v3, %v4927_v2  ;;  %v11117_v35 = vcombine.low %v4923_v3, %v4927_v2 }
 0x86f   :  { %v11109_v40 = vcombine.high %v4922_v53, %v4926_v62  ;;  %v11115_v9 = vcombine.low %v4922_v53, %v4926_v62 }
 0x870   :  { %5516 = vmatpush1.bf16.msra.mxu0 %v11079_v63  ;;  %5557 = vmatpush1.bf16.msra.mxu1 %v11081_v55  ;;  %v4931_v55 = vld [vmem:[#allocation4 + $0x2d8] sm:$0xff] }
 0x871   :  { %5517 = vmatprep.subr.bf16.mxu0 %v11085_v31  ;;  %5558 = vmatprep.subr.bf16.mxu1 %v11087_v41  ;;  %v4930_v41 = vld [vmem:[#allocation4 + $0x2d0] sm:$0xff]  ;;  %v4935_v63 = vld [vmem:[#allocation4 + $0x2f8] sm:$0xff] }
 0x872   :  { %v4934_v31 = vld [vmem:[#allocation4 + $0x2f0] sm:$0xff]  ;;  %v11123_v20 = vcombine.high %v4931_v55, %v4935_v63 }
 0x873   :  { %v11121_v60 = vcombine.high %v4930_v41, %v4934_v31 }
 0x874   :  { %5518 = vmatpush1.bf16.msra.mxu0 %v11091_v34  ;;  %5559 = vmatpush1.bf16.msra.mxu1 %v11093_v30 }
 0x875   :  { %5519 = vmatprep.subr.bf16.mxu0 %v11097_v57  ;;  %5560 = vmatprep.subr.bf16.mxu1 %v11099_v32  ;;  %v11127_v32 = vcombine.low %v4930_v41, %v4934_v31  ;;  %v12184_v31 = vld [vmem:[#allocation74_spill] sm:$0xff] }
 0x878   :  { %5520 = vmatpush1.bf16.msra.mxu0 %v11103_v36  ;;  %5561 = vmatpush1.bf16.msra.mxu1 %v11105_v48  ;;  %v11129_v36 = vcombine.low %v4931_v55, %v4935_v63  ;;  %v145_v55 = vpop.permute.xlu1 %144 }
 0x879   :  { %5521 = vmatprep.subr.bf16.mxu0 %v11109_v40  ;;  %5562 = vmatprep.subr.bf16.mxu1 %v11111_v50  ;;  %v244_v41 = vmul.f32 %v12184_v31, %v145_v55 }
 0x87c   :  { %5522 = vmatpush1.bf16.msra.mxu0 %v11115_v9  ;;  %5563 = vmatpush1.bf16.msra.mxu1 %v11117_v35 }
 0x87d   :  { %5523 = vmatprep.subr.bf16.mxu0 %v11121_v60  ;;  %5564 = vmatprep.subr.bf16.mxu1 %v11123_v20 }
 0x880   :  { %5524 = vmatpush1.bf16.msra.mxu0 %v11127_v32  ;;  %5565 = vmatpush1.bf16.msra.mxu1 %v11129_v36 }
 0x881   :  { %6210 = vmatprep.subr.bf16.mxu0 %v10813_v25  ;;  %6251 = vmatprep.subr.bf16.mxu1 %v10817_v18  ;;  %v12161_v25 = vld [vmem:[#allocation53_spill] sm:$0xff] }
 0x882   :  { %v12163_v18 = vld [vmem:[#allocation57_spill] sm:$0xff] }
 0x883   :  { %5534 = vmatmul.mubr.bf16.vlgmr.msra.gmra.mrb[60].mxu0 %v10993_v22  ;;  %5575 = vmatmul.mubr.bf16.vlgmr.msra.gmra.mrb[60].mxu1 %v10993_v22 }
 0x884   :  { %6211 = vmatpush1.bf16.msra.mxu0 %v10811_v59  ;;  %6252 = vmatpush1.bf16.msra.mxu1 %v10815_v44  ;;  %v12160_v59 = vld [vmem:[#allocation52_spill] sm:$0xff]  ;;  %v12162_v44 = vld [vmem:[#allocation54_spill] sm:$0xff] }
 0x885   :  { %6212 = vmatprep.subr.bf16.mxu0 %v10819_v38  ;;  %6253 = vmatprep.subr.bf16.mxu1 %v10822_v45  ;;  %v12164_v38 = vld [vmem:[#allocation55_spill] sm:$0xff]  ;;  %v12165_v45 = vld [vmem:[#allocation56_spill] sm:$0xff] }
 0x888   :  { %6213 = vmatpush1.bf16.msra.mxu0 %v10826_v49  ;;  %6254 = vmatpush1.bf16.msra.mxu1 %v10830_v4  ;;  %v12166_v49 = vld [vmem:[#allocation58_spill] sm:$0xff]  ;;  %v12167_v4 = vld [vmem:[#allocation75_spill] sm:$0xff] }
 0x889   :  { %6214 = vmatprep.subr.bf16.mxu0 %v10832_v21  ;;  %6255 = vmatprep.subr.bf16.mxu1 %v10835_v12  ;;  %v12168_v21 = vld [vmem:[#allocation59_spill] sm:$0xff] }
 0x88a   :  { %v12169_v12 = vld [vmem:[#allocation63_spill] sm:$0xff] }
 0x88c   :  { %6215 = vmatpush1.bf16.msra.mxu0 %v10838_v43  ;;  %6256 = vmatpush1.bf16.msra.mxu1 %v10842_v54  ;;  %v12170_v43 = vld [vmem:[#allocation72_spill] sm:$0xff]  ;;  %v12171_v54 = vld [vmem:[#allocation41_spill] sm:$0xff] }
 0x88d   :  { %6216 = vmatprep.subr.bf16.mxu0 %v10844_v23  ;;  %6257 = vmatprep.subr.bf16.mxu1 %v10847_v6  ;;  %v12172_v23 = vld [vmem:[#allocation73_spill] sm:$0xff]  ;;  %v12173_v6 = vld [vmem:[#allocation39_spill] sm:$0xff] }
 0x890   :  { %6217 = vmatpush1.bf16.msra.mxu0 %v10850_v14  ;;  %6258 = vmatpush1.bf16.msra.mxu1 %v10854_v26  ;;  %v12174_v14 = vld [vmem:[#allocation42_spill] sm:$0xff]  ;;  %v12175_v26 = vld [vmem:[#allocation61_spill] sm:$0xff] }
 0x891   :  { %6218 = vmatprep.subr.bf16.mxu0 %v10856_v19  ;;  %6259 = vmatprep.subr.bf16.mxu1 %v10859_v5  ;;  %v12176_v19 = vld [vmem:[#allocation40_spill] sm:$0xff]  ;;  %v12177_v5 = vld [vmem:[#allocation43_spill] sm:$0xff] }
 0x894   :  { %6219 = vmatpush1.bf16.msra.mxu0 %v10862_v11  ;;  %6260 = vmatpush1.bf16.msra.mxu1 %v10866_v56  ;;  %v12178_v11 = vld [vmem:[#allocation62_spill] sm:$0xff]  ;;  %v12179_v56 = vld [vmem:[#allocation64_spill] sm:$0xff] }
 0x895   :  { %6220 = vmatprep.subr.bf16.mxu0 %v10868_v47  ;;  %6261 = vmatprep.subr.bf16.mxu1 %v10871_v37  ;;  %v12180_v47 = vld [vmem:[#allocation60_spill] sm:$0xff]  ;;  %v12181_v37 = vld [vmem:[#allocation66_spill] sm:$0xff] }
 0x898   :  { %6221 = vmatpush1.bf16.msra.mxu0 %v10874_v24  ;;  %6262 = vmatpush1.bf16.msra.mxu1 %v10878_v51  ;;  %v12182_v24 = vld [vmem:[#allocation67_spill] sm:$0xff]  ;;  %v12183_v51 = vld [vmem:[#allocation65_spill] sm:$0xff] }
 0x899   :  { %6222 = vmatprep.subr.bf16.mxu0 %v10883_v8  ;;  %6263 = vmatprep.subr.bf16.mxu1 %v10889_v39 }
 0x89c   :  { %6223 = vmatpush1.bf16.msra.mxu0 %v12160_v59  ;;  %6264 = vmatpush1.bf16.msra.mxu1 %v12161_v25  ;;  %v12185_v59 = vld [vmem:[#allocation19_spill] sm:$0xff] }
 0x89d   :  { %6224 = vmatprep.subr.bf16.mxu0 %v12162_v44  ;;  %6265 = vmatprep.subr.bf16.mxu1 %v12163_v18  ;;  %v245_v25 = vmul.f32 %v12185_v59, %v145_v55  ;;  %v12186_v44 = vld [vmem:[#allocation76_spill] sm:$0xff] }
 0x89e   :  { %v11190_v18 = vadd.f32 %v12186_v44, %v244_v41 }
 0x8a0   :  { %6225 = vmatpush1.bf16.msra.mxu0 %v12164_v38  ;;  %6266 = vmatpush1.bf16.msra.mxu1 %v12165_v45  ;;  %v11193_v38 = vadd.f32 %v11961_v61, %v245_v25 }
 0x8a1   :  { %6226 = vmatprep.subr.bf16.mxu0 %v12166_v49  ;;  %6267 = vmatprep.subr.bf16.mxu1 %v12167_v4 }
 0x8a4   :  { %6227 = vmatpush1.bf16.msra.mxu0 %v12168_v21  ;;  %6268 = vmatpush1.bf16.msra.mxu1 %v12169_v12  ;;  %v246_v12 = vmul.f32 %v11863_v28, %v145_v55  ;;  %v248_v28 = vmul.f32 %v11965_v27, %v145_v55 }
 0x8a5   :  { %6228 = vmatprep.subr.bf16.mxu0 %v12170_v43  ;;  %6269 = vmatprep.subr.bf16.mxu1 %v12171_v54  ;;  %v247_v43 = vmul.f32 %v11962_v10, %v145_v55  ;;  %v12187_v10 = vld [vmem:[#allocation23_spill] sm:$0xff] }
 0x8a6   :  { %v11200_v54 = vadd.f32 %v11963_v0, %v246_v12  ;;  %v249_v0 = vmul.f32 %v12187_v10, %v145_v55 }
 0x8a8   :  { %6229 = vmatpush1.bf16.msra.mxu0 %v12172_v23  ;;  %6270 = vmatpush1.bf16.msra.mxu1 %v12173_v6  ;;  %v11203_v23 = vadd.f32 %v11964_v17, %v247_v43  ;;  %v12188_v17 = vld [vmem:[#allocation80_spill] sm:$0xff] }
 0x8a9   :  { %6230 = vmatprep.subr.bf16.mxu0 %v12174_v14  ;;  %6271 = vmatprep.subr.bf16.mxu1 %v12175_v26 }
 0x8ac   :  { %6231 = vmatpush1.bf16.msra.mxu0 %v12176_v19  ;;  %6272 = vmatpush1.bf16.msra.mxu1 %v12177_v5 }
 0x8ad   :  { %6232 = vmatprep.subr.bf16.mxu0 %v12178_v11  ;;  %6273 = vmatprep.subr.bf16.mxu1 %v12179_v56 }
 0x8b0   :  { %6233 = vmatpush1.bf16.msra.mxu0 %v12180_v47  ;;  %6274 = vmatpush1.bf16.msra.mxu1 %v12181_v37  ;;  %v250_v47 = vmul.f32 %v12188_v17, %v145_v55  ;;  %v12189_v37 = vld [vmem:[#allocation24_spill] sm:$0xff] }
 0x8b1   :  { %6292 = vmatprep.subr.bf16.mxu0 %v12182_v24  ;;  %6333 = vmatprep.subr.bf16.mxu1 %v12183_v51  ;;  %v251_v24 = vmul.f32 %v12189_v37, %v145_v55  ;;  %v12190_v51 = vld [vmem:[#allocation81_spill] sm:$0xff] }
 0x8b2   :  { %v11219_v27 = vadd.f32 %v9675_v58, %v250_v47 }
 0x8b3   :  { %v11223_v25 = vadd.f32 %v10070_v29, %v251_v24 }
 0x926   :  { %v5453_v8 = vpop.f32.mrb[56].mxu0  ;;  %v5494_v39 = vpop.f32.mrb[56].mxu1 }
 0x927   :  { %v5455_v22 = vpop.f32.mrb[57].mxu0  ;;  %v5496_v2 = vpop.f32.mrb[57].mxu1  ;;  %v5454_v45 = vadd.f32 %v5453_v8, %v11190_v18  ;;  %v5495_v61 = vadd.f32 %v5494_v39, %v11200_v54  ;;  %v11212_v8 = vadd.f32 %v12190_v51, %v248_v28 }
 0x928   :  { %v5457_v3 = vpop.f32.mrb[58].mxu0  ;;  %v5498_v62 = vpop.f32.mrb[58].mxu1  ;;  %v5456_v49 = vadd.f32 %v5455_v22, %v11193_v38  ;;  %v5497_v6 = vadd.f32 %v5496_v2, %v11203_v23 }
 0x929   :  { %v5458_v53 = vpop.f32.mrb[59].mxu0  ;;  %v5499_v63 = vpop.f32.mrb[59].mxu1  ;;  %v8418_v4 = vmul.f32 -1.442695, %v5454_v45  ;;  %v8420_v19 = vmul.f32 -1.442695, %v5495_v61 }
 0x92a   :  { %v8419_v21 = vmul.f32 -1.442695, %v5456_v49  ;;  %v8421_v5 = vmul.f32 -1.442695, %v5497_v6  ;;  %v12191_v3 = vld [vmem:[#allocation25_spill] sm:$0xff] }
 0x92b   :  { %8959 = vpow2.f32 %v8418_v4  ;;  %v11215_v62 = vadd.f32 %v12191_v3, %v249_v0  ;;  %v12204_v3 = vld [vmem:[#allocation27_spill] sm:$0xff] }
 0x92c   :  { %8961 = vpow2.f32 %v8419_v21 }
 0x92d   :  { %8963 = vpow2.f32 %v8420_v19 }
 0x92e   :  { %8965 = vpow2.f32 %v8421_v5 }
 0x935   :  { %v8960_v14 = vpop.eup %8959 }
 0x936   :  { %v8962_v26 = vpop.eup %8961  ;;  %v5595_v11 = vadd.f32 1.0, %v8960_v14 }
 0x937   :  { %v5596_v56 = vadd.f32 1.0, %v8962_v26  ;;  %v8964_v39 = vpop.eup %8963 }
 0x938   :  { %8967 = vrcp.f32 %v5595_v11  ;;  %v8966_v53 = vpop.eup %8965  ;;  %v5597_v6 = vadd.f32 1.0, %v8964_v39  ;;  %v12196_v39 = vld [vmem:[#allocation17_spill] sm:$0xff] }
 0x939   :  { %8969 = vrcp.f32 %v5596_v56  ;;  %v5598_v26 = vadd.f32 1.0, %v8966_v53  ;;  %v12205_v53 = vld [vmem:[#allocation28_spill] sm:$0xff] }
 0x942   :  { %v8968_v59 = vpop.eup %8967 }
 0x943   :  { %v8970_v49 = vpop.eup %8969 }
 0x956   :  { %v5535_v22 = vpop.f32.mrb[60].mxu0  ;;  %v5576_v2 = vpop.f32.mrb[60].mxu1 }
 0x957   :  { %v5536_v63 = vadd.f32 %v5535_v22, %v11212_v8  ;;  %v5537_v31 = vpop.f32.mrb[61].mxu0  ;;  %v5578_v41 = vpop.f32.mrb[61].mxu1  ;;  %v5577_v21 = vadd.f32 %v5576_v2, %v11219_v27  ;;  %v12197_v22 = vld [vmem:[#allocation18_spill] sm:$0xff] }
 0x958   :  { %v5538_v55 = vadd.f32 %v5537_v31, %v11215_v62  ;;  %v5539_v44 = vpop.f32.mrb[62].mxu0  ;;  %v5580_v45 = vpop.f32.mrb[62].mxu1  ;;  %v5579_v58 = vadd.f32 %v5578_v41, %v11223_v25  ;;  %v12203_v2 = vld [vmem:[#allocation26_spill] sm:$0xff]  ;;  %v12208_v41 = vld [vmem:[#allocation31_spill] sm:$0xff] }
 0x959   :  { %v5607_v4 = vmul.f32 %v8968_v59, %v5536_v63  ;;  %v5540_v12 = vpop.f32.mrb[63].mxu0  ;;  %v5581_v43 = vpop.f32.mrb[63].mxu1  ;;  %v12206_v63 = vld [vmem:[#allocation29_spill] sm:$0xff]  ;;  %v12207_v31 = vld [vmem:[#allocation30_spill] sm:$0xff]  ;;  %v12209_v59 = vld [vmem:[#allocation32_spill] sm:$0xff] }
 0x95a   :  { %v5608_v61 = vmul.f32 %v8970_v49, %v5538_v55  ;;  %v12210_v55 = vld [vmem:[#allocation33_spill] sm:$0xff]  ;;  %v12211_v44 = vld [vmem:[#allocation34_spill] sm:$0xff]  ;;  %v12212_v45 = vld [vmem:[#allocation35_spill] sm:$0xff] }
 0x95b   :  { %v5609_v14 = vadd.f32 %v5607_v4, %v5577_v21  ;;  %v12213_v49 = vld [vmem:[#allocation36_spill] sm:$0xff]  ;;  %v12214_v4 = vld [vmem:[#allocation37_spill] sm:$0xff]  ;;  %v12215_v21 = vld [vmem:[#allocation38_spill] sm:$0xff] }
 0x95c   :  { %v5610_v19 = vadd.f32 %v5608_v61, %v5579_v58  ;;  %v12216_v12 = vld [vmem:[#allocation77_spill] sm:$0xff]  ;;  %v12217_v43 = vld [vmem:[#allocation44_spill] sm:$0xff] }
 0x95d   :  { %8971 = vtanh.f32 %v5609_v14  ;;  %v12218_v61 = vld [vmem:[#allocation45_spill] sm:$0xff] }
 0x95e   :  { %8973 = vtanh.f32 %v5610_v19  ;;  %v6426_v58 = vld [vmem:[#allocation4 + $0x40] sm:$0xff] }
 0x95f   :  { %8975 = vrcp.f32 %v5597_v6  ;;  %v6438_v19 = vld [vmem:[#allocation4 + $0xa0] sm:$0xff] }
 0x960   :  { %8977 = vrcp.f32 %v5598_v26  ;;  %v6431_v26 = vld [vmem:[#allocation4 + $0x68] sm:$0xff] }
 0x967   :  { %v8972_v29 = vpop.eup %8971 }
 0x968   :  { %v8974_v5 = vpop.eup %8973  ;;  %v5613_v11 = vsub.f32 %v10983_v7, %v8972_v29  ;;  %v12192_v7 = vld [vmem:[#allocation68_spill] sm:$0xff] }
 0x969   :  { %v8976_v56 = vpop.eup %8975  ;;  %v5614_v28 = vsub.f32 %v10985_v33, %v8974_v5  ;;  %v12193_v33 = vld [vmem:[#allocation69_spill] sm:$0xff] }
 0x96a   :  { %v8978_v10 = vpop.eup %8977  ;;  %v5615_v0 = vmul.f32 %v8976_v56, %v5613_v11 }
 0x96b   :  { %v5616_v17 = vmul.f32 %v8978_v10, %v5614_v28  ;;  %v6442_v10 = vld [vmem:[#allocation4 + $0xc0] sm:$0xff] }
 0x96c   :  { %v11229_v47 = vadd.f32 %v8972_v29, %v5615_v0  ;;  %v6439_v29 = vld [vmem:[#allocation4 + $0xa8] sm:$0xff]  ;;  %v6446_v0 = vld [vmem:[#allocation4 + $0xe0] sm:$0xff] }
 0x96d   :  { %v11231_v37 = vadd.f32 %v8974_v5, %v5616_v17  ;;  %v6443_v17 = vld [vmem:[#allocation4 + $0xc8] sm:$0xff] }
 0x96e   :  { %v5629_v51 = vpack.c.bf16 %v11229_v47, %v11229_v47 }
 0x96f   :  { %5620 = vst.msk [vmem:[#allocation3 + $0x28] sm:$0xff] %vm1009_vm2, %v11231_v37  ;;  %v5630_v24 = vpack.c.bf16 %v11231_v37, %v11231_v37 }
 0x971   :  { %8518 = vmatprep.mubr.msk.bf16.mxu0 %vm1009_vm2, %v5630_v24  ;;  %8519 = vmatprep.mubr.msk.bf16.mxu1 %vm1009_vm2, %v5630_v24 }
 0x972   :  { %6243 = vmatmul.mubr.bf16.vlgmr.msra.gmra.mrb[64].mxu0 %v5629_v51  ;;  %6284 = vmatmul.mubr.bf16.vlgmr.msra.gmra.mrb[64].mxu1 %v5629_v51 }
 0x973   :  { %6293 = vmatpush1.bf16.msra.mxu0 %v10957_v1  ;;  %6334 = vmatpush1.bf16.msra.mxu1 %v10959_v46  ;;  %v12194_v1 = vld [vmem:[#allocation70_spill] sm:$0xff]  ;;  %v12195_v46 = vld [vmem:[#allocation71_spill] sm:$0xff] }
 0x974   :  { %8520 = vmatprep.mubr.msk.bf16.mxu0 %vm1009_vm2, %v5630_v24  ;;  %8521 = vmatprep.mubr.msk.bf16.mxu1 %vm1009_vm2, %v5630_v24  ;;  %v6447_v24 = vld [vmem:[#allocation4 + $0xe8] sm:$0xff] }
 0x975   :  { %6294 = vmatprep.subr.bf16.mxu0 %v10997_v13  ;;  %6335 = vmatprep.subr.bf16.mxu1 %v10999_v15  ;;  %v12198_v13 = vld [vmem:[#allocation20_spill] sm:$0xff]  ;;  %v12199_v15 = vld [vmem:[#allocation21_spill] sm:$0xff] }
 0x977   :  { %6295 = vmatpush1.bf16.msra.mxu0 %v11005_v16  ;;  %6336 = vmatpush1.bf16.msra.mxu1 %v11007_v42  ;;  %v12200_v16 = vld [vmem:[#allocation78_spill] sm:$0xff] }
 0x978   :  { %6296 = vmatprep.subr.bf16.mxu0 %v11011_v52  ;;  %6337 = vmatprep.subr.bf16.mxu1 %v12192_v7  ;;  %v12201_v42 = vld [vmem:[#allocation22_spill] sm:$0xff]  ;;  %v12202_v52 = vld [vmem:[#allocation79_spill] sm:$0xff] }
 0x97b   :  { %6297 = vmatpush1.bf16.msra.mxu0 %v12193_v33  ;;  %6338 = vmatpush1.bf16.msra.mxu1 %v12194_v1  ;;  %v8551_v33 = vcombine.high %v6442_v10, %v6446_v0  ;;  %v8553_v1 = vcombine.high %v6443_v17, %v6447_v24 }
 0x97c   :  { %6298 = vmatprep.subr.bf16.mxu0 %v12195_v46  ;;  %6339 = vmatprep.subr.bf16.mxu1 %v12196_v39  ;;  %v6450_v46 = vld [vmem:[#allocation4 + $0x100] sm:$0xff] }
 0x97d   :  { %v6454_v39 = vld [vmem:[#allocation4 + $0x120] sm:$0xff] }
 0x97f   :  { %6299 = vmatpush1.bf16.msra.mxu0 %v12197_v22  ;;  %6340 = vmatpush1.bf16.msra.mxu1 %v12198_v13  ;;  %v6451_v22 = vld [vmem:[#allocation4 + $0x108] sm:$0xff] }
 0x980   :  { %6300 = vmatprep.subr.bf16.mxu0 %v12199_v15  ;;  %6341 = vmatprep.subr.bf16.mxu1 %v12200_v16  ;;  %v6455_v13 = vld [vmem:[#allocation4 + $0x128] sm:$0xff]  ;;  %v8550_v15 = vcombine.low %v6442_v10, %v6446_v0  ;;  %v8552_v16 = vcombine.low %v6443_v17, %v6447_v24 }
 0x981   :  { %v6495_v10 = vld [vmem:[#allocation4 + $0x268] sm:$0xff] }
 0x983   :  { %6301 = vmatpush1.bf16.msra.mxu0 %v12201_v42  ;;  %6342 = vmatpush1.bf16.msra.mxu1 %v12202_v52  ;;  %v8559_v42 = vcombine.high %v6450_v46, %v6454_v39  ;;  %v8561_v52 = vcombine.high %v6451_v22, %v6455_v13 }
 0x984   :  { %6302 = vmatprep.subr.bf16.mxu0 %v12203_v2  ;;  %6343 = vmatprep.subr.bf16.mxu1 %v12204_v3  ;;  %v6458_v2 = vld [vmem:[#allocation4 + $0x140] sm:$0xff] }
 0x985   :  { %v6462_v3 = vld [vmem:[#allocation4 + $0x160] sm:$0xff] }
 0x987   :  { %6303 = vmatpush1.bf16.msra.mxu0 %v12205_v53  ;;  %6344 = vmatpush1.bf16.msra.mxu1 %v12206_v63  ;;  %v6459_v53 = vld [vmem:[#allocation4 + $0x148] sm:$0xff] }
 0x988   :  { %6304 = vmatprep.subr.bf16.mxu0 %v12207_v31  ;;  %6345 = vmatprep.subr.bf16.mxu1 %v12208_v41  ;;  %v6463_v63 = vld [vmem:[#allocation4 + $0x168] sm:$0xff]  ;;  %v8558_v31 = vcombine.low %v6450_v46, %v6454_v39  ;;  %v8560_v41 = vcombine.low %v6451_v22, %v6455_v13 }
 0x989   :  { %v6503_v46 = vld [vmem:[#allocation4 + $0x2a8] sm:$0xff] }
 0x98b   :  { %6305 = vmatpush1.bf16.msra.mxu0 %v12209_v59  ;;  %6346 = vmatpush1.bf16.msra.mxu1 %v12210_v55  ;;  %v8567_v59 = vcombine.high %v6458_v2, %v6462_v3  ;;  %v8569_v55 = vcombine.high %v6459_v53, %v6463_v63 }
 0x98c   :  { %6306 = vmatprep.subr.bf16.mxu0 %v12211_v44  ;;  %6347 = vmatprep.subr.bf16.mxu1 %v12212_v45  ;;  %v8566_v44 = vcombine.low %v6458_v2, %v6462_v3  ;;  %v8568_v45 = vcombine.low %v6459_v53, %v6463_v63  ;;  %v6511_v2 = vld [vmem:[#allocation4 + $0x2e8] sm:$0xff] }
 0x98f   :  { %6307 = vmatpush1.bf16.msra.mxu0 %v12213_v49  ;;  %6348 = vmatpush1.bf16.msra.mxu1 %v12214_v4  ;;  %v6466_v49 = vld [vmem:[#allocation4 + $0x180] sm:$0xff] }
 0x990   :  { %6308 = vmatprep.subr.bf16.mxu0 %v12215_v21  ;;  %6349 = vmatprep.subr.bf16.mxu1 %v12216_v12  ;;  %v6470_v4 = vld [vmem:[#allocation4 + $0x1a0] sm:$0xff]  ;;  %v6467_v21 = vld [vmem:[#allocation4 + $0x188] sm:$0xff] }
 0x991   :  { %v8575_v12 = vcombine.high %v6466_v49, %v6470_v4 }
 0x993   :  { %6309 = vmatpush1.bf16.msra.mxu0 %v11091_v34  ;;  %6350 = vmatpush1.bf16.msra.mxu1 %v11093_v30  ;;  %v6418_v34 = vld [vmem:[#allocation4] sm:$0xff] }
 0x994   :  { %6310 = vmatprep.subr.bf16.mxu0 %v11097_v57  ;;  %6351 = vmatprep.subr.bf16.mxu1 %v12217_v43  ;;  %v6422_v30 = vld [vmem:[#allocation4 + $0x20] sm:$0xff]  ;;  %v6419_v57 = vld [vmem:[#allocation4 + $0x8] sm:$0xff] }
 0x995   :  { %v6471_v43 = vld [vmem:[#allocation4 + $0x1a8] sm:$0xff] }
 0x997   :  { %6311 = vmatpush1.bf16.msra.mxu0 %v12218_v61  ;;  %6352 = vmatpush1.bf16.msra.mxu1 %v11105_v48  ;;  %v8526_v48 = vcombine.low %v6418_v34, %v6422_v30  ;;  %v8574_v61 = vcombine.low %v6466_v49, %v6470_v4 }
 0x998   :  { %6312 = vmatprep.subr.bf16.mxu0 %v11109_v40  ;;  %6353 = vmatprep.subr.bf16.mxu1 %v11111_v50  ;;  %v8527_v40 = vcombine.high %v6418_v34, %v6422_v30  ;;  %v6423_v50 = vld [vmem:[#allocation4 + $0x28] sm:$0xff]  ;;  %v8576_v34 = vcombine.low %v6467_v21, %v6471_v43  ;;  %v8577_v30 = vcombine.high %v6467_v21, %v6471_v43 }
 0x999   :  { %v8528_v6 = vcombine.low %v6419_v57, %v6423_v50 }
 0x99b   :  { %6313 = vmatpush1.bf16.msra.mxu0 %v11115_v9  ;;  %6354 = vmatpush1.bf16.msra.mxu1 %v11117_v35  ;;  %v6430_v9 = vld [vmem:[#allocation4 + $0x60] sm:$0xff]  ;;  %v8529_v35 = vcombine.high %v6419_v57, %v6423_v50 }
 0x99c   :  { %6314 = vmatprep.subr.bf16.mxu0 %v11121_v60  ;;  %6355 = vmatprep.subr.bf16.mxu1 %v11123_v20  ;;  %v8535_v14 = vcombine.high %v6426_v58, %v6430_v9  ;;  %v6427_v60 = vld [vmem:[#allocation4 + $0x48] sm:$0xff]  ;;  %v6434_v20 = vld [vmem:[#allocation4 + $0x80] sm:$0xff]  ;;  %v8534_v5 = vcombine.low %v6426_v58, %v6430_v9 }
 0x99d   :  { %v8536_v11 = vcombine.low %v6427_v60, %v6431_v26  ;;  %v8543_v56 = vcombine.high %v6434_v20, %v6438_v19  ;;  %v6474_v57 = vld [vmem:[#allocation4 + $0x1c0] sm:$0xff]  ;;  %v6479_v58 = vld [vmem:[#allocation4 + $0x1e8] sm:$0xff] }
 0x99f   :  { %6315 = vmatpush1.bf16.msra.mxu0 %v11127_v32  ;;  %6356 = vmatpush1.bf16.msra.mxu1 %v11129_v36  ;;  %v8537_v32 = vcombine.high %v6427_v60, %v6431_v26  ;;  %v6435_v36 = vld [vmem:[#allocation4 + $0x88] sm:$0xff]  ;;  %v6486_v60 = vld [vmem:[#allocation4 + $0x220] sm:$0xff] }
 0x9a0   :  { %6997 = vmatprep.subr.bf16.mxu0 %v8527_v40  ;;  %7037 = vmatprep.subr.bf16.mxu1 %v8529_v35  ;;  %v8545_v28 = vcombine.high %v6435_v36, %v6439_v29  ;;  %v8544_v7 = vcombine.low %v6435_v36, %v6439_v29  ;;  %v6475_v40 = vld [vmem:[#allocation4 + $0x1c8] sm:$0xff] }
 0x9a1   :  { %v8585_v35 = vcombine.high %v6475_v40, %v6479_v58  ;;  %v6483_v26 = vld [vmem:[#allocation4 + $0x208] sm:$0xff] }
 0x9a2   :  { %6325 = vmatmul.mubr.bf16.vlgmr.msra.gmra.mrb[68].mxu0 %v5629_v51  ;;  %6366 = vmatmul.mubr.bf16.vlgmr.msra.gmra.mrb[68].mxu1 %v5629_v51  ;;  %v8542_v51 = vcombine.low %v6434_v20, %v6438_v19 }
 0x9a3   :  { %6998 = vmatpush1.bf16.msra.mxu0 %v8526_v48  ;;  %7038 = vmatpush1.bf16.msra.mxu1 %v8528_v6  ;;  %v6478_v48 = vld [vmem:[#allocation4 + $0x1e0] sm:$0xff]  ;;  %v8584_v6 = vcombine.low %v6475_v40, %v6479_v58 }
 0x9a4   :  { %6999 = vmatprep.subr.bf16.mxu0 %v8535_v14  ;;  %7039 = vmatprep.subr.bf16.mxu1 %v8537_v32  ;;  %v8583_v50 = vcombine.high %v6474_v57, %v6478_v48  ;;  %v8582_v9 = vcombine.low %v6474_v57, %v6478_v48  ;;  %v6482_v14 = vld [vmem:[#allocation4 + $0x200] sm:$0xff]  ;;  %v6487_v32 = vld [vmem:[#allocation4 + $0x228] sm:$0xff] }
 0x9a5   :  { %v8591_v20 = vcombine.high %v6482_v14, %v6486_v60  ;;  %v8590_v19 = vcombine.low %v6482_v14, %v6486_v60  ;;  %v8592_v36 = vcombine.low %v6483_v26, %v6487_v32  ;;  %v8593_v29 = vcombine.high %v6483_v26, %v6487_v32 }
 0x9a7   :  { %7000 = vmatpush1.bf16.msra.mxu0 %v8534_v5  ;;  %7040 = vmatpush1.bf16.msra.mxu1 %v8536_v11  ;;  %v6490_v5 = vld [vmem:[#allocation4 + $0x240] sm:$0xff] }
 0x9a8   :  { %7001 = vmatprep.subr.bf16.mxu0 %v8543_v56  ;;  %7041 = vmatprep.subr.bf16.mxu1 %v8545_v28  ;;  %v6494_v11 = vld [vmem:[#allocation4 + $0x260] sm:$0xff]  ;;  %v6491_v56 = vld [vmem:[#allocation4 + $0x248] sm:$0xff] }
 0x9a9   :  { %v8599_v28 = vcombine.high %v6490_v5, %v6494_v11  ;;  %v8598_v0 = vcombine.low %v6490_v5, %v6494_v11  ;;  %v8600_v17 = vcombine.low %v6491_v56, %v6495_v10  ;;  %v8601_v24 = vcombine.high %v6491_v56, %v6495_v10 }
 0x9ab   :  { %7002 = vmatpush1.bf16.msra.mxu0 %v8542_v51  ;;  %7042 = vmatpush1.bf16.msra.mxu1 %v8544_v7  ;;  %v6498_v51 = vld [vmem:[#allocation4 + $0x280] sm:$0xff] }
 0x9ac   :  { %7003 = vmatprep.subr.bf16.mxu0 %v8551_v33  ;;  %7043 = vmatprep.subr.bf16.mxu1 %v8553_v1  ;;  %v6502_v7 = vld [vmem:[#allocation4 + $0x2a0] sm:$0xff]  ;;  %v6499_v33 = vld [vmem:[#allocation4 + $0x288] sm:$0xff] }
 0x9ad   :  { %v8607_v1 = vcombine.high %v6498_v51, %v6502_v7  ;;  %v8606_v39 = vcombine.low %v6498_v51, %v6502_v7  ;;  %v8608_v22 = vcombine.low %v6499_v33, %v6503_v46  ;;  %v8609_v13 = vcombine.high %v6499_v33, %v6503_v46 }
 0x9af   :  { %7004 = vmatpush1.bf16.msra.mxu0 %v8550_v15  ;;  %7044 = vmatpush1.bf16.msra.mxu1 %v8552_v16  ;;  %v6506_v15 = vld [vmem:[#allocation4 + $0x2c0] sm:$0xff] }
 0x9b0   :  { %7005 = vmatprep.subr.bf16.mxu0 %v8559_v42  ;;  %7045 = vmatprep.subr.bf16.mxu1 %v8561_v52  ;;  %v6510_v16 = vld [vmem:[#allocation4 + $0x2e0] sm:$0xff]  ;;  %v6507_v42 = vld [vmem:[#allocation4 + $0x2c8] sm:$0xff] }
 0x9b1   :  { %v8615_v52 = vcombine.high %v6506_v15, %v6510_v16  ;;  %v8614_v3 = vcombine.low %v6506_v15, %v6510_v16  ;;  %v8617_v53 = vcombine.high %v6507_v42, %v6511_v2  ;;  %v8616_v63 = vcombine.low %v6507_v42, %v6511_v2 }
 0x9b3   :  { %7006 = vmatpush1.bf16.msra.mxu0 %v8558_v31  ;;  %7046 = vmatpush1.bf16.msra.mxu1 %v8560_v41  ;;  %v11289_v31 = vld [vmem:[#allocation4 + $0x10] sm:$0xff] }
 0x9b4   :  { %7007 = vmatprep.subr.bf16.mxu0 %v8567_v59  ;;  %7047 = vmatprep.subr.bf16.mxu1 %v8569_v55  ;;  %v11291_v41 = vld [vmem:[#allocation4 + $0x30] sm:$0xff]  ;;  %v11293_v59 = vld [vmem:[#allocation4 + $0x18] sm:$0xff] }
 0x9b5   :  { %v8531_v55 = vcombine.high %v11289_v31, %v11291_v41 }
 0x9b7   :  { %7008 = vmatpush1.bf16.msra.mxu0 %v8566_v44  ;;  %7048 = vmatpush1.bf16.msra.mxu1 %v8568_v45  ;;  %v11297_v44 = vld [vmem:[#allocation4 + $0x38] sm:$0xff]  ;;  %v8530_v45 = vcombine.low %v11289_v31, %v11291_v41 }
 0x9b8   :  { %7009 = vmatprep.subr.bf16.mxu0 %v8575_v12  ;;  %7049 = vmatprep.subr.bf16.mxu1 %v8577_v30  ;;  %v8532_v49 = vcombine.low %v11293_v59, %v11297_v44  ;;  %v8533_v4 = vcombine.high %v11293_v59, %v11297_v44 }
 0x9bb   :  { %7010 = vmatpush1.bf16.msra.mxu0 %v8574_v61  ;;  %7050 = vmatpush1.bf16.msra.mxu1 %v8576_v34 }
 0x9bc   :  { %7011 = vmatprep.subr.bf16.mxu0 %v8583_v50  ;;  %7051 = vmatprep.subr.bf16.mxu1 %v8585_v35 }
 0x9bf   :  { %7012 = vmatpush1.bf16.msra.mxu0 %v8582_v9  ;;  %7052 = vmatpush1.bf16.msra.mxu1 %v8584_v6 }
 0x9c0   :  { %7013 = vmatprep.subr.bf16.mxu0 %v8591_v20  ;;  %7053 = vmatprep.subr.bf16.mxu1 %v8593_v29 }
 0x9c3   :  { %7014 = vmatpush1.bf16.msra.mxu0 %v8590_v19  ;;  %7054 = vmatpush1.bf16.msra.mxu1 %v8592_v36 }
 0x9c4   :  { %7015 = vmatprep.subr.bf16.mxu0 %v8599_v28  ;;  %7055 = vmatprep.subr.bf16.mxu1 %v8601_v24 }
 0x9c7   :  { %7016 = vmatpush1.bf16.msra.mxu0 %v8598_v0  ;;  %7056 = vmatpush1.bf16.msra.mxu1 %v8600_v17 }
 0x9c8   :  { %7017 = vmatprep.subr.bf16.mxu0 %v8607_v1  ;;  %7057 = vmatprep.subr.bf16.mxu1 %v8609_v13 }
 0x9cb   :  { %7018 = vmatpush1.bf16.msra.mxu0 %v8606_v39  ;;  %7058 = vmatpush1.bf16.msra.mxu1 %v8608_v22 }
 0x9cc   :  { %7019 = vmatprep.subr.bf16.mxu0 %v8615_v52  ;;  %7059 = vmatprep.subr.bf16.mxu1 %v8617_v53 }
 0x9cf   :  { %7020 = vmatpush1.bf16.msra.mxu0 %v8614_v3  ;;  %7060 = vmatpush1.bf16.msra.mxu1 %v8616_v63 }
 0x9d0   :  { %7077 = vmatprep.subr.bf16.mxu0 %v8531_v55  ;;  %7117 = vmatprep.subr.bf16.mxu1 %v8533_v4 }
 0xa45   :  { %v6244_v21 = vpop.f32.mrb[64].mxu0  ;;  %v6285_v12 = vpop.f32.mrb[64].mxu1 }
 0xa46   :  { %v6246_v43 = vpop.f32.mrb[65].mxu0  ;;  %v6287_v61 = vpop.f32.mrb[65].mxu1  ;;  %v6245_v40 = vadd.f32 %v6244_v21, %v11190_v18  ;;  %v6286_v6 = vadd.f32 %v6285_v12, %v11200_v54  ;;  %v6428_v21 = vld [vmem:[#allocation4 + $0x50] sm:$0xff] }
 0xa47   :  { %v6248_v34 = vpop.f32.mrb[66].mxu0  ;;  %v6289_v30 = vpop.f32.mrb[66].mxu1  ;;  %v6247_v50 = vadd.f32 %v6246_v43, %v11193_v38  ;;  %v6288_v35 = vadd.f32 %v6287_v61, %v11203_v23  ;;  %v6432_v12 = vld [vmem:[#allocation4 + $0x70] sm:$0xff]  ;;  %v6429_v43 = vld [vmem:[#allocation4 + $0x58] sm:$0xff] }
 0xa48   :  { %v6249_v57 = vpop.f32.mrb[67].mxu0  ;;  %v6290_v48 = vpop.f32.mrb[67].mxu1  ;;  %v8522_v58 = vmul.f32 -1.442695, %v6245_v40  ;;  %v8524_v26 = vmul.f32 -1.442695, %v6286_v6 }
 0xa49   :  { %v8523_v9 = vmul.f32 -1.442695, %v6247_v50  ;;  %v8525_v20 = vmul.f32 -1.442695, %v6288_v35  ;;  %v6433_v61 = vld [vmem:[#allocation4 + $0x78] sm:$0xff]  ;;  %v6436_v30 = vld [vmem:[#allocation4 + $0x90] sm:$0xff] }
 0xa4a   :  { %8979 = vpow2.f32 %v8522_v58  ;;  %v8541_v57 = vcombine.high %v6429_v43, %v6433_v61  ;;  %v6440_v48 = vld [vmem:[#allocation4 + $0xb0] sm:$0xff]  ;;  %v6437_v40 = vld [vmem:[#allocation4 + $0x98] sm:$0xff]  ;;  %v8538_v58 = vcombine.low %v6428_v21, %v6432_v12 }
 0xa4b   :  { %8981 = vpow2.f32 %v8523_v9  ;;  %v6441_v50 = vld [vmem:[#allocation4 + $0xb8] sm:$0xff]  ;;  %v8540_v9 = vcombine.low %v6429_v43, %v6433_v61  ;;  %v8547_v6 = vcombine.high %v6436_v30, %v6440_v48  ;;  %v8546_v31 = vcombine.low %v6436_v30, %v6440_v48  ;;  %v6492_v30 = vld [vmem:[#allocation4 + $0x250] sm:$0xff] }
 0xa4c   :  { %8983 = vpow2.f32 %v8524_v26  ;;  %v8549_v35 = vcombine.high %v6437_v40, %v6441_v50  ;;  %v6445_v26 = vld [vmem:[#allocation4 + $0xd8] sm:$0xff]  ;;  %v8548_v41 = vcombine.low %v6437_v40, %v6441_v50 }
 0xa4d   :  { %8985 = vpow2.f32 %v8525_v20  ;;  %v6449_v20 = vld [vmem:[#allocation4 + $0xf8] sm:$0xff] }
 0xa4e   :  { %v8557_v44 = vcombine.high %v6445_v26, %v6449_v20  ;;  %v6497_v48 = vld [vmem:[#allocation4 + $0x278] sm:$0xff] }
 0xa54   :  { %v8980_v14 = vpop.eup %8979 }
 0xa55   :  { %v8982_v60 = vpop.eup %8981  ;;  %v6386_v32 = vadd.f32 1.0, %v8980_v14  ;;  %v6444_v14 = vld [vmem:[#allocation4 + $0xd0] sm:$0xff] }
 0xa56   :  { %v6387_v19 = vadd.f32 1.0, %v8982_v60  ;;  %v8984_v18 = vpop.eup %8983  ;;  %v6448_v60 = vld [vmem:[#allocation4 + $0xf0] sm:$0xff] }
 0xa57   :  { %8987 = vrcp.f32 %v6386_v32  ;;  %v8986_v5 = vpop.eup %8985  ;;  %v6388_v22 = vadd.f32 1.0, %v8984_v18  ;;  %v8555_v59 = vcombine.high %v6444_v14, %v6448_v60  ;;  %v6453_v32 = vld [vmem:[#allocation4 + $0x118] sm:$0xff]  ;;  %v8554_v18 = vcombine.low %v6444_v14, %v6448_v60 }
 0xa58   :  { %8989 = vrcp.f32 %v6387_v19  ;;  %v6389_v15 = vadd.f32 1.0, %v8986_v5  ;;  %v6457_v19 = vld [vmem:[#allocation4 + $0x138] sm:$0xff] }
 0xa59   :  { %v8565_v5 = vcombine.high %v6453_v32, %v6457_v19  ;;  %v6501_v14 = vld [vmem:[#allocation4 + $0x298] sm:$0xff] }
 0xa5a   :  { %v6505_v60 = vld [vmem:[#allocation4 + $0x2b8] sm:$0xff] }
 0xa61   :  { %v8988_v28 = vpop.eup %8987 }
 0xa62   :  { %v8990_v24 = vpop.eup %8989 }
 0xa75   :  { %v6326_v36 = vpop.f32.mrb[68].mxu0  ;;  %v6367_v29 = vpop.f32.mrb[68].mxu1 }
 0xa76   :  { %v6327_v11 = vadd.f32 %v6326_v36, %v11212_v8  ;;  %v6328_v56 = vpop.f32.mrb[69].mxu0  ;;  %v6369_v54 = vpop.f32.mrb[69].mxu1  ;;  %v6368_v7 = vadd.f32 %v6367_v29, %v11219_v27  ;;  %v8556_v36 = vcombine.low %v6445_v26, %v6449_v20 }
 0xa77   :  { %v6329_v10 = vadd.f32 %v6328_v56, %v11215_v62  ;;  %v6330_v0 = vpop.f32.mrb[70].mxu0  ;;  %v6371_v17 = vpop.f32.mrb[70].mxu1  ;;  %v6370_v39 = vadd.f32 %v6369_v54, %v11223_v25  ;;  %v6464_v56 = vld [vmem:[#allocation4 + $0x170] sm:$0xff]  ;;  %v6461_v54 = vld [vmem:[#allocation4 + $0x158] sm:$0xff] }
 0xa78   :  { %v6398_v51 = vmul.f32 %v8988_v28, %v6327_v11  ;;  %v6331_v33 = vpop.f32.mrb[71].mxu0  ;;  %v6372_v1 = vpop.f32.mrb[71].mxu1  ;;  %v6460_v11 = vld [vmem:[#allocation4 + $0x150] sm:$0xff]  ;;  %v6465_v28 = vld [vmem:[#allocation4 + $0x178] sm:$0xff]  ;;  %v8564_v0 = vcombine.low %v6453_v32, %v6457_v19  ;;  %v8612_v19 = vcombine.low %v6501_v14, %v6505_v60 }
 0xa79   :  { %v6399_v46 = vmul.f32 %v8990_v24, %v6329_v10  ;;  %v8571_v17 = vcombine.high %v6460_v11, %v6464_v56  ;;  %v8573_v24 = vcombine.high %v6461_v54, %v6465_v28  ;;  %v6469_v33 = vld [vmem:[#allocation4 + $0x198] sm:$0xff] }
 0xa7a   :  { %v6400_v13 = vadd.f32 %v6398_v51, %v6368_v7  ;;  %v6468_v51 = vld [vmem:[#allocation4 + $0x190] sm:$0xff]  ;;  %v6473_v1 = vld [vmem:[#allocation4 + $0x1b8] sm:$0xff] }
 0xa7b   :  { %v6401_v8 = vadd.f32 %v6399_v46, %v6370_v39  ;;  %v6472_v7 = vld [vmem:[#allocation4 + $0x1b0] sm:$0xff]  ;;  %v8570_v46 = vcombine.low %v6460_v11, %v6464_v56  ;;  %v8572_v39 = vcombine.low %v6461_v54, %v6465_v28  ;;  %v8811_v11 = vld [vmem:[#allocation7] sm:$0xff]   ;;  %v7178_v56 = vld [vmem:[#allocation3 + $0x8] sm:$0xff] }
 0xa7c   :  { %8991 = vtanh.f32 %v6400_v13  ;;  %v8581_v13 = vcombine.high %v6469_v33, %v6473_v1  ;;  %v7177_v54 = vld [vmem:[#allocation3] sm:$0xff]  ;;  %v8812_v28 = vld [vmem:[#allocation7 + $0x8] sm:$0xff]  }
 0xa7d   :  { %8993 = vtanh.f32 %v6401_v8  ;;  %v6480_v8 = vld [vmem:[#allocation4 + $0x1f0] sm:$0xff] }
 0xa7e   :  { %8995 = vrcp.f32 %v6388_v22  ;;  %v8579_v22 = vcombine.high %v6468_v51, %v6472_v7 }
 0xa7f   :  { %8997 = vrcp.f32 %v6389_v15  ;;  %v6476_v15 = vld [vmem:[#allocation4 + $0x1d0] sm:$0xff] }
 0xa86   :  { %v8992_v16 = vpop.eup %8991 }
 0xa87   :  { %v8994_v42 = vpop.eup %8993  ;;  %v6404_v52 = vsub.f32 %v11229_v47, %v8992_v16 }
 0xa88   :  { %v8996_v2 = vpop.eup %8995  ;;  %v6405_v27 = vsub.f32 %v11231_v37, %v8994_v42  ;;  %v8539_v37 = vcombine.high %v6428_v21, %v6432_v12  ;;  %v6489_v21 = vld [vmem:[#allocation4 + $0x238] sm:$0xff]  ;;  %v8586_v12 = vcombine.low %v6476_v15, %v6480_v8 }
 0xa89   :  { %v8998_v3 = vpop.eup %8997  ;;  %v6406_v53 = vmul.f32 %v8996_v2, %v6404_v52  ;;  %v8578_v52 = vcombine.low %v6468_v51, %v6472_v7  ;;  %v8580_v2 = vcombine.low %v6469_v33, %v6473_v1  ;;  %v7182_v51 = vld [vmem:[#allocation3 + $0x28] sm:$0xff]  ;;  %v7179_v7 = vld [vmem:[#allocation3 + $0x10] sm:$0xff]  ;;  %v7181_v1 = vld [vmem:[#allocation3 + $0x20] sm:$0xff] }
 0xa8a   :  { %v6407_v63 = vmul.f32 %v8998_v3, %v6405_v27  ;;  %v8587_v27 = vcombine.high %v6476_v15, %v6480_v8  ;;  %v8819_v15 = vld [vmem:[%s11421_s6 + $0x20] sm:$0xff]   ;;  %v8820_v8 = vld [vmem:[%s11421_s6 + $0x28] sm:$0xff]  }
 0xa8b   :  { %v6408_v55 = vadd.f32 %v8992_v16, %v6406_v53  ;;  %v6477_v16 = vld [vmem:[#allocation4 + $0x1d8] sm:$0xff]  ;;  %v6484_v53 = vld [vmem:[#allocation4 + $0x210] sm:$0xff] }
 0xa8c   :  { %v11315_v4 = vadd.f32 %v8994_v42, %v6407_v63  ;;  %v6481_v42 = vld [vmem:[#allocation4 + $0x1f8] sm:$0xff]  ;;  %v6488_v63 = vld [vmem:[#allocation4 + $0x230] sm:$0xff] }
 0xa8d   :  { %v11321_v47 = vpack.c.bf16 %v6408_v55, %v6408_v55  ;;  %v8589_v3 = vcombine.high %v6477_v16, %v6481_v42  ;;  %v6485_v55 = vld [vmem:[#allocation4 + $0x218] sm:$0xff]  ;;  %v8588_v43 = vcombine.low %v6477_v16, %v6481_v42  ;;  %v8595_v61 = vcombine.high %v6484_v53, %v6488_v63  ;;  %v8821_v16 = vld [vmem:[%s11421_s6 + $0x30] sm:$0xff]   ;;  %v8822_v42 = vld [vmem:[%s11421_s6 + $0x38] sm:$0xff]  }
 0xa8e   :  { %6411 = vst.msk [vmem:[#allocation3 + $0x30] sm:$0xff] %vm1009_vm2, %v11315_v4  ;;  %v6417_v34 = vpack.c.bf16 %v11315_v4, %v11315_v4  ;;  %v8594_v40 = vcombine.low %v6484_v53, %v6488_v63  ;;  %v8596_v50 = vcombine.low %v6485_v55, %v6489_v21  ;;  %v8827_v53 = vld [vmem:[#allocation9 + $0x20] sm:$0xff]   ;;  %v8828_v63 = vld [vmem:[#allocation9 + $0x28] sm:$0xff]  }
 0xa90   :  { %8622 = vmatprep.mubr.msk.bf16.mxu0 %vm1009_vm2, %v6417_v34  ;;  %8623 = vmatprep.mubr.msk.bf16.mxu1 %vm1009_vm2, %v6417_v34 }
 0xa91   :  { %7030 = vmatmul.mubr.bf16.vlgmr.msra.gmra.mrb[72].mxu0 %v11321_v47  ;;  %7070 = vmatmul.mubr.bf16.vlgmr.msra.gmra.mrb[72].mxu1 %v11321_v47 }
 0xa92   :  { %7078 = vmatpush1.bf16.msra.mxu0 %v8530_v45  ;;  %7118 = vmatpush1.bf16.msra.mxu1 %v8532_v49  ;;  %v6452_v45 = vld [vmem:[#allocation4 + $0x110] sm:$0xff] }
 0xa93   :  { %8624 = vmatprep.mubr.msk.bf16.mxu0 %vm1009_vm2, %v6417_v34  ;;  %8625 = vmatprep.mubr.msk.bf16.mxu1 %vm1009_vm2, %v6417_v34  ;;  %v6456_v49 = vld [vmem:[#allocation4 + $0x130] sm:$0xff]  ;;  %v8597_v34 = vcombine.high %v6485_v55, %v6489_v21 }
 0xa94   :  { %7079 = vmatprep.subr.bf16.mxu0 %v8539_v37  ;;  %7119 = vmatprep.subr.bf16.mxu1 %v8541_v57  ;;  %v8563_v29 = vcombine.high %v6452_v45, %v6456_v49  ;;  %v8562_v10 = vcombine.low %v6452_v45, %v6456_v49  ;;  %v6496_v37 = vld [vmem:[#allocation4 + $0x270] sm:$0xff]  ;;  %v6493_v57 = vld [vmem:[#allocation4 + $0x258] sm:$0xff] }
 0xa95   :  { %v8602_v26 = vcombine.low %v6492_v30, %v6496_v37  ;;  %v8604_v20 = vcombine.low %v6493_v57, %v6497_v48  ;;  %v6509_v45 = vld [vmem:[#allocation4 + $0x2d8] sm:$0xff] }
 0xa96   :  { %7080 = vmatpush1.bf16.msra.mxu0 %v8538_v58  ;;  %7120 = vmatpush1.bf16.msra.mxu1 %v8540_v9  ;;  %v8603_v58 = vcombine.high %v6492_v30, %v6496_v37  ;;  %v8605_v9 = vcombine.high %v6493_v57, %v6497_v48  ;;  %v6513_v49 = vld [vmem:[#allocation4 + $0x2f8] sm:$0xff] }
 0xa97   :  { %7081 = vmatprep.subr.bf16.mxu0 %v8547_v6  ;;  %7121 = vmatprep.subr.bf16.mxu1 %v8549_v35  ;;  %v6500_v6 = vld [vmem:[#allocation4 + $0x290] sm:$0xff] }
 0xa98   :  { %v6504_v35 = vld [vmem:[#allocation4 + $0x2b0] sm:$0xff] }
 0xa99   :  { %v8610_v32 = vcombine.low %v6500_v6, %v6504_v35 }
 0xa9a   :  { %7082 = vmatpush1.bf16.msra.mxu0 %v8546_v31  ;;  %7122 = vmatpush1.bf16.msra.mxu1 %v8548_v41  ;;  %v8611_v31 = vcombine.high %v6500_v6, %v6504_v35  ;;  %v8613_v41 = vcombine.high %v6501_v14, %v6505_v60 }
 0xa9b   :  { %7083 = vmatprep.subr.bf16.mxu0 %v8555_v59  ;;  %7123 = vmatprep.subr.bf16.mxu1 %v8557_v44  ;;  %v6508_v59 = vld [vmem:[#allocation4 + $0x2d0] sm:$0xff] }
 0xa9c   :  { %v6512_v44 = vld [vmem:[#allocation4 + $0x2f0] sm:$0xff] }
 0xa9e   :  { %7084 = vmatpush1.bf16.msra.mxu0 %v8554_v18  ;;  %7124 = vmatpush1.bf16.msra.mxu1 %v8556_v36  ;;  %v8619_v18 = vcombine.high %v6508_v59, %v6512_v44  ;;  %v8621_v36 = vcombine.high %v6509_v45, %v6513_v49 }
 0xa9f   :  { %7085 = vmatprep.subr.bf16.mxu0 %v8563_v29  ;;  %7125 = vmatprep.subr.bf16.mxu1 %v8565_v5  ;;  %v8618_v29 = vcombine.low %v6508_v59, %v6512_v44  ;;  %v8620_v5 = vcombine.low %v6509_v45, %v6513_v49 }
 0xaa2   :  { %7086 = vmatpush1.bf16.msra.mxu0 %v8562_v10  ;;  %7126 = vmatpush1.bf16.msra.mxu1 %v8564_v0  ;;  %v7185_v10 = vpack.c.bf16 %v7178_v56, %v7177_v54  ;;  %v8813_v0 = vld [vmem:[#allocation7 + $0x10] sm:$0xff]  }
 0xaa3   :  { %7087 = vmatprep.subr.bf16.mxu0 %v8571_v17  ;;  %7127 = vmatprep.subr.bf16.mxu1 %v8573_v24  ;;  %v8814_v17 = vld [vmem:[#allocation7 + $0x18] sm:$0xff]  }
 0xaa4   :  { %v7180_v24 = vld [vmem:[#allocation3 + $0x18] sm:$0xff] }
 0xaa5   :  { %v7186_v33 = vpack.c.bf16 %v7180_v24, %v7179_v7 }
 0xaa6   :  { %7088 = vmatpush1.bf16.msra.mxu0 %v8570_v46  ;;  %7128 = vmatpush1.bf16.msra.mxu1 %v8572_v39  ;;  %v7187_v46 = vpack.c.bf16 %v7182_v51, %v7181_v1  ;;  %v8816_v39 = vld [vmem:[%s11421_s6 + $0x8] sm:$0xff]  }
 0xaa7   :  { %7089 = vmatprep.subr.bf16.mxu0 %v8579_v22  ;;  %7129 = vmatprep.subr.bf16.mxu1 %v8581_v13  ;;  %v8817_v22 = vld [vmem:[%s11421_s6 + $0x10] sm:$0xff]   ;;  %v8818_v13 = vld [vmem:[%s11421_s6 + $0x18] sm:$0xff]  }
 0xaaa   :  { %7090 = vmatpush1.bf16.msra.mxu0 %v8578_v52  ;;  %7130 = vmatpush1.bf16.msra.mxu1 %v8580_v2  ;;  %v8823_v52 = vld [vmem:[#allocation9] sm:$0xff]   ;;  %v8824_v2 = vld [vmem:[#allocation9 + $0x8] sm:$0xff]  }
 0xaab   :  { %7091 = vmatprep.subr.bf16.mxu0 %v8587_v27  ;;  %7131 = vmatprep.subr.bf16.mxu1 %v8589_v3  ;;  %v8825_v27 = vld [vmem:[#allocation9 + $0x10] sm:$0xff]   ;;  %v8826_v3 = vld [vmem:[#allocation9 + $0x18] sm:$0xff]  }
 0xaae   :  { %7092 = vmatpush1.bf16.msra.mxu0 %v8586_v12  ;;  %7132 = vmatpush1.bf16.msra.mxu1 %v8588_v43 }
 0xaaf   :  { %7093 = vmatprep.subr.bf16.mxu0 %v8595_v61  ;;  %7133 = vmatprep.subr.bf16.mxu1 %v8597_v34 }
 0xab2   :  { %7094 = vmatpush1.bf16.msra.mxu0 %v8594_v40  ;;  %7134 = vmatpush1.bf16.msra.mxu1 %v8596_v50 }
 0xab3   :  { %7095 = vmatprep.subr.bf16.mxu0 %v8603_v58  ;;  %7135 = vmatprep.subr.bf16.mxu1 %v8605_v9 }
 0xab6   :  { %7096 = vmatpush1.bf16.msra.mxu0 %v8602_v26  ;;  %7136 = vmatpush1.bf16.msra.mxu1 %v8604_v20 }
 0xab7   :  { %7097 = vmatprep.subr.bf16.mxu0 %v8611_v31  ;;  %7137 = vmatprep.subr.bf16.mxu1 %v8613_v41 }
 0xaba   :  { %7098 = vmatpush1.bf16.msra.mxu0 %v8610_v32  ;;  %7138 = vmatpush1.bf16.msra.mxu1 %v8612_v19  ;;  %v11371_v19 = vld [vmem:[%s11420_s5] ss:$0 sm:$0xff] }
 0xabb   :  { %7099 = vmatprep.subr.bf16.mxu0 %v8619_v18  ;;  %7139 = vmatprep.subr.bf16.mxu1 %v8621_v36 }
 0xabe   :  { %7100 = vmatpush1.bf16.msra.mxu0 %v8618_v29  ;;  %7140 = vmatpush1.bf16.msra.mxu1 %v8620_v5 }
 0xabf   :  { %8708 = vmatprep.subr.bf16.mxu0 %v8811_v11 }
 0xac1   :  { %7110 = vmatmul.mubr.bf16.vlgmr.msra.gmra.mrb[76].mxu0 %v11321_v47  ;;  %7150 = vmatmul.mubr.bf16.vlgmr.msra.gmra.mrb[76].mxu1 %v11321_v47  ;;  %v8815_v47 = vld [vmem:[%s11421_s6] sm:$0xff]  }
 0xac2   :  { %8709 = vmatpush3.bf16.msra.mxu0 %v8811_v11  ;;  %8716 = vmatprep.mubr.msk.bf16.mxu0 %vm1009_vm2, %v7185_v10 }
 0xac3   :  { %8710 = vmatprep.subr.bf16.mxu0 %v8812_v28  ;;  %8724 = vmatprep.subr.bf16.mxu1 %v8815_v47 }
 0xac4   :  { %8725 = vmatpush3.bf16.msra.mxu1 %v8815_v47  ;;  %v7183_v47 = vld [vmem:[#allocation3 + $0x30] sm:$0xff] }
 0xac5   :  { %8726 = vmatprep.subr.bf16.mxu1 %v8816_v39 }
 0xac6   :  { %8711 = vmatpush3.bf16.msra.mxu0 %v8812_v28 }
 0xac7   :  { %8712 = vmatprep.subr.bf16.mxu0 %v8813_v0 }
 0xac8   :  { %8727 = vmatpush3.bf16.msra.mxu1 %v8816_v39 }
 0xac9   :  { %8728 = vmatprep.subr.bf16.mxu1 %v8817_v22 }
 0xaca   :  { %8713 = vmatpush3.bf16.msra.mxu0 %v8813_v0 }
 0xacb   :  { %8714 = vmatprep.subr.bf16.mxu0 %v8814_v17 }
 0xacc   :  { %8729 = vmatpush3.bf16.msra.mxu1 %v8817_v22  ;;  %v8829_v22 = vld [vmem:[#allocation9 + $0x30] sm:$0xff]  }
 0xacd   :  { %8730 = vmatprep.subr.bf16.mxu1 %v8818_v13 }
 0xace   :  { %8715 = vmatpush3.bf16.msra.mxu0 %v8814_v17 }
 0xacf   :  { %8748 = vmatprep.subr.bf16.mxu0 %v8823_v52 }
 0xad0   :  { %8731 = vmatpush3.bf16.msra.mxu1 %v8818_v13  ;;  %v8830_v13 = vld [vmem:[#allocation9 + $0x38] sm:$0xff]  }
 0xad1   :  { %8717 = vmatmul.mubr.msk.bf16.vlgmr.msra.gmra.mrb[80].mxu0 %vm1009_vm2, %v7186_v33  ;;  %8732 = vmatprep.subr.bf16.mxu1 %v8819_v15 }
 0xad2   :  { %8720 = vmatprep.mubr.msk.bf16.mxu0 %vm1009_vm2, %v7187_v46  ;;  %8749 = vmatpush3.bf16.msra.mxu0 %v8823_v52  ;;  %v8835_v52 = vld [vmem:[#allocation10 + $0x20] sm:$0xff]  }
 0xad3   :  { %8750 = vmatprep.subr.bf16.mxu0 %v8824_v2 }
 0xad4   :  { %8733 = vmatpush3.bf16.msra.mxu1 %v8819_v15  ;;  %v8831_v15 = vld [vmem:[#allocation10] sm:$0xff]  }
 0xad5   :  { %8734 = vmatprep.subr.bf16.mxu1 %v8820_v8 }
 0xad6   :  { %8751 = vmatpush3.bf16.msra.mxu0 %v8824_v2  ;;  %v8836_v2 = vld [vmem:[#allocation10 + $0x28] sm:$0xff]  }
 0xad7   :  { %8752 = vmatprep.subr.bf16.mxu0 %v8825_v27 }
 0xad8   :  { %8735 = vmatpush3.bf16.msra.mxu1 %v8820_v8  ;;  %v8832_v8 = vld [vmem:[#allocation10 + $0x8] sm:$0xff]  }
 0xad9   :  { %8736 = vmatprep.subr.bf16.mxu1 %v8821_v16 }
 0xada   :  { %8753 = vmatpush3.bf16.msra.mxu0 %v8825_v27  ;;  %v11383_v27 = vld [vmem:[%s11422_s7] ss:$0 sm:$0xff] }
 0xadb   :  { %8754 = vmatprep.subr.bf16.mxu0 %v8826_v3 }
 0xadc   :  { %8737 = vmatpush3.bf16.msra.mxu1 %v8821_v16  ;;  %v8833_v16 = vld [vmem:[#allocation10 + $0x10] sm:$0xff]  }
 0xadd   :  { %8738 = vmatprep.subr.bf16.mxu1 %v8822_v42 }
 0xade   :  { %8755 = vmatpush3.bf16.msra.mxu0 %v8826_v3 }
 0xadf   :  { %8756 = vmatprep.subr.bf16.mxu0 %v8827_v53 }
 0xae0   :  { %8739 = vmatpush3.bf16.msra.mxu1 %v8822_v42  ;;  %v8834_v42 = vld [vmem:[#allocation10 + $0x18] sm:$0xff]  }
 0xae1   :  { %8772 = vmatprep.subr.bf16.mxu1 %v8831_v15 }
 0xae2   :  { %8757 = vmatpush3.bf16.msra.mxu0 %v8827_v53 }
 0xae3   :  { %8758 = vmatprep.subr.bf16.mxu0 %v8828_v63 }
 0xae6   :  { %8759 = vmatpush3.bf16.msra.mxu0 %v8828_v63 }
 0xae7   :  { %8760 = vmatprep.subr.bf16.mxu0 %v8829_v22 }
 0xaea   :  { %8761 = vmatpush3.bf16.msra.mxu0 %v8829_v22 }
 0xaeb   :  { %8762 = vmatprep.subr.bf16.mxu0 %v8830_v13 }
 0xaee   :  { %8763 = vmatpush3.bf16.msra.mxu0 %v8830_v13 }
 0xb64   :  { %v7031_v55 = vpop.f32.mrb[72].mxu0  ;;  %v7071_v21 = vpop.f32.mrb[72].mxu1 }
 0xb65   :  { %v7032_v12 = vpop.f32.mrb[73].mxu0  ;;  %v7072_v43 = vpop.f32.mrb[73].mxu1 }
 0xb66   :  { %v7034_v61 = vpop.f32.mrb[74].mxu0  ;;  %v7074_v34 = vpop.f32.mrb[74].mxu1  ;;  %v7033_v57 = vadd.f32 %v7032_v12, %v11193_v38  ;;  %v7073_v40 = vadd.f32 %v7072_v43, %v11203_v23 }
 0xb67   :  { %v7035_v30 = vpop.f32.mrb[75].mxu0  ;;  %v7075_v37 = vpop.f32.mrb[75].mxu1 }
 0xb68   :  { %v8626_v48 = vmul.f32 -1.442695, %v7033_v57  ;;  %v8627_v58 = vmul.f32 -1.442695, %v7073_v40 }
 0xb6a   :  { %8999 = vpow2.f32 %v8626_v48 }
 0xb6b   :  { %9001 = vpow2.f32 %v8627_v58 }
 0xb74   :  { %v9000_v50 = vpop.eup %8999 }
 0xb75   :  { %v7163_v9 = vadd.f32 1.0, %v9000_v50  ;;  %v9002_v26 = vpop.eup %9001 }
 0xb76   :  { %v7164_v49 = vadd.f32 1.0, %v9002_v26 }
 0xb77   :  { %9003 = vrcp.f32 %v7163_v9 }
 0xb81   :  { %v9004_v59 = vpop.eup %9003 }
 0xb94   :  { %v7111_v6 = vpop.f32.mrb[76].mxu0  ;;  %v7151_v35 = vpop.f32.mrb[76].mxu1 }
 0xb95   :  { %v7112_v14 = vpop.f32.mrb[77].mxu0  ;;  %v7152_v60 = vpop.f32.mrb[77].mxu1 }
 0xb96   :  { %v7113_v20 = vadd.f32 %v7112_v14, %v11215_v62  ;;  %v7114_v31 = vpop.f32.mrb[78].mxu0  ;;  %v7154_v41 = vpop.f32.mrb[78].mxu1  ;;  %v7153_v23 = vadd.f32 %v7152_v60, %v11223_v25 }
 0xb97   :  { %v7115_v38 = vpop.f32.mrb[79].mxu0  ;;  %v7155_v44 = vpop.f32.mrb[79].mxu1 }
 0xb98   :  { %v7169_v45 = vmul.f32 %v9004_v59, %v7113_v20 }
 0xb9a   :  { %v7170_v32 = vadd.f32 %v7169_v45, %v7153_v23  ;;  %v8837_v45 = vld [vmem:[#allocation10 + $0x30] sm:$0xff]   ;;  %v8838_v23 = vld [vmem:[#allocation10 + $0x38] sm:$0xff]  }
 0xb9c   :  { %9005 = vtanh.f32 %v7170_v32 }
 0xb9d   :  { %9007 = vrcp.f32 %v7164_v49  ;;  %v8646_v49 = vld [vmem:[%s11424_s9] ss:$0 sm:$0xff] }
 0xba4   :  { %v8718_v18 = vpop.f32.mrb[80].mxu0 }
 0xba5   :  { %v7283_v62 = vadd.f32 %v8718_v18, %v11371_v19  ;;  %v7274_v36 = vpop.f32.mrb[81].mxu0 }
 0xba6   :  { %v9006_v29 = vpop.eup %9005  ;;  %v7275_v5 = vadd.f32 %v11371_v19, %v7274_v36  ;;  %v8719_v11 = vpop.f32.mrb[82].mxu0 }
 0xba7   :  { %v7172_v56 = vsub.f32 %v11315_v4, %v9006_v29  ;;  %v7286_v25 = vadd.f32 %v8719_v11, %v11371_v19  ;;  %v7277_v54 = vpop.f32.mrb[83].mxu0  ;;  %v9008_v28 = vpop.eup %9007  ;;  %v7307_v17 = vmax.f32 %v7283_v62, 0.0 }
 0xba8   :  { %v7278_v10 = vadd.f32 %v11371_v19, %v7277_v54  ;;  %v7305_v51 = vmax.f32 %v7275_v5, 0.0 }
 0xba9   :  { %v7173_v0 = vmul.f32 %v9008_v28, %v7172_v56  ;;  %v7308_v24 = vmax.f32 %v7286_v25, 0.0 }
 0xbaa   :  { %v7306_v7 = vmax.f32 %v7278_v10, 0.0 }
 0xbab   :  { %v7174_v33 = vadd.f32 %v9006_v29, %v7173_v0  ;;  %v7314_v1 = vpack.c.bf16 %v7308_v24, %v7307_v17 }
 0xbac   :  { %v7313_v46 = vpack.c.bf16 %v7306_v7, %v7305_v51 }
 0xbad   :  { %7176 = vst.msk [vmem:[#allocation3 + $0x38] sm:$0xff] %vm1009_vm2, %v7174_v33 }
 0xbae   :  { %8740 = vmatprep.mubr.bf16.mxu1 %v7313_v46 }
 0xbaf   :  { %8741 = vmatmul.mubr.bf16.vlgmr.msra.gmra.mrb[80].mxu1 %v7314_v1 }
 0xbb0   :  { %8773 = vmatpush3.bf16.msra.mxu1 %v8831_v15 }
 0xbb1   :  { %8774 = vmatprep.subr.bf16.mxu1 %v8832_v8 }
 0xbb4   :  { %v7184_v4 = vld [vmem:[#allocation3 + $0x38] sm:$0xff]  ;;  %8775 = vmatpush3.bf16.msra.mxu1 %v8832_v8 }
 0xbb5   :  { %v7188_v39 = vpack.c.bf16 %v7184_v4, %v7183_v47  ;;  %8776 = vmatprep.subr.bf16.mxu1 %v8833_v16 }
 0xbb7   :  { %8721 = vmatmul.mubr.msk.bf16.gmra.mrb[84].mxu0 %vm1009_vm2, %v7188_v39 }
 0xbb8   :  { %8777 = vmatpush3.bf16.msra.mxu1 %v8833_v16  ;;  %v8655_v16 = vld [vmem:[%s11426_s11] ss:$0 sm:$0xff]  ;;  %s9137_s11 = smov [#allocation12]  }
 0xbb9   :  { %8778 = vmatprep.subr.bf16.mxu1 %v8834_v42  ;;  %s7762_s22 = sshll.u32 %s9137_s11, 4  ;;  %s7763_s22 = int_to_ptr.vmem [resolvable:$true] %s7762_s22 }
 0xbba   :  { %s9097_s28 = scalar_lea.vmem %s7763_s22, 1024  ;;  %p9102_p5 = scmp.lt.s32.totalorder %s7763_s22, %s7763_s22 }
 0xbbb   :  { %p9098_p4 = scmp.ne.s32.totalorder %s7763_s22, %s9097_s28  ;;  %p9103_p6 = scmp.lt.s32.totalorder %s9097_s28, %s9097_s28 }
 0xbbc   :  { %8779 = vmatpush3.bf16.msra.mxu1 %v8834_v42 }
 0xbbd   :  { %8780 = vmatprep.subr.bf16.mxu1 %v8835_v52  ;;  %p9104_p7 = por %p9103_p6, %p9102_p5 }
 0xbbf   :  { %p9105_p8 = pnand %p9104_p7, %p9098_p4 }
 0xbc0   :  { %8781 = vmatpush3.bf16.msra.mxu1 %v8835_v52 }
 0xbc1   :  { %8782 = vmatprep.subr.bf16.mxu1 %v8836_v2 }
 0xbc4   :  { %8783 = vmatpush3.bf16.msra.mxu1 %v8836_v2 }
 0xbc5   :  { %8784 = vmatprep.subr.bf16.mxu1 %v8837_v45 }
 0xbc8   :  { %8785 = vmatpush3.bf16.msra.mxu1 %v8837_v45 }
 0xbc9   :  { %8786 = vmatprep.subr.bf16.mxu1 %v8838_v23 }
 0xbcc   :  { %8787 = vmatpush3.bf16.msra.mxu1 %v8838_v23 }
 0xc82   :  { %v8742_v3 = vpop.f32.mrb[80].mxu1 }
 0xc83   :  { %v7431_v53 = vadd.f32 %v8742_v3, %v11383_v27  ;;  %v7422_v63 = vpop.f32.mrb[81].mxu1 }
 0xc84   :  { %v7423_v55 = vadd.f32 %v11383_v27, %v7422_v63  ;;  %v8743_v21 = vpop.f32.mrb[82].mxu1 }
 0xc85   :  { %v7434_v12 = vadd.f32 %v8743_v21, %v11383_v27  ;;  %v7425_v43 = vpop.f32.mrb[83].mxu1  ;;  %v7455_v34 = vmax.f32 %v7431_v53, 0.0 }
 0xc86   :  { %v7426_v61 = vadd.f32 %v11383_v27, %v7425_v43  ;;  %v7453_v37 = vmax.f32 %v7423_v55, 0.0 }
 0xc87   :  { %v7456_v30 = vmax.f32 %v7434_v12, 0.0 }
 0xc88   :  { %v7454_v57 = vmax.f32 %v7426_v61, 0.0 }
 0xc89   :  { %v7462_v48 = vpack.c.bf16 %v7456_v30, %v7455_v34 }
 0xc8a   :  { %v7461_v40 = vpack.c.bf16 %v7454_v57, %v7453_v37  ;;  %v8722_v50 = vpop.f32.mrb[84].mxu0 }
 0xc8b   :  { %v7299_v58 = vadd.f32 %v8722_v50, %v11371_v19  ;;  %v7290_v9 = vpop.f32.mrb[85].mxu0 }
 0xc8c   :  { %v7291_v6 = vadd.f32 %v11371_v19, %v7290_v9  ;;  %v8723_v35 = vpop.f32.mrb[86].mxu0  ;;  %8764 = vmatprep.mubr.bf16.mxu0 %v7461_v40 }
 0xc8d   :  { %v7302_v14 = vadd.f32 %v8723_v35, %v11371_v19  ;;  %v7293_v60 = vpop.f32.mrb[87].mxu0  ;;  %8765 = vmatmul.mubr.bf16.vlgmr.msra.gmra.mrb[88].mxu0 %v7462_v48  ;;  %v7311_v20 = vmax.f32 %v7299_v58, 0.0 }
 0xc8e   :  { %v7294_v26 = vadd.f32 %v11371_v19, %v7293_v60  ;;  %v7309_v41 = vmax.f32 %v7291_v6, 0.0 }
 0xc8f   :  { %v7312_v31 = vmax.f32 %v7302_v14, 0.0 }
 0xc90   :  { %v7310_v59 = vmax.f32 %v7294_v26, 0.0 }
 0xc91   :  { %v7316_v38 = vpack.c.bf16 %v7312_v31, %v7311_v20 }
 0xc92   :  { %v7315_v44 = vpack.c.bf16 %v7310_v59, %v7309_v41 }
 0xc94   :  { %8744 = vmatprep.mubr.bf16.mxu1 %v7315_v44 }
 0xc95   :  { %8745 = vmatmul.mubr.bf16.gmra.mrb[84].mxu1 %v7316_v38 }
 0xd60   :  { %v8766_v32 = vpop.f32.mrb[88].mxu0 }
 0xd61   :  { %v7579_v19 = vadd.f32 %v8766_v32, %v8646_v49  ;;  %v7570_v18 = vpop.f32.mrb[89].mxu0 }
 0xd62   :  { %v7571_v62 = vadd.f32 %v8646_v49, %v7570_v18  ;;  %v8767_v36 = vpop.f32.mrb[90].mxu0 }
 0xd63   :  { %v7582_v29 = vadd.f32 %v8767_v36, %v8646_v49  ;;  %v7573_v5 = vpop.f32.mrb[91].mxu0  ;;  %v7603_v56 = vmax.f32 %v7579_v19, 0.0 }
 0xd64   :  { %v7574_v11 = vadd.f32 %v8646_v49, %v7573_v5  ;;  %v7601_v54 = vmax.f32 %v7571_v62, 0.0 }
 0xd65   :  { %v7604_v25 = vmax.f32 %v7582_v29, 0.0 }
 0xd66   :  { %v7602_v28 = vmax.f32 %v7574_v11, 0.0 }
 0xd67   :  { %v7610_v10 = vpack.c.bf16 %v7604_v25, %v7603_v56 }
 0xd68   :  { %v7609_v0 = vpack.c.bf16 %v7602_v28, %v7601_v54  ;;  %v8746_v17 = vpop.f32.mrb[84].mxu1 }
 0xd69   :  { %v7447_v24 = vadd.f32 %v8746_v17, %v11383_v27  ;;  %v7438_v51 = vpop.f32.mrb[85].mxu1 }
 0xd6a   :  { %v7439_v7 = vadd.f32 %v11383_v27, %v7438_v51  ;;  %v8747_v33 = vpop.f32.mrb[86].mxu1  ;;  %8788 = vmatprep.mubr.bf16.mxu1 %v7609_v0 }
 0xd6b   :  { %v7450_v1 = vadd.f32 %v8747_v33, %v11383_v27  ;;  %v7441_v46 = vpop.f32.mrb[87].mxu1  ;;  %8789 = vmatmul.mubr.bf16.vlgmr.msra.gmra.mrb[88].mxu1 %v7610_v10  ;;  %v7459_v4 = vmax.f32 %v7447_v24, 0.0 }
 0xd6c   :  { %v7442_v47 = vadd.f32 %v11383_v27, %v7441_v46  ;;  %v7457_v22 = vmax.f32 %v7439_v7, 0.0 }
 0xd6d   :  { %v7460_v39 = vmax.f32 %v7450_v1, 0.0 }
 0xd6e   :  { %v7458_v13 = vmax.f32 %v7442_v47, 0.0 }
 0xd6f   :  { %v7464_v15 = vpack.c.bf16 %v7460_v39, %v7459_v4 }
 0xd70   :  { %v7463_v8 = vpack.c.bf16 %v7458_v13, %v7457_v22 }
 0xd72   :  { %8768 = vmatprep.mubr.bf16.mxu0 %v7463_v8 }
 0xd73   :  { %8769 = vmatmul.mubr.bf16.gmra.mrb[92].mxu0 %v7464_v15 }
 0xe3e   :  { %v8790_v42 = vpop.f32.mrb[88].mxu1 }
 0xe3f   :  { %v7727_v52 = vadd.f32 %v8790_v42, %v8655_v16  ;;  %v7718_v2 = vpop.f32.mrb[89].mxu1 }
 0xe40   :  { %v7719_v3 = vadd.f32 %v8655_v16, %v7718_v2  ;;  %v8791_v53 = vpop.f32.mrb[90].mxu1 }
 0xe41   :  { %7751 = vst [vmem:[#allocation12 + $0x10] sm:$0xff] %v7727_v52  ;;  %v7730_v63 = vadd.f32 %v8791_v53, %v8655_v16  ;;  %v7721_v27 = vpop.f32.mrb[91].mxu1 }
 0xe42   :  { %7749 = vst [vmem:[#allocation12] sm:$0xff] %v7719_v3  ;;  %v7722_v55 = vadd.f32 %v8655_v16, %v7721_v27 }
 0xe43   :  { %7752 = vst [vmem:[#allocation12 + $0x18] sm:$0xff] %v7730_v63 }
 0xe44   :  { %7750 = vst [vmem:[#allocation12 + $0x8] sm:$0xff] %v7722_v55 }
 0xe46   :  { %v8770_v21 = vpop.f32.mrb[92].mxu0 }
 0xe47   :  { %v7595_v12 = vadd.f32 %v8770_v21, %v8646_v49  ;;  %v7586_v43 = vpop.f32.mrb[93].mxu0 }
 0xe48   :  { %v7587_v61 = vadd.f32 %v8646_v49, %v7586_v43  ;;  %v8771_v34 = vpop.f32.mrb[94].mxu0 }
 0xe49   :  { %v7598_v30 = vadd.f32 %v8771_v34, %v8646_v49  ;;  %v7589_v37 = vpop.f32.mrb[95].mxu0  ;;  %v7607_v48 = vmax.f32 %v7595_v12, 0.0 }
 0xe4a   :  { %v7590_v57 = vadd.f32 %v8646_v49, %v7589_v37  ;;  %v7605_v50 = vmax.f32 %v7587_v61, 0.0 }
 0xe4b   :  { %v7608_v40 = vmax.f32 %v7598_v30, 0.0 }
 0xe4c   :  { %v7606_v58 = vmax.f32 %v7590_v57, 0.0 }
 0xe4d   :  { %v7612_v9 = vpack.c.bf16 %v7608_v40, %v7607_v48 }
 0xe4e   :  { %v7611_v6 = vpack.c.bf16 %v7606_v58, %v7605_v50 }
 0xe50   :  { %8792 = vmatprep.mubr.bf16.mxu1 %v7611_v6 }
 0xe51   :  { %8793 = vmatmul.mubr.bf16.gmra.mrb[92].mxu1 %v7612_v9 }
 0xf24   :  { %v8794_v35 = vpop.f32.mrb[92].mxu1 }
 0xf25   :  { %v7743_v14 = vadd.f32 %v8794_v35, %v8655_v16  ;;  %v7734_v60 = vpop.f32.mrb[93].mxu1 }
 0xf26   :  { %v7735_v26 = vadd.f32 %v8655_v16, %v7734_v60  ;;  %v8795_v20 = vpop.f32.mrb[94].mxu1 }
 0xf27   :  { %7755 = vst [vmem:[#allocation12 + $0x30] sm:$0xff] %v7743_v14  ;;  %v7746_v31 = vadd.f32 %v8795_v20, %v8655_v16  ;;  %v7737_v41 = vpop.f32.mrb[95].mxu1 }
 0xf28   :  { %7753 = vst [vmem:[#allocation12 + $0x20] sm:$0xff] %v7735_v26  ;;  %v7738_v59 = vadd.f32 %v8655_v16, %v7737_v41 }
 0xf29   :  { %7756 = vst [vmem:[#allocation12 + $0x38] sm:$0xff] %v7746_v31 }
 0xf2a   :  { %7754 = vst [vmem:[#allocation12 + $0x28] sm:$0xff] %v7738_v59 }
 0xf2b   :  { %9108 = shalt.err (!%p9105_p8)
}
 0xf2c   :  { %s9109_s16 = scalar_lea.hbm %s11427_s12, 1024 }
 0xf2d   :  { %p9110_p9 = scmp.ne.s32.totalorder %s11427_s12, %s9109_s16  ;;  %p9113_p10 = scmp.lt.u32.totalorder %s9109_s16, %s11427_s12 }
 0xf2f   :  { %p9115_p11 = pnand %p9113_p10, %p9110_p9 }
 0xf31   :  { %9118 = shalt.err (!%p9115_p11)
}
 0xf32   :  { %s9138_s15 = smov 128   ;;  %s9139_s10 = smov 8  }
 0xf33   :  { %7768 = dma.vmem_to_hbm [thread:$0]  %s7763_s22, 1024, %s11427_s12, [#allocation6], %s9138_s15, %s9138_s15, %s9139_s10  }
 0xf34   :  { %9125 = dma.done.wait [#allocation6], 1024  }
 0xf35   :  { %9126 = vsyncadd [#allocation6], 4294966272 }
 0xf36   :  { %7772 = vsyncpa [#allocation5], 1 }
 0xf37   :  { %7773 = vsyncpa [#allocation8], 1 }
 0xf38   :  { %7774 = vsyncpa [#allocation11], 1 }
 0xf39   :  { %7775 = vsyncpa [#allocation6], 1 }

</bundles_post_ra>
